<compile_context>
chip_gen: v6e
topology: v6e:2x2x1
jax: 0.10.0
libtpu: 0.0.40
codegen_flags: <defaults>
</compile_context>

<pallas_src>
import math

import jax
import jax.numpy as jnp
from jax.experimental import pallas as pl
from jax.experimental.pallas import tpu as pltpu

# ---- config (ViT-tiny-like; image / depth reduced for a small synthetic run) ----
IMG = 32                     # ViT-tiny uses 224; small here (keeps patch grid 2x2)
PATCH = 16
HIDDEN = 192                 # fixed by fc head Linear(192, 128)
NUM_HEADS = 3
HEAD_DIM = HIDDEN // NUM_HEADS   # 64
MLP_DIM = 4 * HIDDEN             # 768
NUM_LAYERS = 2               # ViT-tiny has 12 layers; 2 used for the small example
NUM_CLASSES = 4              # OCTMNIST has 4 labels
LN_EPS = 1e-12
BN_EPS = 1e-5

# MXU operand dtype for the weight matmuls (accumulation is always f32).
# Set to jnp.float32 to recover bit-exact f32 matmul semantics.
MXU_DTYPE = jnp.bfloat16


# ----------------------------- fused Pallas kernel -----------------------------

def _fused_vit_kernel(ptok_ref, embias_ref, maskb_ref, pool_ref, patch_w_ref,
                      ln1_g_ref, ln1_b_ref, wqkv_ref, bqkv_ref, wo_ref, bo_ref,
                      ln2_g_ref, ln2_b_ref, wfc1_ref, bfc1_ref, wfc2_ref, bfc2_ref,
                      fc1_w_ref, fc1_b_ref, bn_scale_ref, bn_shift_ref,
                      fc2_w_ref, fc2_b_ref, o_ref):
    f32 = jnp.float32
    scale = 1.0 / math.sqrt(HEAD_DIM)

    def layer_norm(x, g, b):
        mu = jnp.mean(x, axis=-1, keepdims=True)
        var = jnp.mean(jnp.square(x - mu), axis=-1, keepdims=True)
        return (x - mu) * jax.lax.rsqrt(var + LN_EPS) * g + b

    # ---- patch embedding + cls token + positional embedding ----
    # ptok has a zero row per image in the CLS slot; embias carries
    # (cls_token + pos[0]) for CLS rows and (patch_bias + pos[1:]) for patch rows.
    h = jnp.dot(ptok_ref[...].astype(MXU_DTYPE), patch_w_ref[...],
                preferred_element_type=f32) + embias_ref[...]           # (B*S, D) f32
    maskb = maskb_ref[...]                                              # (B*S, B*S)

    # ---- pre-LN transformer blocks (hidden_states[-1]: no final layernorm) ----
    for l in range(NUM_LAYERS):
        # --- self-attention, fused QKV projection ---
        hn = layer_norm(h, ln1_g_ref[l], ln1_b_ref[l])
        qkv = jnp.dot(hn.astype(MXU_DTYPE), wqkv_ref[l],
                      preferred_element_type=f32) + bqkv_ref[l]         # (B*S, 3D)
        wo = wo_ref[l]                                                  # (D, D)
        attn = jnp.zeros(h.shape, f32)
        for hh in range(NUM_HEADS):
            lo = hh * HEAD_DIM
            q = qkv[:, lo:lo + HEAD_DIM]                                # (B*S, 64)
            k = qkv[:, HIDDEN + lo:HIDDEN + lo + HEAD_DIM]
            v = qkv[:, 2 * HIDDEN + lo:2 * HIDDEN + lo + HEAD_DIM]
            # scores over all tokens; block-diagonal mask keeps attention per-image
            s = jax.lax.dot_general(q, k, (((1,), (1,)), ((), ())),
                                    preferred_element_type=f32) * scale + maskb
            s = s - jnp.max(s, axis=-1, keepdims=True)
            p = jnp.exp(s)
            p = p / jnp.sum(p, axis=-1, keepdims=True)
            oh = jnp.dot(p, v, preferred_element_type=f32)              # (B*S, 64)
            # fold the output projection of this head directly into the accumulator
            attn = attn + jnp.dot(oh.astype(MXU_DTYPE), wo[lo:lo + HEAD_DIM, :],
                                  preferred_element_type=f32)
        h = h + attn + bo_ref[l]

        # --- MLP ---
        hn2 = layer_norm(h, ln2_g_ref[l], ln2_b_ref[l])
        mid = jnp.dot(hn2.astype(MXU_DTYPE), wfc1_ref[l],
                      preferred_element_type=f32) + bfc1_ref[l]
        # TODO(synk): HF ViT uses exact (erf) GELU; tanh approximation used here.
        mid = jax.nn.gelu(mid, approximate=True)
        h = h + jnp.dot(mid.astype(MXU_DTYPE), wfc2_ref[l],
                        preferred_element_type=f32) + bfc2_ref[l]

    # ---- head: mean pool over tokens (incl. CLS) -> fc1 -> BN(eval) -> ReLU -> fc2 ----
    feats = jnp.dot(pool_ref[...], h, preferred_element_type=f32)       # (B, D)
    z = jnp.dot(feats, fc1_w_ref[...], preferred_element_type=f32) + fc1_b_ref[...]
    z = z * bn_scale_ref[...] + bn_shift_ref[...]                       # BatchNorm1d (eval)
    z = jnp.maximum(z, 0.0)                                             # ReLU
    # TODO(synk): Dropout(0.5) is identity in eval mode; training-mode RNG drop not kernelized.
    o_ref[...] = jnp.dot(z, fc2_w_ref[...], preferred_element_type=f32) + fc2_b_ref[...]


# ----------------------------- model forward -----------------------------

def forward(packed, x):
    # x: (B, 3, H, W) NCHW
    B, C, H, W = x.shape
    nh, nw = H // PATCH, W // PATCH
    NP = nh * nw
    S = NP + 1
    BS = B * S

    # patch extraction == Conv2d(3, 192, k=16, s=16); flatten order (C, ph, pw)
    # matches torch conv weight (192, 3, 16, 16).reshape(192, -1)
    patches = x.reshape(B, C, nh, PATCH, nw, PATCH)
    patches = patches.transpose(0, 2, 4, 1, 3, 5).reshape(B, NP, C * PATCH * PATCH)
    # zero row per image in the CLS slot; the CLS embedding is injected via embias
    ptok = jnp.concatenate(
        [jnp.zeros((B, 1, C * PATCH * PATCH), jnp.float32), patches], axis=1
    ).reshape(BS, C * PATCH * PATCH)

    # per-token additive bias (cls+pos for CLS rows, patch_bias+pos for patch rows)
    embias = jnp.broadcast_to(packed["tok_bias"][None], (B, S, HIDDEN)).reshape(BS, HIDDEN)

    # block-diagonal additive attention mask and per-image mean-pool matrix
    tok_batch = jnp.arange(BS, dtype=jnp.int32) // S
    maskb = jnp.where(tok_batch[:, None] == tok_batch[None, :], 0.0, -1e30
                      ).astype(jnp.float32)
    pool = jnp.where(jnp.arange(B, dtype=jnp.int32)[:, None] == tok_batch[None, :],
                     1.0 / S, 0.0).astype(jnp.float32)

    args = (ptok, embias, maskb, pool,
            packed["patch_w"],
            packed["ln1_g"], packed["ln1_b"], packed["wqkv"], packed["bqkv"],
            packed["wo"], packed["bo"], packed["ln2_g"], packed["ln2_b"],
            packed["wfc1"], packed["bfc1"], packed["wfc2"], packed["bfc2"],
            packed["fc1_w"], packed["fc1_b"], packed["bn_scale"], packed["bn_shift"],
            packed["fc2_w"], packed["fc2_b"])

    full = lambda a: pl.BlockSpec(a.shape, lambda: (0,) * a.ndim)
    return pl.pallas_call(
        _fused_vit_kernel,
        out_shape=jax.ShapeDtypeStruct((B, NUM_CLASSES), jnp.float32),
        in_specs=[full(a) for a in args],
        out_specs=pl.BlockSpec((B, NUM_CLASSES), lambda: (0, 0)),
        compiler_params=pltpu.CompilerParams(vmem_limit_bytes=32 * 1024 * 1024),
    )(*args)


# ----------------------------- parameter init / packing -----------------------------

def init_params(key):
    counter = [0]

    def nk():
        counter[0] += 1
        return jax.random.fold_in(key, counter[0])

    def nrm(shape, scale=0.02):
        return scale * jax.random.normal(nk(), shape, dtype=jnp.float32)

    num_patches = (IMG // PATCH) ** 2
    params = {
        "patch_w": nrm((3 * PATCH * PATCH, HIDDEN)),
        "patch_b": jnp.zeros((HIDDEN,), jnp.float32),
        "cls_token": nrm((1, 1, HIDDEN)),
        "pos_embed": nrm((1, num_patches + 1, HIDDEN)),
        "fc1_w": nrm((HIDDEN, 128)),
        "fc1_b": jnp.zeros((128,), jnp.float32),
        "bn_g": jnp.ones((128,), jnp.float32),
        "bn_b": jnp.zeros((128,), jnp.float32),
        "bn_rm": jnp.zeros((128,), jnp.float32),
        "bn_rv": jnp.ones((128,), jnp.float32),
        "fc2_w": nrm((128, NUM_CLASSES)),
        "fc2_b": jnp.zeros((NUM_CLASSES,), jnp.float32),
        "layers": [],
    }
    for _ in range(NUM_LAYERS):
        params["layers"].append({
            "ln1_g": jnp.ones((HIDDEN,), jnp.float32),
            "ln1_b": jnp.zeros((HIDDEN,), jnp.float32),
            "wq": nrm((HIDDEN, HIDDEN)), "bq": jnp.zeros((HIDDEN,), jnp.float32),
            "wk": nrm((HIDDEN, HIDDEN)), "bk": jnp.zeros((HIDDEN,), jnp.float32),
            "wv": nrm((HIDDEN, HIDDEN)), "bv": jnp.zeros((HIDDEN,), jnp.float32),
            "wo": nrm((HIDDEN, HIDDEN)), "bo": jnp.zeros((HIDDEN,), jnp.float32),
            "ln2_g": jnp.ones((HIDDEN,), jnp.float32),
            "ln2_b": jnp.zeros((HIDDEN,), jnp.float32),
            "w_fc1": nrm((HIDDEN, MLP_DIM)), "b_fc1": jnp.zeros((MLP_DIM,), jnp.float32),
            "w_fc2": nrm((MLP_DIM, HIDDEN)), "b_fc2": jnp.zeros((HIDDEN,), jnp.float32),
        })
    return params


def pack_params(p):
    """One-time packing: stack per-layer weights, fuse Wq|Wk|Wv, fold BN running
    stats into an affine scale/shift (eval-mode exact), fold patch bias / cls token
    into a per-token additive embedding bias, and cast matmul weights to MXU_DTYPE."""
    L = p["layers"]
    nl = len(L)

    def stack(key, new_shape=None, dtype=jnp.float32):
        a = jnp.stack([layer[key] for layer in L]).astype(dtype)
        return a.reshape(new_shape) if new_shape is not None else a

    # tok_bias[0]  = cls_token + pos[0]
    # tok_bias[1:] = patch_bias + pos[1:]
    tok_bias = jnp.concatenate(
        [p["cls_token"].reshape(1, HIDDEN) + p["pos_embed"][0, 0:1, :],
         p["pos_embed"][0, 1:, :] + p["patch_b"].reshape(1, HIDDEN)], axis=0)

    bn_scale = p["bn_g"] * jax.lax.rsqrt(p["bn_rv"] + BN_EPS)
    bn_shift = p["bn_b"] - p["bn_rm"] * bn_scale

    return {
        "tok_bias": tok_bias,
        "patch_w": p["patch_w"].astype(MXU_DTYPE),
        "ln1_g": stack("ln1_g", (nl, 1, HIDDEN)),
        "ln1_b": stack("ln1_b", (nl, 1, HIDDEN)),
        "wqkv": jnp.stack([jnp.concatenate([l["wq"], l["wk"], l["wv"]], axis=1)
                           for l in L]).astype(MXU_DTYPE),
        "bqkv": jnp.stack([jnp.concatenate([l["bq"], l["bk"], l["bv"]], axis=0)
                           for l in L]).reshape(nl, 1, 3 * HIDDEN),
        "wo": stack("wo", dtype=MXU_DTYPE),
        "bo": stack("bo", (nl, 1, HIDDEN)),
        "ln2_g": stack("ln2_g", (nl, 1, HIDDEN)),
        "ln2_b": stack("ln2_b", (nl, 1, HIDDEN)),
        "wfc1": stack("w_fc1", dtype=MXU_DTYPE),
        "bfc1": stack("b_fc1", (nl, 1, MLP_DIM)),
        "wfc2": stack("w_fc2", dtype=MXU_DTYPE),
        "bfc2": stack("b_fc2", (nl, 1, HIDDEN)),
        # tiny head matmuls stay f32 (negligible cost, avoids drift on logits)
        "fc1_w": p["fc1_w"],
        "fc1_b": p["fc1_b"].reshape(1, 128),
        "bn_scale": bn_scale.reshape(1, 128),
        "bn_shift": bn_shift.reshape(1, 128),
        "fc2_w": p["fc2_w"],
        "fc2_b": p["fc2_b"].reshape(1, NUM_CLASSES),
    }


if __name__ == "__main__":
    x = jax.random.normal(jax.random.PRNGKey(0), (2, 3, IMG, IMG), dtype=jnp.float32)
    params = init_params(jax.random.PRNGKey(42))
    packed = pack_params(params)
    out = jax.jit(forward)(packed, x)
    out = jax.block_until_ready(out)
    assert out.shape == (2, NUM_CLASSES) and out.dtype == jnp.float32
    print("KERNEL_OK")
</pallas_src>

<mosaic_0001>
module attributes {stable_mosaic.version = 11 : i64} {
  func.func @_fused_vit_kernel(%arg0: memref<10x768xf32, #tpu.memory_space<vmem>>, %arg1: memref<10x192xf32, #tpu.memory_space<vmem>>, %arg2: memref<10x10xf32, #tpu.memory_space<vmem>>, %arg3: memref<2x10xf32, #tpu.memory_space<vmem>>, %arg4: memref<768x192xbf16, #tpu.memory_space<vmem>>, %arg5: memref<2x1x192xf32, #tpu.memory_space<vmem>>, %arg6: memref<2x1x192xf32, #tpu.memory_space<vmem>>, %arg7: memref<2x192x576xbf16, #tpu.memory_space<vmem>>, %arg8: memref<2x1x576xf32, #tpu.memory_space<vmem>>, %arg9: memref<2x192x192xbf16, #tpu.memory_space<vmem>>, %arg10: memref<2x1x192xf32, #tpu.memory_space<vmem>>, %arg11: memref<2x1x192xf32, #tpu.memory_space<vmem>>, %arg12: memref<2x1x192xf32, #tpu.memory_space<vmem>>, %arg13: memref<2x192x768xbf16, #tpu.memory_space<vmem>>, %arg14: memref<2x1x768xf32, #tpu.memory_space<vmem>>, %arg15: memref<2x768x192xbf16, #tpu.memory_space<vmem>>, %arg16: memref<2x1x192xf32, #tpu.memory_space<vmem>>, %arg17: memref<192x128xf32, #tpu.memory_space<vmem>>, %arg18: memref<1x128xf32, #tpu.memory_space<vmem>>, %arg19: memref<1x128xf32, #tpu.memory_space<vmem>>, %arg20: memref<1x128xf32, #tpu.memory_space<vmem>>, %arg21: memref<128x4xf32, #tpu.memory_space<vmem>>, %arg22: memref<1x4xf32, #tpu.memory_space<vmem>>, %arg23: memref<2x4xf32, #tpu.memory_space<vmem>>) attributes {dimension_semantics = [], scalar_prefetch = 0 : i64, scratch_operands = 0 : i64, tpu.core_type = #tpu.core_type<tc>} {
    %c0 = arith.constant 0 : index
    %c0_0 = arith.constant 0 : index
    %0 = vector.load %arg0[%c0, %c0_0] : memref<10x768xf32, #tpu.memory_space<vmem>>, vector<10x768xf32>
    %1 = arith.truncf %0 : vector<10x768xf32> to vector<10x768xbf16>
    %c0_1 = arith.constant 0 : index
    %c0_2 = arith.constant 0 : index
    %2 = vector.load %arg4[%c0_1, %c0_2] : memref<768x192xbf16, #tpu.memory_space<vmem>>, vector<768x192xbf16>
    %cst = arith.constant dense<0.000000e+00> : vector<10x192xf32>
    %3 = tpu.matmul %1, %2, %cst {dimension_numbers = #tpu.dot_dimension_numbers<[1], [0], [0], [1], [0, 0, 1, 1], [], []>} : vector<10x768xbf16>, vector<768x192xbf16>, vector<10x192xf32> -> vector<10x192xf32>
    %c0_3 = arith.constant 0 : index
    %c0_4 = arith.constant 0 : index
    %4 = vector.load %arg1[%c0_3, %c0_4] : memref<10x192xf32, #tpu.memory_space<vmem>>, vector<10x192xf32>
    %5 = arith.addf %3, %4 : vector<10x192xf32>
    %c0_5 = arith.constant 0 : index
    %c0_6 = arith.constant 0 : index
    %6 = vector.load %arg2[%c0_5, %c0_6] : memref<10x10xf32, #tpu.memory_space<vmem>>, vector<10x10xf32>
    %c0_7 = arith.constant 0 : index
    %c0_8 = arith.constant 0 : index
    %c0_9 = arith.constant 0 : index
    %7 = vector.load %arg5[%c0_7, %c0_8, %c0_9] : memref<2x1x192xf32, #tpu.memory_space<vmem>>, vector<1x1x192xf32>
    %8 = vector.shape_cast %7 : vector<1x1x192xf32> to vector<1x192xf32>
    %c0_10 = arith.constant 0 : index
    %c0_11 = arith.constant 0 : index
    %c0_12 = arith.constant 0 : index
    %9 = vector.load %arg6[%c0_10, %c0_11, %c0_12] : memref<2x1x192xf32, #tpu.memory_space<vmem>>, vector<1x1x192xf32>
    %10 = vector.shape_cast %9 : vector<1x1x192xf32> to vector<1x192xf32>
    %cst_13 = arith.constant dense<0.000000e+00> : vector<10xf32>
    %11 = vector.multi_reduction <add>, %5, %cst_13 [1] : vector<10x192xf32> to vector<10xf32>
    %12 = vector.shape_cast %11 : vector<10xf32> to vector<10x1xf32>
    %cst_14 = arith.constant 1.920000e+02 : f32
    %13 = vector.broadcast %cst_14 : f32 to vector<10x1xf32>
    %14 = arith.divf %12, %13 : vector<10x1xf32>
    %15 = vector.broadcast %14 : vector<10x1xf32> to vector<10x192xf32>
    %16 = arith.subf %5, %15 : vector<10x192xf32>
    %17 = arith.mulf %16, %16 : vector<10x192xf32>
    %cst_15 = arith.constant dense<0.000000e+00> : vector<10xf32>
    %18 = vector.multi_reduction <add>, %17, %cst_15 [1] : vector<10x192xf32> to vector<10xf32>
    %19 = vector.shape_cast %18 : vector<10xf32> to vector<10x1xf32>
    %cst_16 = arith.constant 1.920000e+02 : f32
    %20 = vector.broadcast %cst_16 : f32 to vector<10x1xf32>
    %21 = arith.divf %19, %20 : vector<10x1xf32>
    %22 = vector.broadcast %14 : vector<10x1xf32> to vector<10x192xf32>
    %23 = arith.subf %5, %22 : vector<10x192xf32>
    %cst_17 = arith.constant 9.99999996E-13 : f32
    %24 = vector.broadcast %cst_17 : f32 to vector<10x1xf32>
    %25 = arith.addf %21, %24 : vector<10x1xf32>
    %26 = math.rsqrt %25 : vector<10x1xf32>
    %27 = vector.broadcast %26 : vector<10x1xf32> to vector<10x192xf32>
    %28 = arith.mulf %23, %27 : vector<10x192xf32>
    %29 = vector.broadcast %8 : vector<1x192xf32> to vector<10x192xf32>
    %30 = arith.mulf %28, %29 : vector<10x192xf32>
    %31 = vector.broadcast %10 : vector<1x192xf32> to vector<10x192xf32>
    %32 = arith.addf %30, %31 : vector<10x192xf32>
    %33 = arith.truncf %32 : vector<10x192xf32> to vector<10x192xbf16>
    %c0_18 = arith.constant 0 : index
    %c0_19 = arith.constant 0 : index
    %c0_20 = arith.constant 0 : index
    %34 = vector.load %arg7[%c0_18, %c0_19, %c0_20] : memref<2x192x576xbf16, #tpu.memory_space<vmem>>, vector<1x192x576xbf16>
    %35 = vector.shape_cast %34 : vector<1x192x576xbf16> to vector<192x576xbf16>
    %cst_21 = arith.constant dense<0.000000e+00> : vector<10x576xf32>
    %36 = tpu.matmul %33, %35, %cst_21 {dimension_numbers = #tpu.dot_dimension_numbers<[1], [0], [0], [1], [0, 0, 1, 1], [], []>} : vector<10x192xbf16>, vector<192x576xbf16>, vector<10x576xf32> -> vector<10x576xf32>
    %c0_22 = arith.constant 0 : index
    %c0_23 = arith.constant 0 : index
    %c0_24 = arith.constant 0 : index
    %37 = vector.load %arg8[%c0_22, %c0_23, %c0_24] : memref<2x1x576xf32, #tpu.memory_space<vmem>>, vector<1x1x576xf32>
    %38 = vector.shape_cast %37 : vector<1x1x576xf32> to vector<1x576xf32>
    %39 = vector.broadcast %38 : vector<1x576xf32> to vector<10x576xf32>
    %40 = arith.addf %36, %39 : vector<10x576xf32>
    %c0_25 = arith.constant 0 : index
    %c0_26 = arith.constant 0 : index
    %c0_27 = arith.constant 0 : index
    %41 = vector.load %arg9[%c0_25, %c0_26, %c0_27] : memref<2x192x192xbf16, #tpu.memory_space<vmem>>, vector<1x192x192xbf16>
    %42 = vector.shape_cast %41 : vector<1x192x192xbf16> to vector<192x192xbf16>
    %cst_28 = arith.constant 0.000000e+00 : f32
    %43 = vector.broadcast %cst_28 : f32 to vector<10x192xf32>
    %44 = vector.extract_strided_slice %40 {offsets = [0, 0], sizes = [10, 64], strides = [1, 1]} : vector<10x576xf32> to vector<10x64xf32>
    %45 = vector.extract_strided_slice %40 {offsets = [0, 192], sizes = [10, 64], strides = [1, 1]} : vector<10x576xf32> to vector<10x64xf32>
    %46 = vector.extract_strided_slice %40 {offsets = [0, 384], sizes = [10, 64], strides = [1, 1]} : vector<10x576xf32> to vector<10x64xf32>
    %cst_29 = arith.constant dense<0.000000e+00> : vector<10x10xf32>
    %47 = tpu.matmul %44, %45, %cst_29 {dimension_numbers = #tpu.dot_dimension_numbers<[1], [1], [0], [0], [0, 0, 1, 0], [], []>} : vector<10x64xf32>, vector<10x64xf32>, vector<10x10xf32> -> vector<10x10xf32>
    %cst_30 = arith.constant 1.250000e-01 : f32
    %48 = vector.broadcast %cst_30 : f32 to vector<10x10xf32>
    %49 = arith.mulf %47, %48 : vector<10x10xf32>
    %50 = arith.addf %49, %6 : vector<10x10xf32>
    %cst_31 = arith.constant dense<0xFF800000> : vector<10xf32>
    %51 = vector.multi_reduction <maximumf>, %50, %cst_31 [1] : vector<10x10xf32> to vector<10xf32>
    %52 = vector.shape_cast %51 : vector<10xf32> to vector<10x1xf32>
    %53 = vector.broadcast %52 : vector<10x1xf32> to vector<10x10xf32>
    %54 = arith.subf %50, %53 : vector<10x10xf32>
    %55 = math.exp %54 : vector<10x10xf32>
    %cst_32 = arith.constant dense<0.000000e+00> : vector<10xf32>
    %56 = vector.multi_reduction <add>, %55, %cst_32 [1] : vector<10x10xf32> to vector<10xf32>
    %57 = vector.shape_cast %56 : vector<10xf32> to vector<10x1xf32>
    %58 = vector.broadcast %57 : vector<10x1xf32> to vector<10x10xf32>
    %59 = arith.divf %55, %58 : vector<10x10xf32>
    %cst_33 = arith.constant dense<0.000000e+00> : vector<10x64xf32>
    %60 = tpu.matmul %59, %46, %cst_33 {dimension_numbers = #tpu.dot_dimension_numbers<[1], [0], [0], [1], [0, 0, 1, 1], [], []>} : vector<10x10xf32>, vector<10x64xf32>, vector<10x64xf32> -> vector<10x64xf32>
    %61 = arith.truncf %60 : vector<10x64xf32> to vector<10x64xbf16>
    %62 = vector.extract_strided_slice %42 {offsets = [0, 0], sizes = [64, 192], strides = [1, 1]} : vector<192x192xbf16> to vector<64x192xbf16>
    %cst_34 = arith.constant dense<0.000000e+00> : vector<10x192xf32>
    %63 = tpu.matmul %61, %62, %cst_34 {dimension_numbers = #tpu.dot_dimension_numbers<[1], [0], [0], [1], [0, 0, 1, 1], [], []>} : vector<10x64xbf16>, vector<64x192xbf16>, vector<10x192xf32> -> vector<10x192xf32>
    %64 = arith.addf %43, %63 : vector<10x192xf32>
    %65 = vector.extract_strided_slice %40 {offsets = [0, 64], sizes = [10, 64], strides = [1, 1]} : vector<10x576xf32> to vector<10x64xf32>
    %66 = vector.extract_strided_slice %40 {offsets = [0, 256], sizes = [10, 64], strides = [1, 1]} : vector<10x576xf32> to vector<10x64xf32>
    %67 = vector.extract_strided_slice %40 {offsets = [0, 448], sizes = [10, 64], strides = [1, 1]} : vector<10x576xf32> to vector<10x64xf32>
    %cst_35 = arith.constant dense<0.000000e+00> : vector<10x10xf32>
    %68 = tpu.matmul %65, %66, %cst_35 {dimension_numbers = #tpu.dot_dimension_numbers<[1], [1], [0], [0], [0, 0, 1, 0], [], []>} : vector<10x64xf32>, vector<10x64xf32>, vector<10x10xf32> -> vector<10x10xf32>
    %cst_36 = arith.constant 1.250000e-01 : f32
    %69 = vector.broadcast %cst_36 : f32 to vector<10x10xf32>
    %70 = arith.mulf %68, %69 : vector<10x10xf32>
    %71 = arith.addf %70, %6 : vector<10x10xf32>
    %cst_37 = arith.constant dense<0xFF800000> : vector<10xf32>
    %72 = vector.multi_reduction <maximumf>, %71, %cst_37 [1] : vector<10x10xf32> to vector<10xf32>
    %73 = vector.shape_cast %72 : vector<10xf32> to vector<10x1xf32>
    %74 = vector.broadcast %73 : vector<10x1xf32> to vector<10x10xf32>
    %75 = arith.subf %71, %74 : vector<10x10xf32>
    %76 = math.exp %75 : vector<10x10xf32>
    %cst_38 = arith.constant dense<0.000000e+00> : vector<10xf32>
    %77 = vector.multi_reduction <add>, %76, %cst_38 [1] : vector<10x10xf32> to vector<10xf32>
    %78 = vector.shape_cast %77 : vector<10xf32> to vector<10x1xf32>
    %79 = vector.broadcast %78 : vector<10x1xf32> to vector<10x10xf32>
    %80 = arith.divf %76, %79 : vector<10x10xf32>
    %cst_39 = arith.constant dense<0.000000e+00> : vector<10x64xf32>
    %81 = tpu.matmul %80, %67, %cst_39 {dimension_numbers = #tpu.dot_dimension_numbers<[1], [0], [0], [1], [0, 0, 1, 1], [], []>} : vector<10x10xf32>, vector<10x64xf32>, vector<10x64xf32> -> vector<10x64xf32>
    %82 = arith.truncf %81 : vector<10x64xf32> to vector<10x64xbf16>
    %83 = vector.extract_strided_slice %42 {offsets = [64, 0], sizes = [64, 192], strides = [1, 1]} : vector<192x192xbf16> to vector<64x192xbf16>
    %cst_40 = arith.constant dense<0.000000e+00> : vector<10x192xf32>
    %84 = tpu.matmul %82, %83, %cst_40 {dimension_numbers = #tpu.dot_dimension_numbers<[1], [0], [0], [1], [0, 0, 1, 1], [], []>} : vector<10x64xbf16>, vector<64x192xbf16>, vector<10x192xf32> -> vector<10x192xf32>
    %85 = arith.addf %64, %84 : vector<10x192xf32>
    %86 = vector.extract_strided_slice %40 {offsets = [0, 128], sizes = [10, 64], strides = [1, 1]} : vector<10x576xf32> to vector<10x64xf32>
    %87 = vector.extract_strided_slice %40 {offsets = [0, 320], sizes = [10, 64], strides = [1, 1]} : vector<10x576xf32> to vector<10x64xf32>
    %88 = vector.extract_strided_slice %40 {offsets = [0, 512], sizes = [10, 64], strides = [1, 1]} : vector<10x576xf32> to vector<10x64xf32>
    %cst_41 = arith.constant dense<0.000000e+00> : vector<10x10xf32>
    %89 = tpu.matmul %86, %87, %cst_41 {dimension_numbers = #tpu.dot_dimension_numbers<[1], [1], [0], [0], [0, 0, 1, 0], [], []>} : vector<10x64xf32>, vector<10x64xf32>, vector<10x10xf32> -> vector<10x10xf32>
    %cst_42 = arith.constant 1.250000e-01 : f32
    %90 = vector.broadcast %cst_42 : f32 to vector<10x10xf32>
    %91 = arith.mulf %89, %90 : vector<10x10xf32>
    %92 = arith.addf %91, %6 : vector<10x10xf32>
    %cst_43 = arith.constant dense<0xFF800000> : vector<10xf32>
    %93 = vector.multi_reduction <maximumf>, %92, %cst_43 [1] : vector<10x10xf32> to vector<10xf32>
    %94 = vector.shape_cast %93 : vector<10xf32> to vector<10x1xf32>
    %95 = vector.broadcast %94 : vector<10x1xf32> to vector<10x10xf32>
    %96 = arith.subf %92, %95 : vector<10x10xf32>
    %97 = math.exp %96 : vector<10x10xf32>
    %cst_44 = arith.constant dense<0.000000e+00> : vector<10xf32>
    %98 = vector.multi_reduction <add>, %97, %cst_44 [1] : vector<10x10xf32> to vector<10xf32>
    %99 = vector.shape_cast %98 : vector<10xf32> to vector<10x1xf32>
    %100 = vector.broadcast %99 : vector<10x1xf32> to vector<10x10xf32>
    %101 = arith.divf %97, %100 : vector<10x10xf32>
    %cst_45 = arith.constant dense<0.000000e+00> : vector<10x64xf32>
    %102 = tpu.matmul %101, %88, %cst_45 {dimension_numbers = #tpu.dot_dimension_numbers<[1], [0], [0], [1], [0, 0, 1, 1], [], []>} : vector<10x10xf32>, vector<10x64xf32>, vector<10x64xf32> -> vector<10x64xf32>
    %103 = arith.truncf %102 : vector<10x64xf32> to vector<10x64xbf16>
    %104 = vector.extract_strided_slice %42 {offsets = [128, 0], sizes = [64, 192], strides = [1, 1]} : vector<192x192xbf16> to vector<64x192xbf16>
    %cst_46 = arith.constant dense<0.000000e+00> : vector<10x192xf32>
    %105 = tpu.matmul %103, %104, %cst_46 {dimension_numbers = #tpu.dot_dimension_numbers<[1], [0], [0], [1], [0, 0, 1, 1], [], []>} : vector<10x64xbf16>, vector<64x192xbf16>, vector<10x192xf32> -> vector<10x192xf32>
    %106 = arith.addf %85, %105 : vector<10x192xf32>
    %107 = arith.addf %5, %106 : vector<10x192xf32>
    %c0_47 = arith.constant 0 : index
    %c0_48 = arith.constant 0 : index
    %c0_49 = arith.constant 0 : index
    %108 = vector.load %arg10[%c0_47, %c0_48, %c0_49] : memref<2x1x192xf32, #tpu.memory_space<vmem>>, vector<1x1x192xf32>
    %109 = vector.shape_cast %108 : vector<1x1x192xf32> to vector<1x192xf32>
    %110 = vector.broadcast %109 : vector<1x192xf32> to vector<10x192xf32>
    %111 = arith.addf %107, %110 : vector<10x192xf32>
    %c0_50 = arith.constant 0 : index
    %c0_51 = arith.constant 0 : index
    %c0_52 = arith.constant 0 : index
    %112 = vector.load %arg11[%c0_50, %c0_51, %c0_52] : memref<2x1x192xf32, #tpu.memory_space<vmem>>, vector<1x1x192xf32>
    %113 = vector.shape_cast %112 : vector<1x1x192xf32> to vector<1x192xf32>
    %c0_53 = arith.constant 0 : index
    %c0_54 = arith.constant 0 : index
    %c0_55 = arith.constant 0 : index
    %114 = vector.load %arg12[%c0_53, %c0_54, %c0_55] : memref<2x1x192xf32, #tpu.memory_space<vmem>>, vector<1x1x192xf32>
    %115 = vector.shape_cast %114 : vector<1x1x192xf32> to vector<1x192xf32>
    %cst_56 = arith.constant dense<0.000000e+00> : vector<10xf32>
    %116 = vector.multi_reduction <add>, %111, %cst_56 [1] : vector<10x192xf32> to vector<10xf32>
    %117 = vector.shape_cast %116 : vector<10xf32> to vector<10x1xf32>
    %cst_57 = arith.constant 1.920000e+02 : f32
    %118 = vector.broadcast %cst_57 : f32 to vector<10x1xf32>
    %119 = arith.divf %117, %118 : vector<10x1xf32>
    %120 = vector.broadcast %119 : vector<10x1xf32> to vector<10x192xf32>
    %121 = arith.subf %111, %120 : vector<10x192xf32>
    %122 = arith.mulf %121, %121 : vector<10x192xf32>
    %cst_58 = arith.constant dense<0.000000e+00> : vector<10xf32>
    %123 = vector.multi_reduction <add>, %122, %cst_58 [1] : vector<10x192xf32> to vector<10xf32>
    %124 = vector.shape_cast %123 : vector<10xf32> to vector<10x1xf32>
    %cst_59 = arith.constant 1.920000e+02 : f32
    %125 = vector.broadcast %cst_59 : f32 to vector<10x1xf32>
    %126 = arith.divf %124, %125 : vector<10x1xf32>
    %127 = vector.broadcast %119 : vector<10x1xf32> to vector<10x192xf32>
    %128 = arith.subf %111, %127 : vector<10x192xf32>
    %cst_60 = arith.constant 9.99999996E-13 : f32
    %129 = vector.broadcast %cst_60 : f32 to vector<10x1xf32>
    %130 = arith.addf %126, %129 : vector<10x1xf32>
    %131 = math.rsqrt %130 : vector<10x1xf32>
    %132 = vector.broadcast %131 : vector<10x1xf32> to vector<10x192xf32>
    %133 = arith.mulf %128, %132 : vector<10x192xf32>
    %134 = vector.broadcast %113 : vector<1x192xf32> to vector<10x192xf32>
    %135 = arith.mulf %133, %134 : vector<10x192xf32>
    %136 = vector.broadcast %115 : vector<1x192xf32> to vector<10x192xf32>
    %137 = arith.addf %135, %136 : vector<10x192xf32>
    %138 = arith.truncf %137 : vector<10x192xf32> to vector<10x192xbf16>
    %c0_61 = arith.constant 0 : index
    %c0_62 = arith.constant 0 : index
    %c0_63 = arith.constant 0 : index
    %139 = vector.load %arg13[%c0_61, %c0_62, %c0_63] : memref<2x192x768xbf16, #tpu.memory_space<vmem>>, vector<1x192x768xbf16>
    %140 = vector.shape_cast %139 : vector<1x192x768xbf16> to vector<192x768xbf16>
    %cst_64 = arith.constant dense<0.000000e+00> : vector<10x768xf32>
    %141 = tpu.matmul %138, %140, %cst_64 {dimension_numbers = #tpu.dot_dimension_numbers<[1], [0], [0], [1], [0, 0, 1, 1], [], []>} : vector<10x192xbf16>, vector<192x768xbf16>, vector<10x768xf32> -> vector<10x768xf32>
    %c0_65 = arith.constant 0 : index
    %c0_66 = arith.constant 0 : index
    %c0_67 = arith.constant 0 : index
    %142 = vector.load %arg14[%c0_65, %c0_66, %c0_67] : memref<2x1x768xf32, #tpu.memory_space<vmem>>, vector<1x1x768xf32>
    %143 = vector.shape_cast %142 : vector<1x1x768xf32> to vector<1x768xf32>
    %144 = vector.broadcast %143 : vector<1x768xf32> to vector<10x768xf32>
    %145 = arith.addf %141, %144 : vector<10x768xf32>
    %146 = arith.mulf %145, %145 : vector<10x768xf32>
    %147 = arith.mulf %145, %146 : vector<10x768xf32>
    %cst_68 = arith.constant 4.471500e-02 : f32
    %148 = vector.broadcast %cst_68 : f32 to vector<10x768xf32>
    %149 = arith.mulf %148, %147 : vector<10x768xf32>
    %150 = arith.addf %145, %149 : vector<10x768xf32>
    %cst_69 = arith.constant 0.797884583 : f32
    %151 = vector.broadcast %cst_69 : f32 to vector<10x768xf32>
    %152 = arith.mulf %151, %150 : vector<10x768xf32>
    %153 = math.tanh %152 : vector<10x768xf32>
    %cst_70 = arith.constant 1.000000e+00 : f32
    %154 = vector.broadcast %cst_70 : f32 to vector<10x768xf32>
    %155 = arith.addf %154, %153 : vector<10x768xf32>
    %cst_71 = arith.constant 5.000000e-01 : f32
    %156 = vector.broadcast %cst_71 : f32 to vector<10x768xf32>
    %157 = arith.mulf %156, %155 : vector<10x768xf32>
    %158 = arith.mulf %145, %157 : vector<10x768xf32>
    %159 = arith.truncf %158 : vector<10x768xf32> to vector<10x768xbf16>
    %c0_72 = arith.constant 0 : index
    %c0_73 = arith.constant 0 : index
    %c0_74 = arith.constant 0 : index
    %160 = vector.load %arg15[%c0_72, %c0_73, %c0_74] : memref<2x768x192xbf16, #tpu.memory_space<vmem>>, vector<1x768x192xbf16>
    %161 = vector.shape_cast %160 : vector<1x768x192xbf16> to vector<768x192xbf16>
    %cst_75 = arith.constant dense<0.000000e+00> : vector<10x192xf32>
    %162 = tpu.matmul %159, %161, %cst_75 {dimension_numbers = #tpu.dot_dimension_numbers<[1], [0], [0], [1], [0, 0, 1, 1], [], []>} : vector<10x768xbf16>, vector<768x192xbf16>, vector<10x192xf32> -> vector<10x192xf32>
    %163 = arith.addf %111, %162 : vector<10x192xf32>
    %c0_76 = arith.constant 0 : index
    %c0_77 = arith.constant 0 : index
    %c0_78 = arith.constant 0 : index
    %164 = vector.load %arg16[%c0_76, %c0_77, %c0_78] : memref<2x1x192xf32, #tpu.memory_space<vmem>>, vector<1x1x192xf32>
    %165 = vector.shape_cast %164 : vector<1x1x192xf32> to vector<1x192xf32>
    %166 = vector.broadcast %165 : vector<1x192xf32> to vector<10x192xf32>
    %167 = arith.addf %163, %166 : vector<10x192xf32>
    %c1 = arith.constant 1 : index
    %c0_79 = arith.constant 0 : index
    %c0_80 = arith.constant 0 : index
    %168 = vector.load %arg5[%c1, %c0_79, %c0_80] : memref<2x1x192xf32, #tpu.memory_space<vmem>>, vector<1x1x192xf32>
    %169 = vector.shape_cast %168 : vector<1x1x192xf32> to vector<1x192xf32>
    %c1_81 = arith.constant 1 : index
    %c0_82 = arith.constant 0 : index
    %c0_83 = arith.constant 0 : index
    %170 = vector.load %arg6[%c1_81, %c0_82, %c0_83] : memref<2x1x192xf32, #tpu.memory_space<vmem>>, vector<1x1x192xf32>
    %171 = vector.shape_cast %170 : vector<1x1x192xf32> to vector<1x192xf32>
    %cst_84 = arith.constant dense<0.000000e+00> : vector<10xf32>
    %172 = vector.multi_reduction <add>, %167, %cst_84 [1] : vector<10x192xf32> to vector<10xf32>
    %173 = vector.shape_cast %172 : vector<10xf32> to vector<10x1xf32>
    %cst_85 = arith.constant 1.920000e+02 : f32
    %174 = vector.broadcast %cst_85 : f32 to vector<10x1xf32>
    %175 = arith.divf %173, %174 : vector<10x1xf32>
    %176 = vector.broadcast %175 : vector<10x1xf32> to vector<10x192xf32>
    %177 = arith.subf %167, %176 : vector<10x192xf32>
    %178 = arith.mulf %177, %177 : vector<10x192xf32>
    %cst_86 = arith.constant dense<0.000000e+00> : vector<10xf32>
    %179 = vector.multi_reduction <add>, %178, %cst_86 [1] : vector<10x192xf32> to vector<10xf32>
    %180 = vector.shape_cast %179 : vector<10xf32> to vector<10x1xf32>
    %cst_87 = arith.constant 1.920000e+02 : f32
    %181 = vector.broadcast %cst_87 : f32 to vector<10x1xf32>
    %182 = arith.divf %180, %181 : vector<10x1xf32>
    %183 = vector.broadcast %175 : vector<10x1xf32> to vector<10x192xf32>
    %184 = arith.subf %167, %183 : vector<10x192xf32>
    %cst_88 = arith.constant 9.99999996E-13 : f32
    %185 = vector.broadcast %cst_88 : f32 to vector<10x1xf32>
    %186 = arith.addf %182, %185 : vector<10x1xf32>
    %187 = math.rsqrt %186 : vector<10x1xf32>
    %188 = vector.broadcast %187 : vector<10x1xf32> to vector<10x192xf32>
    %189 = arith.mulf %184, %188 : vector<10x192xf32>
    %190 = vector.broadcast %169 : vector<1x192xf32> to vector<10x192xf32>
    %191 = arith.mulf %189, %190 : vector<10x192xf32>
    %192 = vector.broadcast %171 : vector<1x192xf32> to vector<10x192xf32>
    %193 = arith.addf %191, %192 : vector<10x192xf32>
    %194 = arith.truncf %193 : vector<10x192xf32> to vector<10x192xbf16>
    %c1_89 = arith.constant 1 : index
    %c0_90 = arith.constant 0 : index
    %c0_91 = arith.constant 0 : index
    %195 = vector.load %arg7[%c1_89, %c0_90, %c0_91] : memref<2x192x576xbf16, #tpu.memory_space<vmem>>, vector<1x192x576xbf16>
    %196 = vector.shape_cast %195 : vector<1x192x576xbf16> to vector<192x576xbf16>
    %cst_92 = arith.constant dense<0.000000e+00> : vector<10x576xf32>
    %197 = tpu.matmul %194, %196, %cst_92 {dimension_numbers = #tpu.dot_dimension_numbers<[1], [0], [0], [1], [0, 0, 1, 1], [], []>} : vector<10x192xbf16>, vector<192x576xbf16>, vector<10x576xf32> -> vector<10x576xf32>
    %c1_93 = arith.constant 1 : index
    %c0_94 = arith.constant 0 : index
    %c0_95 = arith.constant 0 : index
    %198 = vector.load %arg8[%c1_93, %c0_94, %c0_95] : memref<2x1x576xf32, #tpu.memory_space<vmem>>, vector<1x1x576xf32>
    %199 = vector.shape_cast %198 : vector<1x1x576xf32> to vector<1x576xf32>
    %200 = vector.broadcast %199 : vector<1x576xf32> to vector<10x576xf32>
    %201 = arith.addf %197, %200 : vector<10x576xf32>
    %c1_96 = arith.constant 1 : index
    %c0_97 = arith.constant 0 : index
    %c0_98 = arith.constant 0 : index
    %202 = vector.load %arg9[%c1_96, %c0_97, %c0_98] : memref<2x192x192xbf16, #tpu.memory_space<vmem>>, vector<1x192x192xbf16>
    %203 = vector.shape_cast %202 : vector<1x192x192xbf16> to vector<192x192xbf16>
    %cst_99 = arith.constant 0.000000e+00 : f32
    %204 = vector.broadcast %cst_99 : f32 to vector<10x192xf32>
    %205 = vector.extract_strided_slice %201 {offsets = [0, 0], sizes = [10, 64], strides = [1, 1]} : vector<10x576xf32> to vector<10x64xf32>
    %206 = vector.extract_strided_slice %201 {offsets = [0, 192], sizes = [10, 64], strides = [1, 1]} : vector<10x576xf32> to vector<10x64xf32>
    %207 = vector.extract_strided_slice %201 {offsets = [0, 384], sizes = [10, 64], strides = [1, 1]} : vector<10x576xf32> to vector<10x64xf32>
    %cst_100 = arith.constant dense<0.000000e+00> : vector<10x10xf32>
    %208 = tpu.matmul %205, %206, %cst_100 {dimension_numbers = #tpu.dot_dimension_numbers<[1], [1], [0], [0], [0, 0, 1, 0], [], []>} : vector<10x64xf32>, vector<10x64xf32>, vector<10x10xf32> -> vector<10x10xf32>
    %cst_101 = arith.constant 1.250000e-01 : f32
    %209 = vector.broadcast %cst_101 : f32 to vector<10x10xf32>
    %210 = arith.mulf %208, %209 : vector<10x10xf32>
    %211 = arith.addf %210, %6 : vector<10x10xf32>
    %cst_102 = arith.constant dense<0xFF800000> : vector<10xf32>
    %212 = vector.multi_reduction <maximumf>, %211, %cst_102 [1] : vector<10x10xf32> to vector<10xf32>
    %213 = vector.shape_cast %212 : vector<10xf32> to vector<10x1xf32>
    %214 = vector.broadcast %213 : vector<10x1xf32> to vector<10x10xf32>
    %215 = arith.subf %211, %214 : vector<10x10xf32>
    %216 = math.exp %215 : vector<10x10xf32>
    %cst_103 = arith.constant dense<0.000000e+00> : vector<10xf32>
    %217 = vector.multi_reduction <add>, %216, %cst_103 [1] : vector<10x10xf32> to vector<10xf32>
    %218 = vector.shape_cast %217 : vector<10xf32> to vector<10x1xf32>
    %219 = vector.broadcast %218 : vector<10x1xf32> to vector<10x10xf32>
    %220 = arith.divf %216, %219 : vector<10x10xf32>
    %cst_104 = arith.constant dense<0.000000e+00> : vector<10x64xf32>
    %221 = tpu.matmul %220, %207, %cst_104 {dimension_numbers = #tpu.dot_dimension_numbers<[1], [0], [0], [1], [0, 0, 1, 1], [], []>} : vector<10x10xf32>, vector<10x64xf32>, vector<10x64xf32> -> vector<10x64xf32>
    %222 = arith.truncf %221 : vector<10x64xf32> to vector<10x64xbf16>
    %223 = vector.extract_strided_slice %203 {offsets = [0, 0], sizes = [64, 192], strides = [1, 1]} : vector<192x192xbf16> to vector<64x192xbf16>
    %cst_105 = arith.constant dense<0.000000e+00> : vector<10x192xf32>
    %224 = tpu.matmul %222, %223, %cst_105 {dimension_numbers = #tpu.dot_dimension_numbers<[1], [0], [0], [1], [0, 0, 1, 1], [], []>} : vector<10x64xbf16>, vector<64x192xbf16>, vector<10x192xf32> -> vector<10x192xf32>
    %225 = arith.addf %204, %224 : vector<10x192xf32>
    %226 = vector.extract_strided_slice %201 {offsets = [0, 64], sizes = [10, 64], strides = [1, 1]} : vector<10x576xf32> to vector<10x64xf32>
    %227 = vector.extract_strided_slice %201 {offsets = [0, 256], sizes = [10, 64], strides = [1, 1]} : vector<10x576xf32> to vector<10x64xf32>
    %228 = vector.extract_strided_slice %201 {offsets = [0, 448], sizes = [10, 64], strides = [1, 1]} : vector<10x576xf32> to vector<10x64xf32>
    %cst_106 = arith.constant dense<0.000000e+00> : vector<10x10xf32>
    %229 = tpu.matmul %226, %227, %cst_106 {dimension_numbers = #tpu.dot_dimension_numbers<[1], [1], [0], [0], [0, 0, 1, 0], [], []>} : vector<10x64xf32>, vector<10x64xf32>, vector<10x10xf32> -> vector<10x10xf32>
    %cst_107 = arith.constant 1.250000e-01 : f32
    %230 = vector.broadcast %cst_107 : f32 to vector<10x10xf32>
    %231 = arith.mulf %229, %230 : vector<10x10xf32>
    %232 = arith.addf %231, %6 : vector<10x10xf32>
    %cst_108 = arith.constant dense<0xFF800000> : vector<10xf32>
    %233 = vector.multi_reduction <maximumf>, %232, %cst_108 [1] : vector<10x10xf32> to vector<10xf32>
    %234 = vector.shape_cast %233 : vector<10xf32> to vector<10x1xf32>
    %235 = vector.broadcast %234 : vector<10x1xf32> to vector<10x10xf32>
    %236 = arith.subf %232, %235 : vector<10x10xf32>
    %237 = math.exp %236 : vector<10x10xf32>
    %cst_109 = arith.constant dense<0.000000e+00> : vector<10xf32>
    %238 = vector.multi_reduction <add>, %237, %cst_109 [1] : vector<10x10xf32> to vector<10xf32>
    %239 = vector.shape_cast %238 : vector<10xf32> to vector<10x1xf32>
    %240 = vector.broadcast %239 : vector<10x1xf32> to vector<10x10xf32>
    %241 = arith.divf %237, %240 : vector<10x10xf32>
    %cst_110 = arith.constant dense<0.000000e+00> : vector<10x64xf32>
    %242 = tpu.matmul %241, %228, %cst_110 {dimension_numbers = #tpu.dot_dimension_numbers<[1], [0], [0], [1], [0, 0, 1, 1], [], []>} : vector<10x10xf32>, vector<10x64xf32>, vector<10x64xf32> -> vector<10x64xf32>
    %243 = arith.truncf %242 : vector<10x64xf32> to vector<10x64xbf16>
    %244 = vector.extract_strided_slice %203 {offsets = [64, 0], sizes = [64, 192], strides = [1, 1]} : vector<192x192xbf16> to vector<64x192xbf16>
    %cst_111 = arith.constant dense<0.000000e+00> : vector<10x192xf32>
    %245 = tpu.matmul %243, %244, %cst_111 {dimension_numbers = #tpu.dot_dimension_numbers<[1], [0], [0], [1], [0, 0, 1, 1], [], []>} : vector<10x64xbf16>, vector<64x192xbf16>, vector<10x192xf32> -> vector<10x192xf32>
    %246 = arith.addf %225, %245 : vector<10x192xf32>
    %247 = vector.extract_strided_slice %201 {offsets = [0, 128], sizes = [10, 64], strides = [1, 1]} : vector<10x576xf32> to vector<10x64xf32>
    %248 = vector.extract_strided_slice %201 {offsets = [0, 320], sizes = [10, 64], strides = [1, 1]} : vector<10x576xf32> to vector<10x64xf32>
    %249 = vector.extract_strided_slice %201 {offsets = [0, 512], sizes = [10, 64], strides = [1, 1]} : vector<10x576xf32> to vector<10x64xf32>
    %cst_112 = arith.constant dense<0.000000e+00> : vector<10x10xf32>
    %250 = tpu.matmul %247, %248, %cst_112 {dimension_numbers = #tpu.dot_dimension_numbers<[1], [1], [0], [0], [0, 0, 1, 0], [], []>} : vector<10x64xf32>, vector<10x64xf32>, vector<10x10xf32> -> vector<10x10xf32>
    %cst_113 = arith.constant 1.250000e-01 : f32
    %251 = vector.broadcast %cst_113 : f32 to vector<10x10xf32>
    %252 = arith.mulf %250, %251 : vector<10x10xf32>
    %253 = arith.addf %252, %6 : vector<10x10xf32>
    %cst_114 = arith.constant dense<0xFF800000> : vector<10xf32>
    %254 = vector.multi_reduction <maximumf>, %253, %cst_114 [1] : vector<10x10xf32> to vector<10xf32>
    %255 = vector.shape_cast %254 : vector<10xf32> to vector<10x1xf32>
    %256 = vector.broadcast %255 : vector<10x1xf32> to vector<10x10xf32>
    %257 = arith.subf %253, %256 : vector<10x10xf32>
    %258 = math.exp %257 : vector<10x10xf32>
    %cst_115 = arith.constant dense<0.000000e+00> : vector<10xf32>
    %259 = vector.multi_reduction <add>, %258, %cst_115 [1] : vector<10x10xf32> to vector<10xf32>
    %260 = vector.shape_cast %259 : vector<10xf32> to vector<10x1xf32>
    %261 = vector.broadcast %260 : vector<10x1xf32> to vector<10x10xf32>
    %262 = arith.divf %258, %261 : vector<10x10xf32>
    %cst_116 = arith.constant dense<0.000000e+00> : vector<10x64xf32>
    %263 = tpu.matmul %262, %249, %cst_116 {dimension_numbers = #tpu.dot_dimension_numbers<[1], [0], [0], [1], [0, 0, 1, 1], [], []>} : vector<10x10xf32>, vector<10x64xf32>, vector<10x64xf32> -> vector<10x64xf32>
    %264 = arith.truncf %263 : vector<10x64xf32> to vector<10x64xbf16>
    %265 = vector.extract_strided_slice %203 {offsets = [128, 0], sizes = [64, 192], strides = [1, 1]} : vector<192x192xbf16> to vector<64x192xbf16>
    %cst_117 = arith.constant dense<0.000000e+00> : vector<10x192xf32>
    %266 = tpu.matmul %264, %265, %cst_117 {dimension_numbers = #tpu.dot_dimension_numbers<[1], [0], [0], [1], [0, 0, 1, 1], [], []>} : vector<10x64xbf16>, vector<64x192xbf16>, vector<10x192xf32> -> vector<10x192xf32>
    %267 = arith.addf %246, %266 : vector<10x192xf32>
    %268 = arith.addf %167, %267 : vector<10x192xf32>
    %c1_118 = arith.constant 1 : index
    %c0_119 = arith.constant 0 : index
    %c0_120 = arith.constant 0 : index
    %269 = vector.load %arg10[%c1_118, %c0_119, %c0_120] : memref<2x1x192xf32, #tpu.memory_space<vmem>>, vector<1x1x192xf32>
    %270 = vector.shape_cast %269 : vector<1x1x192xf32> to vector<1x192xf32>
    %271 = vector.broadcast %270 : vector<1x192xf32> to vector<10x192xf32>
    %272 = arith.addf %268, %271 : vector<10x192xf32>
    %c1_121 = arith.constant 1 : index
    %c0_122 = arith.constant 0 : index
    %c0_123 = arith.constant 0 : index
    %273 = vector.load %arg11[%c1_121, %c0_122, %c0_123] : memref<2x1x192xf32, #tpu.memory_space<vmem>>, vector<1x1x192xf32>
    %274 = vector.shape_cast %273 : vector<1x1x192xf32> to vector<1x192xf32>
    %c1_124 = arith.constant 1 : index
    %c0_125 = arith.constant 0 : index
    %c0_126 = arith.constant 0 : index
    %275 = vector.load %arg12[%c1_124, %c0_125, %c0_126] : memref<2x1x192xf32, #tpu.memory_space<vmem>>, vector<1x1x192xf32>
    %276 = vector.shape_cast %275 : vector<1x1x192xf32> to vector<1x192xf32>
    %cst_127 = arith.constant dense<0.000000e+00> : vector<10xf32>
    %277 = vector.multi_reduction <add>, %272, %cst_127 [1] : vector<10x192xf32> to vector<10xf32>
    %278 = vector.shape_cast %277 : vector<10xf32> to vector<10x1xf32>
    %cst_128 = arith.constant 1.920000e+02 : f32
    %279 = vector.broadcast %cst_128 : f32 to vector<10x1xf32>
    %280 = arith.divf %278, %279 : vector<10x1xf32>
    %281 = vector.broadcast %280 : vector<10x1xf32> to vector<10x192xf32>
    %282 = arith.subf %272, %281 : vector<10x192xf32>
    %283 = arith.mulf %282, %282 : vector<10x192xf32>
    %cst_129 = arith.constant dense<0.000000e+00> : vector<10xf32>
    %284 = vector.multi_reduction <add>, %283, %cst_129 [1] : vector<10x192xf32> to vector<10xf32>
    %285 = vector.shape_cast %284 : vector<10xf32> to vector<10x1xf32>
    %cst_130 = arith.constant 1.920000e+02 : f32
    %286 = vector.broadcast %cst_130 : f32 to vector<10x1xf32>
    %287 = arith.divf %285, %286 : vector<10x1xf32>
    %288 = vector.broadcast %280 : vector<10x1xf32> to vector<10x192xf32>
    %289 = arith.subf %272, %288 : vector<10x192xf32>
    %cst_131 = arith.constant 9.99999996E-13 : f32
    %290 = vector.broadcast %cst_131 : f32 to vector<10x1xf32>
    %291 = arith.addf %287, %290 : vector<10x1xf32>
    %292 = math.rsqrt %291 : vector<10x1xf32>
    %293 = vector.broadcast %292 : vector<10x1xf32> to vector<10x192xf32>
    %294 = arith.mulf %289, %293 : vector<10x192xf32>
    %295 = vector.broadcast %274 : vector<1x192xf32> to vector<10x192xf32>
    %296 = arith.mulf %294, %295 : vector<10x192xf32>
    %297 = vector.broadcast %276 : vector<1x192xf32> to vector<10x192xf32>
    %298 = arith.addf %296, %297 : vector<10x192xf32>
    %299 = arith.truncf %298 : vector<10x192xf32> to vector<10x192xbf16>
    %c1_132 = arith.constant 1 : index
    %c0_133 = arith.constant 0 : index
    %c0_134 = arith.constant 0 : index
    %300 = vector.load %arg13[%c1_132, %c0_133, %c0_134] : memref<2x192x768xbf16, #tpu.memory_space<vmem>>, vector<1x192x768xbf16>
    %301 = vector.shape_cast %300 : vector<1x192x768xbf16> to vector<192x768xbf16>
    %cst_135 = arith.constant dense<0.000000e+00> : vector<10x768xf32>
    %302 = tpu.matmul %299, %301, %cst_135 {dimension_numbers = #tpu.dot_dimension_numbers<[1], [0], [0], [1], [0, 0, 1, 1], [], []>} : vector<10x192xbf16>, vector<192x768xbf16>, vector<10x768xf32> -> vector<10x768xf32>
    %c1_136 = arith.constant 1 : index
    %c0_137 = arith.constant 0 : index
    %c0_138 = arith.constant 0 : index
    %303 = vector.load %arg14[%c1_136, %c0_137, %c0_138] : memref<2x1x768xf32, #tpu.memory_space<vmem>>, vector<1x1x768xf32>
    %304 = vector.shape_cast %303 : vector<1x1x768xf32> to vector<1x768xf32>
    %305 = vector.broadcast %304 : vector<1x768xf32> to vector<10x768xf32>
    %306 = arith.addf %302, %305 : vector<10x768xf32>
    %307 = arith.mulf %306, %306 : vector<10x768xf32>
    %308 = arith.mulf %306, %307 : vector<10x768xf32>
    %cst_139 = arith.constant 4.471500e-02 : f32
    %309 = vector.broadcast %cst_139 : f32 to vector<10x768xf32>
    %310 = arith.mulf %309, %308 : vector<10x768xf32>
    %311 = arith.addf %306, %310 : vector<10x768xf32>
    %cst_140 = arith.constant 0.797884583 : f32
    %312 = vector.broadcast %cst_140 : f32 to vector<10x768xf32>
    %313 = arith.mulf %312, %311 : vector<10x768xf32>
    %314 = math.tanh %313 : vector<10x768xf32>
    %cst_141 = arith.constant 1.000000e+00 : f32
    %315 = vector.broadcast %cst_141 : f32 to vector<10x768xf32>
    %316 = arith.addf %315, %314 : vector<10x768xf32>
    %cst_142 = arith.constant 5.000000e-01 : f32
    %317 = vector.broadcast %cst_142 : f32 to vector<10x768xf32>
    %318 = arith.mulf %317, %316 : vector<10x768xf32>
    %319 = arith.mulf %306, %318 : vector<10x768xf32>
    %320 = arith.truncf %319 : vector<10x768xf32> to vector<10x768xbf16>
    %c1_143 = arith.constant 1 : index
    %c0_144 = arith.constant 0 : index
    %c0_145 = arith.constant 0 : index
    %321 = vector.load %arg15[%c1_143, %c0_144, %c0_145] : memref<2x768x192xbf16, #tpu.memory_space<vmem>>, vector<1x768x192xbf16>
    %322 = vector.shape_cast %321 : vector<1x768x192xbf16> to vector<768x192xbf16>
    %cst_146 = arith.constant dense<0.000000e+00> : vector<10x192xf32>
    %323 = tpu.matmul %320, %322, %cst_146 {dimension_numbers = #tpu.dot_dimension_numbers<[1], [0], [0], [1], [0, 0, 1, 1], [], []>} : vector<10x768xbf16>, vector<768x192xbf16>, vector<10x192xf32> -> vector<10x192xf32>
    %324 = arith.addf %272, %323 : vector<10x192xf32>
    %c1_147 = arith.constant 1 : index
    %c0_148 = arith.constant 0 : index
    %c0_149 = arith.constant 0 : index
    %325 = vector.load %arg16[%c1_147, %c0_148, %c0_149] : memref<2x1x192xf32, #tpu.memory_space<vmem>>, vector<1x1x192xf32>
    %326 = vector.shape_cast %325 : vector<1x1x192xf32> to vector<1x192xf32>
    %327 = vector.broadcast %326 : vector<1x192xf32> to vector<10x192xf32>
    %328 = arith.addf %324, %327 : vector<10x192xf32>
    %c0_150 = arith.constant 0 : index
    %c0_151 = arith.constant 0 : index
    %329 = vector.load %arg3[%c0_150, %c0_151] : memref<2x10xf32, #tpu.memory_space<vmem>>, vector<2x10xf32>
    %cst_152 = arith.constant dense<0.000000e+00> : vector<2x192xf32>
    %330 = tpu.matmul %329, %328, %cst_152 {dimension_numbers = #tpu.dot_dimension_numbers<[1], [0], [0], [1], [0, 0, 1, 1], [], []>} : vector<2x10xf32>, vector<10x192xf32>, vector<2x192xf32> -> vector<2x192xf32>
    %c0_153 = arith.constant 0 : index
    %c0_154 = arith.constant 0 : index
    %331 = vector.load %arg17[%c0_153, %c0_154] : memref<192x128xf32, #tpu.memory_space<vmem>>, vector<192x128xf32>
    %cst_155 = arith.constant dense<0.000000e+00> : vector<2x128xf32>
    %332 = tpu.matmul %330, %331, %cst_155 {dimension_numbers = #tpu.dot_dimension_numbers<[1], [0], [0], [1], [0, 0, 1, 1], [], []>} : vector<2x192xf32>, vector<192x128xf32>, vector<2x128xf32> -> vector<2x128xf32>
    %c0_156 = arith.constant 0 : index
    %c0_157 = arith.constant 0 : index
    %333 = vector.load %arg18[%c0_156, %c0_157] : memref<1x128xf32, #tpu.memory_space<vmem>>, vector<1x128xf32>
    %334 = vector.broadcast %333 : vector<1x128xf32> to vector<2x128xf32>
    %335 = arith.addf %332, %334 : vector<2x128xf32>
    %c0_158 = arith.constant 0 : index
    %c0_159 = arith.constant 0 : index
    %336 = vector.load %arg19[%c0_158, %c0_159] : memref<1x128xf32, #tpu.memory_space<vmem>>, vector<1x128xf32>
    %337 = vector.broadcast %336 : vector<1x128xf32> to vector<2x128xf32>
    %338 = arith.mulf %335, %337 : vector<2x128xf32>
    %c0_160 = arith.constant 0 : index
    %c0_161 = arith.constant 0 : index
    %339 = vector.load %arg20[%c0_160, %c0_161] : memref<1x128xf32, #tpu.memory_space<vmem>>, vector<1x128xf32>
    %340 = vector.broadcast %339 : vector<1x128xf32> to vector<2x128xf32>
    %341 = arith.addf %338, %340 : vector<2x128xf32>
    %cst_162 = arith.constant 0.000000e+00 : f32
    %342 = vector.broadcast %cst_162 : f32 to vector<2x128xf32>
    %343 = arith.maximumf %341, %342 : vector<2x128xf32>
    %c0_163 = arith.constant 0 : index
    %c0_164 = arith.constant 0 : index
    %344 = vector.load %arg21[%c0_163, %c0_164] : memref<128x4xf32, #tpu.memory_space<vmem>>, vector<128x4xf32>
    %cst_165 = arith.constant dense<0.000000e+00> : vector<2x4xf32>
    %345 = tpu.matmul %343, %344, %cst_165 {dimension_numbers = #tpu.dot_dimension_numbers<[1], [0], [0], [1], [0, 0, 1, 1], [], []>} : vector<2x128xf32>, vector<128x4xf32>, vector<2x4xf32> -> vector<2x4xf32>
    %c0_166 = arith.constant 0 : index
    %c0_167 = arith.constant 0 : index
    %346 = vector.load %arg22[%c0_166, %c0_167] : memref<1x4xf32, #tpu.memory_space<vmem>>, vector<1x4xf32>
    %347 = vector.broadcast %346 : vector<1x4xf32> to vector<2x4xf32>
    %348 = arith.addf %345, %347 : vector<2x4xf32>
    %c0_168 = arith.constant 0 : index
    %c0_169 = arith.constant 0 : index
    %349 = vector.load %arg23[%c0_168, %c0_169] : memref<2x4xf32, #tpu.memory_space<vmem>>, vector<2x4xf32>
    tpu.vector_store %arg23[%c0_168, %c0_169], %348 {strides = array<i32>} : memref<2x4xf32, #tpu.memory_space<vmem>>, vector<2x4xf32>,
    return
  }
}

</mosaic_0001>

<bundles_post_ra>
// kernel: forward.1
= control target key start
LH: loop header
LB: loop body
LE: loop exit
PB: predicated region body
PF: predicated region fallthrough
CT: control target
= control target key end

     0   :  { %s12286_s0 = inlined_call_operand.vmem [shape: f32[10,768], index: 0, kind: input, shape index: {}]   ;;  %s12287_s1 = inlined_call_operand.vmem [shape: f32[10,192], index: 1, kind: input, shape index: {}]   ;;  %s12288_s2 = inlined_call_operand.vmem [shape: f32[10,10], index: 2, kind: input, shape index: {}]   ;;  %s12289_s3 = inlined_call_operand.vmem [shape: f32[2,10], index: 3, kind: input, shape index: {}]   ;;  %s12290_s4 = inlined_call_operand.vmem [shape: bf16[768,192], index: 4, kind: input, shape index: {}]   ;;  %s12291_s5 = inlined_call_operand.vmem [shape: f32[2,1,192], index: 5, kind: input, shape index: {}]   ;;  %s12292_s6 = inlined_call_operand.vmem [shape: f32[2,1,192], index: 6, kind: input, shape index: {}]   ;;  %s12293_s7 = inlined_call_operand.vmem [shape: bf16[2,192,576], index: 7, kind: input, shape index: {}]   ;;  %s12294_s8 = inlined_call_operand.vmem [shape: f32[2,1,576], index: 8, kind: input, shape index: {}]   ;;  %s12295_s9 = inlined_call_operand.vmem [shape: bf16[2,192,192], index: 9, kind: input, shape index: {}]   ;;  %s12296_s10 = inlined_call_operand.vmem [shape: f32[2,1,192], index: 10, kind: input, shape index: {}]   ;;  %s12297_s11 = inlined_call_operand.vmem [shape: f32[2,1,192], index: 11, kind: input, shape index: {}]   ;;  %s12298_s12 = inlined_call_operand.vmem [shape: f32[2,1,192], index: 12, kind: input, shape index: {}]   ;;  %s12299_s13 = inlined_call_operand.vmem [shape: bf16[2,192,768], index: 13, kind: input, shape index: {}]   ;;  %s12300_s14 = inlined_call_operand.vmem [shape: f32[2,1,768], index: 14, kind: input, shape index: {}]   ;;  %s12301_s15 = inlined_call_operand.vmem [shape: bf16[2,768,192], index: 15, kind: input, shape index: {}]   ;;  %s12302_s16 = inlined_call_operand.vmem [shape: f32[2,1,192], index: 16, kind: input, shape index: {}]   ;;  %s12303_s17 = inlined_call_operand.vmem [shape: f32[192,128], index: 17, kind: input, shape index: {}]   ;;  %s12304_s18 = inlined_call_operand.vmem [shape: f32[1,128], index: 18, kind: input, shape index: {}]   ;;  %s12305_s19 = inlined_call_operand.vmem [shape: f32[1,128], index: 19, kind: input, shape index: {}]   ;;  %s12306_s20 = inlined_call_operand.vmem [shape: f32[1,128], index: 20, kind: input, shape index: {}]   ;;  %s12307_s21 = inlined_call_operand.vmem [shape: f32[128,4], index: 21, kind: input, shape index: {}]   ;;  %s12308_s22 = inlined_call_operand.vmem [shape: f32[1,4], index: 22, kind: input, shape index: {}]   ;;  %s12309_s23 = inlined_call_operand.hbm [shape: f32[2,4], index: 23, kind: output, shape index: {}]  }
   0x1   :  { %12319 = sst [smem:[#allocation5_spill]] %s12286_s0 }
   0x2   :  { %12320 = sst [smem:[#allocation6_spill]] %s12287_s1 }
   0x3   :  { %12321 = sst [smem:[#allocation7_spill]] %s12288_s2 }
   0x4   :  { %12322 = sst [smem:[#allocation8_spill]] %s12289_s3 }
   0x5   :  { %12323 = sst [smem:[#allocation9_spill]] %s12290_s4 }
   0x6   :  { %12324 = sst [smem:[#allocation10_spill]] %s12291_s5 }
   0x7   :  { %12325 = sst [smem:[#allocation11_spill]] %s12292_s6 }
   0x8   :  { %12326 = sst [smem:[#allocation12_spill]] %s12293_s7 }
   0x9   :  { %s12327_s24 = sld [smem:[#allocation9_spill]] }
   0xa   :  { %s12328_s28 = sld [smem:[#allocation5_spill]] }
   0xf   :  { %v8325_v0 = vld [vmem:[%s12327_s24 + $0x74] ss:$8 sps:$4 sm:$0xff]   ;;  %v8327_v1 = vld [vmem:[%s12327_s24 + $0x70] ss:$8 sps:$4 sm:$0xff]   ;;  %v8331_v4 = vld [vmem:[%s12327_s24 + $0x64] ss:$8 sps:$4 sm:$0xff]  }
  0x10   :  { %674 = vmatprep.subr.bf16.mxu0 %v8325_v0  ;;  %v8328_v2 = vld [vmem:[%s12327_s24 + $0x174] ss:$8 sps:$4 sm:$0xff]   ;;  %v8330_v3 = vld [vmem:[%s12327_s24 + $0x170] ss:$8 sps:$4 sm:$0xff]   ;;  %v8333_v5 = vld [vmem:[%s12327_s24 + $0x60] ss:$8 sps:$4 sm:$0xff]  }
  0x11   :  { %675 = vmatpush1.bf16.msra.mxu0 %v8327_v1  ;;  %717 = vmatprep.subr.bf16.mxu1 %v8328_v2  ;;  %v8334_v6 = vld [vmem:[%s12327_s24 + $0x164] ss:$8 sps:$4 sm:$0xff]   ;;  %v8336_v7 = vld [vmem:[%s12327_s24 + $0x160] ss:$8 sps:$4 sm:$0xff]   ;;  %v8337_v8 = vld [vmem:[%s12327_s24 + $0x54] ss:$8 sps:$4 sm:$0xff]  }
  0x12   :  { %718 = vmatpush1.bf16.msra.mxu1 %v8330_v3  ;;  %676 = vmatprep.subr.bf16.mxu0 %v8331_v4  ;;  %v8339_v9 = vld [vmem:[%s12327_s24 + $0x50] ss:$8 sps:$4 sm:$0xff]   ;;  %v8340_v10 = vld [vmem:[%s12327_s24 + $0x154] ss:$8 sps:$4 sm:$0xff]   ;;  %v8343_v11 = vld [vmem:[%s12327_s24 + $0x44] ss:$8 sps:$4 sm:$0xff]  }
  0x13   :  { %719 = vmatprep.subr.bf16.mxu1 %v8334_v6  ;;  %v8342_v12 = vld [vmem:[%s12327_s24 + $0x150] ss:$8 sps:$4 sm:$0xff]   ;;  %v8346_v13 = vld [vmem:[%s12327_s24 + $0x144] ss:$8 sps:$4 sm:$0xff]   ;;  %v8345_v14 = vld [vmem:[%s12327_s24 + $0x40] ss:$8 sps:$4 sm:$0xff]  }
  0x14   :  { %v8349_v15 = vld [vmem:[%s12327_s24 + $0x34] ss:$8 sps:$4 sm:$0xff]   ;;  %v8348_v16 = vld [vmem:[%s12327_s24 + $0x140] ss:$8 sps:$4 sm:$0xff]   ;;  %v8351_v18 = vld [vmem:[%s12327_s24 + $0x30] ss:$8 sps:$4 sm:$0xff]  }
  0x15   :  { %677 = vmatpush1.bf16.msra.mxu0 %v8333_v5  ;;  %v8352_v17 = vld [vmem:[%s12327_s24 + $0x134] ss:$8 sps:$4 sm:$0xff]   ;;  %v8355_v19 = vld [vmem:[%s12327_s24 + $0x24] ss:$8 sps:$4 sm:$0xff]   ;;  %v8354_v20 = vld [vmem:[%s12327_s24 + $0x130] ss:$8 sps:$4 sm:$0xff]  }
  0x16   :  { %678 = vmatprep.subr.bf16.mxu0 %v8337_v8  ;;  %720 = vmatpush1.bf16.msra.mxu1 %v8336_v7  ;;  %v8358_v21 = vld [vmem:[%s12327_s24 + $0x124] ss:$8 sps:$4 sm:$0xff]   ;;  %v8357_v22 = vld [vmem:[%s12327_s24 + $0x20] ss:$8 sps:$4 sm:$0xff]   ;;  %v8361_v23 = vld [vmem:[%s12327_s24 + $0x14] ss:$8 sps:$4 sm:$0xff]  }
  0x17   :  { %721 = vmatprep.subr.bf16.mxu1 %v8340_v10  ;;  %v8360_v24 = vld [vmem:[%s12327_s24 + $0x120] ss:$8 sps:$4 sm:$0xff]   ;;  %v8364_v25 = vld [vmem:[%s12327_s24 + $0x114] ss:$8 sps:$4 sm:$0xff]   ;;  %v8363_v26 = vld [vmem:[%s12327_s24 + $0x10] ss:$8 sps:$4 sm:$0xff]  }
  0x18   :  { %v8367_v27 = vld [vmem:[%s12327_s24 + $0x4] ss:$8 sps:$4 sm:$0xff]   ;;  %v8366_v28 = vld [vmem:[%s12327_s24 + $0x110] ss:$8 sps:$4 sm:$0xff]   ;;  %v8369_v30 = vld [vmem:[%s12327_s24] ss:$8 sps:$4 sm:$0xff]  }
  0x19   :  { %679 = vmatpush1.bf16.msra.mxu0 %v8339_v9  ;;  %v8370_v29 = vld [vmem:[%s12327_s24 + $0x104] ss:$8 sps:$4 sm:$0xff]   ;;  %v8373_v31 = vld [vmem:[%s12327_s24 + $0xf4] ss:$8 sps:$4 sm:$0xff]   ;;  %v8372_v32 = vld [vmem:[%s12327_s24 + $0x100] ss:$8 sps:$4 sm:$0xff]  }
  0x1a   :  { %680 = vmatprep.subr.bf16.mxu0 %v8343_v11  ;;  %722 = vmatpush1.bf16.msra.mxu1 %v8342_v12  ;;  %v8376_v33 = vld [vmem:[%s12327_s24 + $0x1f4] ss:$8 sps:$4 sm:$0xff]   ;;  %v8375_v34 = vld [vmem:[%s12327_s24 + $0xf0] ss:$8 sps:$4 sm:$0xff]   ;;  %v8379_v35 = vld [vmem:[%s12327_s24 + $0xe4] ss:$8 sps:$4 sm:$0xff]  }
  0x1b   :  { %723 = vmatprep.subr.bf16.mxu1 %v8346_v13  ;;  %v8378_v36 = vld [vmem:[%s12327_s24 + $0x1f0] ss:$8 sps:$4 sm:$0xff]   ;;  %v8382_v37 = vld [vmem:[%s12327_s24 + $0x1e4] ss:$8 sps:$4 sm:$0xff]   ;;  %v8381_v38 = vld [vmem:[%s12327_s24 + $0xe0] ss:$8 sps:$4 sm:$0xff]  }
  0x1c   :  { %v8385_v39 = vld [vmem:[%s12327_s24 + $0xd4] ss:$8 sps:$4 sm:$0xff]   ;;  %v8384_v40 = vld [vmem:[%s12327_s24 + $0x1e0] ss:$8 sps:$4 sm:$0xff]   ;;  %v8387_v42 = vld [vmem:[%s12327_s24 + $0xd0] ss:$8 sps:$4 sm:$0xff]  }
  0x1d   :  { %681 = vmatpush1.bf16.msra.mxu0 %v8345_v14  ;;  %v8388_v41 = vld [vmem:[%s12327_s24 + $0x1d4] ss:$8 sps:$4 sm:$0xff]   ;;  %v8391_v43 = vld [vmem:[%s12327_s24 + $0xc4] ss:$8 sps:$4 sm:$0xff]   ;;  %v8390_v44 = vld [vmem:[%s12327_s24 + $0x1d0] ss:$8 sps:$4 sm:$0xff]  }
  0x1e   :  { %682 = vmatprep.subr.bf16.mxu0 %v8349_v15  ;;  %724 = vmatpush1.bf16.msra.mxu1 %v8348_v16  ;;  %v8394_v45 = vld [vmem:[%s12327_s24 + $0x1c4] ss:$8 sps:$4 sm:$0xff]   ;;  %v83_v47 = vld [vmem:[%s12328_s28 + $0x38] sm:$0x3]  ;;  %v8393_v48 = vld [vmem:[%s12327_s24 + $0xc0] ss:$8 sps:$4 sm:$0xff]  }
  0x1f   :  { %725 = vmatprep.subr.bf16.mxu1 %v8352_v17  ;;  %v77_v46 = vld [vmem:[%s12328_s28 + $0x8] sm:$0xff]  ;;  %v8397_v50 = vld [vmem:[%s12327_s24 + $0xb4] ss:$8 sps:$4 sm:$0xff]   ;;  %v8399_v56 = vld [vmem:[%s12327_s24 + $0xb0] ss:$8 sps:$4 sm:$0xff]  }
  0x20   :  { %v89_v49 = vpack.c.bf16 %v83_v47, %v77_v46  ;;  %v8396_v51 = vld [vmem:[%s12327_s24 + $0x1c0] ss:$8 sps:$4 sm:$0xff]   ;;  %v79_v52 = vld [vmem:[%s12328_s28 + $0x18] sm:$0xff]  ;;  %v8403_v57 = vld [vmem:[%s12327_s24 + $0xa4] ss:$8 sps:$4 sm:$0xff]  }
  0x21   :  { %683 = vmatpush1.bf16.msra.mxu0 %v8351_v18  ;;  %v85_v53 = vld [vmem:[%s12328_s28 + $0x48] sm:$0x3]  ;;  %v8400_v54 = vld [vmem:[%s12327_s24 + $0x1b4] ss:$8 sps:$4 sm:$0xff]   ;;  %v8402_v58 = vld [vmem:[%s12327_s24 + $0x1b0] ss:$8 sps:$4 sm:$0xff]  }
  0x22   :  { %684 = vmatprep.subr.bf16.mxu0 %v8355_v19  ;;  %726 = vmatpush1.bf16.msra.mxu1 %v8354_v20  ;;  %v91_v55 = vpack.c.bf16 %v85_v53, %v79_v52  ;;  %v8406_v59 = vld [vmem:[%s12327_s24 + $0x1a4] ss:$8 sps:$4 sm:$0xff]   ;;  %v8405_v60 = vld [vmem:[%s12327_s24 + $0xa0] ss:$8 sps:$4 sm:$0xff]   ;;  %v8409_v61 = vld [vmem:[%s12327_s24 + $0x94] ss:$8 sps:$4 sm:$0xff]  }
  0x23   :  { %727 = vmatprep.subr.bf16.mxu1 %v8358_v21  ;;  %706 = vmatprep.mubr.bf16.mxu0 %v89_v49  ;;  %v8408_v62 = vld [vmem:[%s12327_s24 + $0x1a0] ss:$8 sps:$4 sm:$0xff]   ;;  %v8412_v63 = vld [vmem:[%s12327_s24 + $0x194] ss:$8 sps:$4 sm:$0xff]   ;;  %v8411_v0 = vld [vmem:[%s12327_s24 + $0x90] ss:$8 sps:$4 sm:$0xff]  }
  0x24   :  { %749 = vmatprep.mubr.bf16.mxu1 %v91_v55  ;;  %v8414_v1 = vld [vmem:[%s12327_s24 + $0x190] ss:$8 sps:$4 sm:$0xff]   ;;  %v8415_v2 = vld [vmem:[%s12327_s24 + $0x84] ss:$8 sps:$4 sm:$0xff]   ;;  %v8417_v3 = vld [vmem:[%s12327_s24 + $0x80] ss:$8 sps:$4 sm:$0xff]  }
  0x25   :  { %685 = vmatpush1.bf16.msra.mxu0 %v8357_v22  ;;  %v8418_v4 = vld [vmem:[%s12327_s24 + $0x184] ss:$8 sps:$4 sm:$0xff]   ;;  %v8420_v6 = vld [vmem:[%s12327_s24 + $0x180] ss:$8 sps:$4 sm:$0xff]   ;;  %v82_v7 = vld [vmem:[%s12328_s28 + $0x30] sm:$0x3] }
  0x26   :  { %686 = vmatprep.subr.bf16.mxu0 %v8361_v23  ;;  %728 = vmatpush1.bf16.msra.mxu1 %v8360_v24  ;;  %v76_v5 = vld [vmem:[%s12328_s28] sm:$0xff]  ;;  %v8423_v8 = vld [vmem:[%s12327_s24 + $0x274] ss:$8 sps:$4 sm:$0xff]   ;;  %v8421_v12 = vld [vmem:[%s12327_s24 + $0x270] ss:$8 sps:$4 sm:$0xff]  }
  0x27   :  { %729 = vmatprep.subr.bf16.mxu1 %v8364_v25  ;;  %v78_v9 = vld [vmem:[%s12328_s28 + $0x10] sm:$0xff]  ;;  %v84_v10 = vld [vmem:[%s12328_s28 + $0x40] sm:$0x3]  ;;  %v88_v11 = vpack.c.bf16 %v82_v7, %v76_v5  ;;  %v8426_v14 = vld [vmem:[%s12327_s24 + $0x264] ss:$8 sps:$4 sm:$0xff]  }
  0x28   :  { %v90_v13 = vpack.c.bf16 %v84_v10, %v78_v9  ;;  %v81_v15 = vld [vmem:[%s12328_s28 + $0x28] sm:$0xff]  ;;  %v87_v17 = vld [vmem:[%s12328_s28 + $0x58] sm:$0x3]  ;;  %v8429_v18 = vld [vmem:[%s12327_s24 + $0x254] ss:$8 sps:$4 sm:$0xff]  }
  0x29   :  { %687 = vmatpush1.bf16.msra.mxu0 %v8363_v26  ;;  %v8424_v16 = vld [vmem:[%s12327_s24 + $0x260] ss:$8 sps:$4 sm:$0xff]   ;;  %v93_v19 = vpack.c.bf16 %v87_v17, %v81_v15  ;;  %v8427_v20 = vld [vmem:[%s12327_s24 + $0x250] ss:$8 sps:$4 sm:$0xff]   ;;  %v8432_v21 = vld [vmem:[%s12327_s24 + $0x244] ss:$8 sps:$4 sm:$0xff]  }
  0x2a   :  { %688 = vmatprep.subr.bf16.mxu0 %v8367_v27  ;;  %730 = vmatpush1.bf16.msra.mxu1 %v8366_v28  ;;  %v8430_v22 = vld [vmem:[%s12327_s24 + $0x240] ss:$8 sps:$4 sm:$0xff]   ;;  %v8435_v23 = vld [vmem:[%s12327_s24 + $0x234] ss:$8 sps:$4 sm:$0xff]   ;;  %v8433_v24 = vld [vmem:[%s12327_s24 + $0x230] ss:$8 sps:$4 sm:$0xff]  }
  0x2b   :  { %731 = vmatprep.subr.bf16.mxu1 %v8370_v29  ;;  %v8438_v25 = vld [vmem:[%s12327_s24 + $0x224] ss:$8 sps:$4 sm:$0xff]   ;;  %v8436_v26 = vld [vmem:[%s12327_s24 + $0x220] ss:$8 sps:$4 sm:$0xff]   ;;  %v8441_v27 = vld [vmem:[%s12327_s24 + $0x214] ss:$8 sps:$4 sm:$0xff]  }
  0x2c   :  { %v8439_v28 = vld [vmem:[%s12327_s24 + $0x210] ss:$8 sps:$4 sm:$0xff]   ;;  %v8444_v29 = vld [vmem:[%s12327_s24 + $0x204] ss:$8 sps:$4 sm:$0xff]   ;;  %v8466_v46 = vld [vmem:[%s12327_s24 + $0x280] ss:$8 sps:$4 sm:$0xff]  }
  0x2d   :  { %689 = vmatpush1.bf16.msra.mxu0 %v8369_v30  ;;  %v8442_v30 = vld [vmem:[%s12327_s24 + $0x200] ss:$8 sps:$4 sm:$0xff]  }
  0x2e   :  { %690 = vmatprep.subr.bf16.mxu0 %v8373_v31  ;;  %732 = vmatpush1.bf16.msra.mxu1 %v8372_v32  ;;  %v8447_v31 = vld [vmem:[%s12327_s24 + $0x2f4] ss:$8 sps:$4 sm:$0xff]   ;;  %v8445_v32 = vld [vmem:[%s12327_s24 + $0x2f0] ss:$8 sps:$4 sm:$0xff]   ;;  %v80_v47 = vld [vmem:[%s12328_s28 + $0x20] sm:$0xff] }
  0x2f   :  { %733 = vmatprep.subr.bf16.mxu1 %v8376_v33  ;;  %v8450_v33 = vld [vmem:[%s12327_s24 + $0x2e4] ss:$8 sps:$4 sm:$0xff]  }
  0x31   :  { %691 = vmatpush2.bf16.msra.mxu0 %v8375_v34  ;;  %v8448_v34 = vld [vmem:[%s12327_s24 + $0x2e0] ss:$8 sps:$4 sm:$0xff]  }
  0x32   :  { %692 = vmatprep.subr.bf16.mxu0 %v8379_v35  ;;  %734 = vmatpush2.bf16.msra.mxu1 %v8378_v36  ;;  %v8453_v35 = vld [vmem:[%s12327_s24 + $0x2d4] ss:$8 sps:$4 sm:$0xff]   ;;  %v8451_v36 = vld [vmem:[%s12327_s24 + $0x2d0] ss:$8 sps:$4 sm:$0xff]  }
  0x33   :  { %735 = vmatprep.subr.bf16.mxu1 %v8382_v37  ;;  %v8456_v37 = vld [vmem:[%s12327_s24 + $0x2c4] ss:$8 sps:$4 sm:$0xff]  }
  0x35   :  { %693 = vmatpush2.bf16.msra.mxu0 %v8381_v38  ;;  %v8454_v38 = vld [vmem:[%s12327_s24 + $0x2c0] ss:$8 sps:$4 sm:$0xff]  }
  0x36   :  { %694 = vmatprep.subr.bf16.mxu0 %v8385_v39  ;;  %736 = vmatpush2.bf16.msra.mxu1 %v8384_v40  ;;  %v8459_v39 = vld [vmem:[%s12327_s24 + $0x2b4] ss:$8 sps:$4 sm:$0xff]   ;;  %v8457_v40 = vld [vmem:[%s12327_s24 + $0x2b0] ss:$8 sps:$4 sm:$0xff]  }
  0x37   :  { %737 = vmatprep.subr.bf16.mxu1 %v8388_v41  ;;  %v8462_v41 = vld [vmem:[%s12327_s24 + $0x2a4] ss:$8 sps:$4 sm:$0xff]  }
  0x39   :  { %695 = vmatpush2.bf16.msra.mxu0 %v8387_v42  ;;  %v8460_v42 = vld [vmem:[%s12327_s24 + $0x2a0] ss:$8 sps:$4 sm:$0xff]  }
  0x3a   :  { %696 = vmatprep.subr.bf16.mxu0 %v8391_v43  ;;  %738 = vmatpush2.bf16.msra.mxu1 %v8390_v44  ;;  %v8465_v43 = vld [vmem:[%s12327_s24 + $0x294] ss:$8 sps:$4 sm:$0xff]   ;;  %v8463_v44 = vld [vmem:[%s12327_s24 + $0x290] ss:$8 sps:$4 sm:$0xff]  }
  0x3b   :  { %739 = vmatprep.subr.bf16.mxu1 %v8394_v45  ;;  %v8468_v45 = vld [vmem:[%s12327_s24 + $0x284] ss:$8 sps:$4 sm:$0xff]  }
  0x3d   :  { %697 = vmatpush2.bf16.msra.mxu0 %v8393_v48  ;;  %v86_v48 = vld [vmem:[%s12328_s28 + $0x50] sm:$0x3] }
  0x3e   :  { %698 = vmatprep.subr.bf16.mxu0 %v8397_v50  ;;  %740 = vmatpush2.bf16.msra.mxu1 %v8396_v51  ;;  %v92_v49 = vpack.c.bf16 %v86_v48, %v80_v47 }
  0x3f   :  { %741 = vmatprep.subr.bf16.mxu1 %v8400_v54 }
  0x41   :  { %699 = vmatpush2.bf16.msra.mxu0 %v8399_v56 }
  0x42   :  { %700 = vmatprep.subr.bf16.mxu0 %v8403_v57  ;;  %742 = vmatpush2.bf16.msra.mxu1 %v8402_v58 }
  0x43   :  { %743 = vmatprep.subr.bf16.mxu1 %v8406_v59 }
  0x45   :  { %701 = vmatpush2.bf16.msra.mxu0 %v8405_v60 }
  0x46   :  { %702 = vmatprep.subr.bf16.mxu0 %v8409_v61  ;;  %744 = vmatpush2.bf16.msra.mxu1 %v8408_v62 }
  0x47   :  { %745 = vmatprep.subr.bf16.mxu1 %v8412_v63 }
  0x49   :  { %703 = vmatpush2.bf16.msra.mxu0 %v8411_v0 }
  0x4a   :  { %704 = vmatprep.subr.bf16.mxu0 %v8415_v2  ;;  %746 = vmatpush2.bf16.msra.mxu1 %v8414_v1 }
  0x4b   :  { %747 = vmatprep.subr.bf16.mxu1 %v8418_v4 }
  0x4d   :  { %705 = vmatpush2.bf16.msra.mxu0 %v8417_v3 }
  0x4e   :  { %760 = vmatprep.subr.bf16.mxu0 %v8423_v8  ;;  %748 = vmatpush2.bf16.msra.mxu1 %v8420_v6 }
  0x50   :  { %707 = vmatmul.mubr.bf16.vlgmr.msra.gmra.mxu0 %v88_v11 }
  0x51   :  { %761 = vmatpush1.bf16.msra.mxu0 %v8421_v12  ;;  %750 = vmatmul.mubr.bf16.vlgmr.msra.gmra.mxu1 %v90_v13 }
  0x52   :  { %762 = vmatprep.subr.bf16.mxu0 %v8426_v14  ;;  %792 = vmatprep.mubr.bf16.mxu0 %v93_v19 }
  0x55   :  { %763 = vmatpush1.bf16.msra.mxu0 %v8424_v16 }
  0x56   :  { %764 = vmatprep.subr.bf16.mxu0 %v8429_v18 }
  0x59   :  { %765 = vmatpush1.bf16.msra.mxu0 %v8427_v20 }
  0x5a   :  { %766 = vmatprep.subr.bf16.mxu0 %v8432_v21 }
  0x5d   :  { %767 = vmatpush1.bf16.msra.mxu0 %v8430_v22 }
  0x5e   :  { %768 = vmatprep.subr.bf16.mxu0 %v8435_v23 }
  0x61   :  { %769 = vmatpush1.bf16.msra.mxu0 %v8433_v24 }
  0x62   :  { %770 = vmatprep.subr.bf16.mxu0 %v8438_v25 }
  0x65   :  { %771 = vmatpush1.bf16.msra.mxu0 %v8436_v26 }
  0x66   :  { %772 = vmatprep.subr.bf16.mxu0 %v8441_v27 }
  0x69   :  { %773 = vmatpush1.bf16.msra.mxu0 %v8439_v28 }
  0x6a   :  { %774 = vmatprep.subr.bf16.mxu0 %v8444_v29 }
  0x6d   :  { %775 = vmatpush1.bf16.msra.mxu0 %v8442_v30 }
  0x6e   :  { %776 = vmatprep.subr.bf16.mxu0 %v8447_v31 }
  0x71   :  { %777 = vmatpush2.bf16.msra.mxu0 %v8445_v32 }
  0x72   :  { %778 = vmatprep.subr.bf16.mxu0 %v8450_v33 }
  0x75   :  { %779 = vmatpush2.bf16.msra.mxu0 %v8448_v34 }
  0x76   :  { %780 = vmatprep.subr.bf16.mxu0 %v8453_v35 }
  0x79   :  { %781 = vmatpush2.bf16.msra.mxu0 %v8451_v36 }
  0x7a   :  { %782 = vmatprep.subr.bf16.mxu0 %v8456_v37 }
  0x7d   :  { %783 = vmatpush2.bf16.msra.mxu0 %v8454_v38 }
  0x7e   :  { %784 = vmatprep.subr.bf16.mxu0 %v8459_v39 }
  0x81   :  { %785 = vmatpush2.bf16.msra.mxu0 %v8457_v40 }
  0x82   :  { %786 = vmatprep.subr.bf16.mxu0 %v8462_v41 }
  0x85   :  { %787 = vmatpush2.bf16.msra.mxu0 %v8460_v42 }
  0x86   :  { %788 = vmatprep.subr.bf16.mxu0 %v8465_v43 }
  0x89   :  { %789 = vmatpush2.bf16.msra.mxu0 %v8463_v44 }
  0x8a   :  { %790 = vmatprep.subr.bf16.mxu0 %v8468_v45 }
  0x8d   :  { %791 = vmatpush2.bf16.msra.mxu0 %v8466_v46 }
  0x90   :  { %793 = vmatmul.mubr.bf16.vlgmr.msra.gmra.mxu0 %v92_v49 }
  0x91   :  { %28 = vsyncpa [#allocation3], 0  ;;  %s12329_s24 = sld [smem:[#allocation6_spill]]  ;;  %vm807_vm0 = vcmask 523264   ;;  %vm812_vm1 = vcmask 1041408   ;;  %vm814_vm2 = vcmask 517120  }
  0x92   :  { %s12330_s3 = sld [smem:[#allocation12_spill]]  ;;  %v9349_v21 = vmov 0   ;;  %s12317_s28 = smov 64   ;;  %vm1545_vm3 = vcmask 74752   ;;  %vm1541_vm4 = vcmask 80896   ;;  %vm9352_vm5 = vmmov 0  }
  0x93   :  { %1381 = vmatprep.subr.bf16.mxu0 %v9349_v21  ;;  %s12331_s5 = sld [smem:[#allocation10_spill]]  ;;  %vm7180_vm6 = vcmask 25600  }
  0x94   :  { %s12332_s26 = sld [smem:[#allocation11_spill]] }
  0x95   :  { %s12333_s27 = sld [smem:[#allocation7_spill]] }
  0x96   :  { %s12335_s6 = sld [smem:[#allocation8_spill]] }
  0x97   :  { %v191_v53 = vld [vmem:[%s12329_s24 + $0x8] sm:$0xff]  ;;  %v190_v56 = vld [vmem:[%s12329_s24] sm:$0xff]  ;;  %v192_v57 = vld [vmem:[%s12329_s24 + $0x10] sm:$0x3] }
  0x98   :  { %v193_v60 = vld [vmem:[%s12329_s24 + $0x18] sm:$0x3]  ;;  %v8471_v20 = vld [vmem:[%s12330_s3 + $0x11c] ss:$20 sps:$4 sm:$0xff]   ;;  %v8475_v23 = vld [vmem:[%s12330_s3 + $0xf4] ss:$20 sps:$4 sm:$0xff]  }
  0x99   :  { %v8469_v19 = vld [vmem:[%s12330_s3 + $0x118] ss:$20 sps:$4 sm:$0xff]   ;;  %v8472_v22 = vld [vmem:[%s12330_s3 + $0x128] ss:$20 sps:$4 sm:$0xff]   ;;  %1295 = vmatprep.subr.bf16.mxu1 %v8471_v20  ;;  %v8473_v24 = vld [vmem:[%s12330_s3 + $0xf0] ss:$20 sps:$4 sm:$0xff]   ;;  %v850_v20 = vlaneseq }
  0x9a   :  { %1296 = vmatpush1.bf16.msra.mxu1 %v8469_v19  ;;  %1382 = vmatpush1.bf16.msra.mxu0 %v8472_v22  ;;  %v8476_v25 = vld [vmem:[%s12330_s3 + $0x100] ss:$20 sps:$4 sm:$0xff]   ;;  %v8477_v27 = vld [vmem:[%s12330_s3 + $0xc8] ss:$20 sps:$4 sm:$0xff]   ;;  %v8480_v28 = vld [vmem:[%s12330_s3 + $0xd8] ss:$20 sps:$4 sm:$0xff]  }
  0x9b   :  { %1297 = vmatprep.subr.bf16.mxu1 %v8475_v23  ;;  %1383 = vmatprep.subr.bf16.mxu0 %v9349_v21  ;;  %v8479_v26 = vld [vmem:[%s12330_s3 + $0xcc] ss:$20 sps:$4 sm:$0xff]   ;;  %v8483_v29 = vld [vmem:[%s12330_s3 + $0xa4] ss:$20 sps:$4 sm:$0xff]   ;;  %v8487_v32 = vld [vmem:[%s12330_s3 + $0x7c] ss:$20 sps:$4 sm:$0xff]  }
  0x9c   :  { %v8481_v30 = vld [vmem:[%s12330_s3 + $0xa0] ss:$20 sps:$4 sm:$0xff]   ;;  %v8484_v31 = vld [vmem:[%s12330_s3 + $0xb0] ss:$20 sps:$4 sm:$0xff]   ;;  %v8485_v33 = vld [vmem:[%s12330_s3 + $0x78] ss:$20 sps:$4 sm:$0xff]  }
  0x9d   :  { %v9971_v22 = vshrl.u32 %v850_v20, 7 }
  0x9e   :  { %1298 = vmatpush1.bf16.msra.mxu1 %v8473_v24  ;;  %1384 = vmatpush1.bf16.msra.mxu0 %v8476_v25  ;;  %v805_v25 = vld [vmem:[%s12331_s5] sm:$0x3] }
  0x9f   :  { %1299 = vmatprep.subr.bf16.mxu1 %v8479_v26  ;;  %1385 = vmatprep.subr.bf16.mxu0 %v9349_v21  ;;  %v9974_v23 = vsub.s32 1, %v9971_v22  ;;  %v9977_v24 = vsub.s32 0, %v9971_v22 }
  0xa2   :  { %1300 = vmatpush1.bf16.msra.mxu1 %v8477_v27  ;;  %1386 = vmatpush1.bf16.msra.mxu0 %v8480_v28  ;;  %v806_v27 = vld [vmem:[%s12332_s26] sm:$0x3] }
  0xa3   :  { %1301 = vmatprep.subr.bf16.mxu1 %v8483_v29  ;;  %1387 = vmatprep.subr.bf16.mxu0 %v9349_v21  ;;  %v857_v29 = vrot.slane %v805_v25, %v9974_v23 }
  0xa6   :  { %1302 = vmatpush1.bf16.msra.mxu1 %v8481_v30  ;;  %1388 = vmatpush1.bf16.msra.mxu0 %v8484_v31  ;;  %v853_v31 = vrot.slane %v805_v25, %v9977_v24 }
  0xa7   :  { %1303 = vmatprep.subr.bf16.mxu1 %v8487_v32  ;;  %1389 = vmatprep.subr.bf16.mxu0 %v9349_v21 }
  0xaa   :  { %1304 = vmatpush1.bf16.msra.mxu1 %v8485_v33  ;;  %v872_v33 = vrot.slane %v806_v27, %v9974_v23 }
 0x110   :  { %v708_v50 = vpop.f32.mrf.mxu0 }
 0x111   :  { %v751_v52 = vpop.f32.mrf.mxu1  ;;  %v709_v59 = vadd.f32 %v708_v50, %v190_v56  ;;  %v8493_v56 = vld [vmem:[%s12330_s3 + $0x28] ss:$20 sps:$4 sm:$0xff]  }
 0x112   :  { %v710_v51 = vpop.f32.mrf.mxu0 }
 0x113   :  { %v753_v55 = vpop.f32.mrf.mxu1  ;;  %v711_v58 = vadd.f32 %v710_v51, %v191_v53  ;;  %v752_v3 = vadd.f32 %v751_v52, %v709_v59  ;;  %v8488_v51 = vld [vmem:[%s12330_s3 + $0x88] ss:$20 sps:$4 sm:$0xff]   ;;  %v8489_v53 = vld [vmem:[%s12330_s3 + $0x50] ss:$20 sps:$4 sm:$0xff]  }
 0x114   :  { %v712_v54 = vpop.f32.mrf.mxu0  ;;  %1390 = vmatpush1.bf16.msra.mxu0 %v8488_v51  ;;  %v8491_v52 = vld [vmem:[%s12330_s3 + $0x54] ss:$20 sps:$4 sm:$0xff]   ;;  %v8499_v59 = vld [vmem:[%s12330_s3 + $0x4] ss:$20 sps:$4 sm:$0xff]  }
 0x115   :  { %v755_v62 = vpop.f32.mrf.mxu1  ;;  %v713_v63 = vadd.f32 %v712_v54, %v192_v57  ;;  %v754_v1 = vadd.f32 %v753_v55, %v711_v58  ;;  %1391 = vmatprep.subr.bf16.mxu0 %v9349_v21  ;;  %1305 = vmatprep.subr.bf16.mxu1 %v8491_v52  ;;  %v8492_v54 = vld [vmem:[%s12330_s3 + $0x60] ss:$20 sps:$4 sm:$0xff]   ;;  %v8496_v57 = vld [vmem:[%s12330_s3 + $0x38] ss:$20 sps:$4 sm:$0xff]   ;;  %v8523_v51 = vld [vmem:[%s12330_s3 + $0xd0] ss:$20 sps:$4 sm:$0xff]  }
 0x116   :  { %v714_v61 = vpop.f32.mrf.mxu0  ;;  %1306 = vmatpush1.bf16.msra.mxu1 %v8489_v53  ;;  %v8495_v55 = vld [vmem:[%s12330_s3 + $0x2c] ss:$20 sps:$4 sm:$0xff]   ;;  %v8526_v53 = vld [vmem:[%s12330_s3 + $0xa8] ss:$20 sps:$4 sm:$0xff]  }
 0x117   :  { %v715_v2 = vadd.f32 %v714_v61, %v193_v60  ;;  %v757_v4 = vpop.f32.mrf.mxu1  ;;  %v756_v6 = vadd.f32 %v755_v62, %v713_v63  ;;  %1307 = vmatprep.subr.bf16.mxu1 %v8495_v55  ;;  %v8497_v58 = vld [vmem:[%s12330_s3] ss:$20 sps:$4 sm:$0xff]   ;;  %v8500_v60 = vld [vmem:[%s12330_s3 + $0x10] ss:$20 sps:$4 sm:$0xff]   ;;  %v8501_v62 = vld [vmem:[%s12330_s3 + $0x1b8] ss:$20 sps:$4 sm:$0xff]  }
 0x118   :  { %1392 = vmatpush1.bf16.msra.mxu0 %v8492_v54  ;;  %v8503_v61 = vld [vmem:[%s12330_s3 + $0x1bc] ss:$20 sps:$4 sm:$0xff]   ;;  %v8528_v52 = vld [vmem:[%s12330_s3 + $0xac] ss:$20 sps:$4 sm:$0xff]   ;;  %v8531_v54 = vld [vmem:[%s12330_s3 + $0x84] ss:$20 sps:$4 sm:$0xff]  }
 0x119   :  { %v758_v10 = vadd.f32 %v757_v4, %v715_v2  ;;  %1393 = vmatprep.subr.bf16.mxu0 %v9349_v21  ;;  %v8504_v63 = vld [vmem:[%s12330_s3 + $0x1c8] ss:$20 sps:$4 sm:$0xff]   ;;  %v8508_v2 = vld [vmem:[%s12330_s3 + $0x1a0] ss:$20 sps:$4 sm:$0xff]  }
 0x11a   :  { %1308 = vmatpush1.bf16.msra.mxu1 %v8493_v56  ;;  %v8509_v4 = vld [vmem:[%s12330_s3 + $0x168] ss:$20 sps:$4 sm:$0xff]   ;;  %v8529_v55 = vld [vmem:[%s12330_s3 + $0x80] ss:$20 sps:$4 sm:$0xff]  }
 0x11b   :  { %1309 = vmatprep.subr.bf16.mxu1 %v8499_v59  ;;  %v8534_v56 = vld [vmem:[%s12330_s3 + $0x5c] ss:$20 sps:$4 sm:$0xff]  }
 0x11c   :  { %1394 = vmatpush1.bf16.msra.mxu0 %v8496_v57  ;;  %v8532_v57 = vld [vmem:[%s12330_s3 + $0x58] ss:$20 sps:$4 sm:$0xff]   ;;  %v8535_v59 = vld [vmem:[%s12330_s3 + $0x30] ss:$20 sps:$4 sm:$0xff]  }
 0x11d   :  { %1395 = vmatprep.subr.bf16.mxu0 %v9349_v21 }
 0x11e   :  { %1310 = vmatpush1.bf16.msra.mxu1 %v8497_v58  ;;  %v8537_v58 = vld [vmem:[%s12330_s3 + $0x34] ss:$20 sps:$4 sm:$0xff]  }
 0x11f   :  { %1319 = vmatprep.subr.bf16.mxu1 %v8503_v61  ;;  %v8538_v61 = vld [vmem:[%s12330_s3 + $0x8] ss:$20 sps:$4 sm:$0xff]  }
 0x120   :  { %1396 = vmatpush1.bf16.msra.mxu0 %v8500_v60  ;;  %v8540_v60 = vld [vmem:[%s12330_s3 + $0xc] ss:$20 sps:$4 sm:$0xff]  }
 0x121   :  { %1405 = vmatprep.subr.bf16.mxu0 %v9349_v21 }
 0x122   :  { %1320 = vmatpush2.bf16.msra.mxu1 %v8501_v62  ;;  %v8543_v62 = vld [vmem:[%s12330_s3 + $0x1c4] ss:$20 sps:$4 sm:$0xff]  }
 0x124   :  { %1406 = vmatpush2.bf16.msra.mxu0 %v8504_v63  ;;  %v8541_v63 = vld [vmem:[%s12330_s3 + $0x1c0] ss:$20 sps:$4 sm:$0xff]  }
 0x125   :  { %1407 = vmatprep.subr.bf16.mxu0 %v9349_v21 }
 0x128   :  { %1408 = vmatpush2.bf16.msra.mxu0 %v8508_v2  ;;  %v8549_v2 = vld [vmem:[%s12330_s3 + $0x174] ss:$20 sps:$4 sm:$0xff]  }
 0x129   :  { %1409 = vmatprep.subr.bf16.mxu0 %v9349_v21 }
 0x150   :  { %v794_v0 = vpop.f32.mrf.mxu0 }
 0x151   :  { %v9812_v8 = vadd.f32 %v794_v0, %v752_v3  ;;  %v8507_v0 = vld [vmem:[%s12330_s3 + $0x194] ss:$20 sps:$4 sm:$0xff]   ;;  %v8511_v3 = vld [vmem:[%s12330_s3 + $0x16c] ss:$20 sps:$4 sm:$0xff]  }
 0x152   :  { %v796_v5 = vpop.f32.mrf.mxu0  ;;  %1321 = vmatprep.subr.bf16.mxu1 %v8507_v0  ;;  %v8546_v0 = vld [vmem:[%s12330_s3 + $0x19c] ss:$20 sps:$4 sm:$0xff]  }
 0x153   :  { %v9810_v7 = vadd.f32 %v796_v5, %v754_v1  ;;  %v8505_v1 = vld [vmem:[%s12330_s3 + $0x190] ss:$20 sps:$4 sm:$0xff]   ;;  %v8512_v5 = vld [vmem:[%s12330_s3 + $0x178] ss:$20 sps:$4 sm:$0xff]  }
 0x154   :  { %v798_v9 = vpop.f32.mrf.mxu0  ;;  %1322 = vmatpush2.bf16.msra.mxu1 %v8505_v1  ;;  %1410 = vmatpush2.bf16.msra.mxu0 %v8512_v5  ;;  %v8544_v1 = vld [vmem:[%s12330_s3 + $0x198] ss:$20 sps:$4 sm:$0xff]   ;;  %v8550_v5 = vld [vmem:[%s12330_s3 + $0x148] ss:$20 sps:$4 sm:$0xff]  }
 0x155   :  { %v9814_v11 = vadd.f32 %v798_v9, %v756_v6  ;;  %v808_v12 = vsel %vm807_vm0, %v9810_v7, 0.0  ;;  %1323 = vmatprep.subr.bf16.mxu1 %v8511_v3  ;;  %v8515_v6 = vld [vmem:[%s12330_s3 + $0x144] ss:$20 sps:$4 sm:$0xff]   ;;  %v8513_v9 = vld [vmem:[%s12330_s3 + $0x140] ss:$20 sps:$4 sm:$0xff]   ;;  %1411 = vmatprep.subr.bf16.mxu0 %v9349_v21 }
 0x156   :  { %v800_v13 = vpop.f32.mrf.mxu0  ;;  %v809_v14 = vadd.f32 %v808_v12, %v9812_v8  ;;  %v8519_v12 = vld [vmem:[%s12330_s3 + $0x124] ss:$20 sps:$4 sm:$0xff]  }
 0x157   :  { %v9819_v15 = vadd.f32 %v800_v13, %v758_v10  ;;  %v813_v16 = vsel %vm812_vm1, %v9814_v11, 0.0  ;;  %v8516_v10 = vld [vmem:[%s12330_s3 + $0x150] ss:$20 sps:$4 sm:$0xff]  }
 0x158   :  { %810 = vadd.xlane.f32.xlu0 %v809_v14  ;;  %1324 = vmatpush2.bf16.msra.mxu1 %v8509_v4  ;;  %v8547_v3 = vld [vmem:[%s12330_s3 + $0x170] ss:$20 sps:$4 sm:$0xff]   ;;  %v8552_v4 = vld [vmem:[%s12330_s3 + $0x14c] ss:$20 sps:$4 sm:$0xff]  }
 0x159   :  { %v815_v17 = vsel %vm814_vm2, %v9819_v15, 0.0  ;;  %1325 = vmatprep.subr.bf16.mxu1 %v8515_v6  ;;  %1412 = vmatpush2.bf16.msra.mxu0 %v8516_v10  ;;  %v10068_v6 = vld [vmem:[%s12294_s8] sm:$0x1f] }
 0x15a   :  { %v816_v18 = vadd.f32 %v815_v17, %v813_v16  ;;  %v962_v10 = vrot.slane %v10068_v6, %v9974_v23 }
 0x15c   :  { %817 = vadd.xlane.f32.xlu0 %v816_v18  ;;  %1326 = vmatpush2.bf16.msra.mxu1 %v8513_v9  ;;  %v958_v9 = vrot.slane %v10068_v6, %v9977_v24 }
 0x15d   :  { %1338 = vmatprep.subr.bf16.mxu1 %v8519_v12 }
 0x1e1   :  { %v811_v34 = vpop.xlane.xlu0 %810 }
 0x1e2   :  { %v820_v35 = vmul.f32 0.0052083335, %v811_v34  ;;  %v868_v34 = vrot.slane %v806_v27, %v9977_v24 }
 0x1e4   :  { %v9873_v36 = vsub.f32 %v9812_v8, %v820_v35  ;;  %v9876_v37 = vsub.f32 %v9810_v7, %v820_v35 }
 0x1e5   :  { %v818_v38 = vpop.xlane.xlu0 %817 }
 0x1e6   :  { %v821_v39 = vmul.f32 0.0052083335, %v818_v38  ;;  %v826_v40 = vmul.f32 %v9873_v36, %v9873_v36  ;;  %v827_v41 = vmul.f32 %v9876_v37, %v9876_v37 }
 0x1e8   :  { %v9883_v42 = vsub.f32 %v9814_v11, %v821_v39  ;;  %v9886_v43 = vsub.f32 %v9819_v15, %v821_v39  ;;  %v830_v44 = vsel %vm807_vm0, %v827_v41, 0.0 }
 0x1e9   :  { %v831_v45 = vadd.f32 %v830_v44, %v826_v40 }
 0x1ea   :  { %v828_v46 = vmul.f32 %v9883_v42, %v9883_v42  ;;  %v829_v47 = vmul.f32 %v9886_v43, %v9886_v43 }
 0x1eb   :  { %832 = vadd.xlane.f32.xlu1 %v831_v45 }
 0x1ec   :  { %v834_v48 = vsel %vm812_vm1, %v828_v46, 0.0  ;;  %v835_v49 = vsel %vm814_vm2, %v829_v47, 0.0 }
 0x1ed   :  { %v836_v50 = vadd.f32 %v835_v49, %v834_v48  ;;  %v8517_v48 = vld [vmem:[%s12330_s3 + $0x120] ss:$20 sps:$4 sm:$0xff]  }
 0x1ef   :  { %837 = vadd.xlane.f32.xlu1 %v836_v50  ;;  %v8525_v50 = vld [vmem:[%s12330_s3 + $0xd4] ss:$20 sps:$4 sm:$0xff]  }
 0x274   :  { %v833_v13 = vpop.xlane.xlu1 %832 }
 0x275   :  { %v839_v14 = vmul.f32 0.0052083335, %v833_v13 }
 0x277   :  { %v841_v16 = vadd.f32 1e-12, %v839_v14 }
 0x278   :  { %v838_v17 = vpop.xlane.xlu1 %837 }
 0x279   :  { %9213 = vrsqrt.f32 %v841_v16  ;;  %v840_v18 = vmul.f32 0.0052083335, %v838_v17 }
 0x27b   :  { %v842_v19 = vadd.f32 1e-12, %v840_v18 }
 0x27d   :  { %9215 = vrsqrt.f32 %v842_v19 }
 0x286   :  { %v9214_v26 = vpop.eup %9213 }
 0x287   :  { %v846_v28 = vmul.f32 %v9214_v26, %v9876_v37  ;;  %v845_v30 = vmul.f32 %v9214_v26, %v9873_v36 }
 0x289   :  { %v861_v38 = vmul.f32 %v857_v29, %v846_v28  ;;  %v860_v40 = vmul.f32 %v853_v31, %v845_v30 }
 0x28a   :  { %v9216_v32 = vpop.eup %9215 }
 0x28b   :  { %v848_v35 = vmul.f32 %v9216_v32, %v9886_v43  ;;  %v847_v39 = vmul.f32 %v9216_v32, %v9883_v42  ;;  %v876_v37 = vadd.f32 %v872_v33, %v861_v38  ;;  %v875_v46 = vadd.f32 %v868_v34, %v860_v40  ;;  %v8522_v43 = vld [vmem:[%s12330_s3 + $0xfc] ss:$20 sps:$4 sm:$0xff]   ;;  %v8520_v42 = vld [vmem:[%s12330_s3 + $0xf8] ss:$20 sps:$4 sm:$0xff]  }
 0x28d   :  { %v863_v41 = vmul.f32 %v857_v29, %v848_v35  ;;  %v862_v44 = vmul.f32 %v853_v31, %v847_v39  ;;  %v10091_v29 = vsub.s32 2, %v9971_v22  ;;  %v10098_v35 = vsub.s32 3, %v9971_v22 }
 0x28f   :  { %v878_v45 = vadd.f32 %v872_v33, %v863_v41  ;;  %v877_v47 = vadd.f32 %v868_v34, %v862_v44  ;;  %v966_v30 = vrot.slane %v10068_v6, %v10091_v29  ;;  %v970_v41 = vrot.slane %v10068_v6, %v10098_v35 }
 0x291   :  { %v880_v36 = vpack.c.bf16 %v878_v45, %v876_v37  ;;  %v879_v49 = vpack.c.bf16 %v877_v47, %v875_v46  ;;  %v10124_v47 = vld [vmem:[%s12333_s27 + $0x8] sm:$0x3] }
 0x293   :  { %7352 = vmatprep.mubr.msk.bf16.mxu1 %vm807_vm0, %v880_v36  ;;  %7354 = vmatprep.mubr.msk.bf16.mxu0 %vm807_vm0, %v880_v36 }
 0x294   :  { %1328 = vmatmul.mubr.bf16.vlgmr.msra.gmra.mxu1 %v879_v49  ;;  %1414 = vmatmul.mubr.bf16.vlgmr.msra.gmra.mxu0 %v879_v49 }
 0x295   :  { %1339 = vmatpush1.bf16.msra.mxu1 %v8517_v48  ;;  %7353 = vmatprep.mubr.msk.bf16.mxu1 %vm807_vm0, %v880_v36 }
 0x296   :  { %1340 = vmatprep.subr.bf16.mxu1 %v8522_v43 }
 0x299   :  { %1341 = vmatpush1.bf16.msra.mxu1 %v8520_v42 }
 0x29a   :  { %1342 = vmatprep.subr.bf16.mxu1 %v8525_v50 }
 0x29d   :  { %1343 = vmatpush1.bf16.msra.mxu1 %v8523_v51 }
 0x29e   :  { %1344 = vmatprep.subr.bf16.mxu1 %v8528_v52 }
 0x2a1   :  { %1345 = vmatpush1.bf16.msra.mxu1 %v8526_v53 }
 0x2a2   :  { %1346 = vmatprep.subr.bf16.mxu1 %v8531_v54 }
 0x2a5   :  { %1347 = vmatpush1.bf16.msra.mxu1 %v8529_v55 }
 0x2a6   :  { %1348 = vmatprep.subr.bf16.mxu1 %v8534_v56 }
 0x2a9   :  { %1349 = vmatpush1.bf16.msra.mxu1 %v8532_v57 }
 0x2aa   :  { %1350 = vmatprep.subr.bf16.mxu1 %v8537_v58 }
 0x2ad   :  { %1351 = vmatpush1.bf16.msra.mxu1 %v8535_v59 }
 0x2ae   :  { %1352 = vmatprep.subr.bf16.mxu1 %v8540_v60 }
 0x2b1   :  { %1353 = vmatpush1.bf16.msra.mxu1 %v8538_v61 }
 0x2b2   :  { %1362 = vmatprep.subr.bf16.mxu1 %v8543_v62 }
 0x2b5   :  { %1363 = vmatpush2.bf16.msra.mxu1 %v8541_v63 }
 0x2b6   :  { %1364 = vmatprep.subr.bf16.mxu1 %v8546_v0 }
 0x2b9   :  { %1365 = vmatpush2.bf16.msra.mxu1 %v8544_v1 }
 0x2ba   :  { %1366 = vmatprep.subr.bf16.mxu1 %v8549_v2 }
 0x2bd   :  { %1367 = vmatpush2.bf16.msra.mxu1 %v8547_v3 }
 0x2be   :  { %1368 = vmatprep.subr.bf16.mxu1 %v8552_v4 }
 0x2c1   :  { %1369 = vmatpush2.bf16.msra.mxu1 %v8550_v5 }
 0x2c4   :  { %1371 = vmatmul.mubr.bf16.vlgmr.msra.gmra.mxu1 %v879_v49  ;;  %v10129_v49 = vld [vmem:[%s12333_s27] sm:$0xff] }
 0x354   :  { %v1329_v12 = vpop.f32.mrf.mxu1  ;;  %v10074_v13 = vpop.f32.mrf.mxu0 }
 0x355   :  { %v10076_v14 = vadd.f32 %v1329_v12, %v958_v9 }
 0x356   :  { %v1331_v16 = vpop.f32.mrf.mxu1  ;;  %v1417_v17 = vpop.f32.mrf.mxu0 }
 0x357   :  { %v10078_v18 = vadd.f32 %v1331_v16, %v962_v10  ;;  %8205 = vmatprep.mubr.msk.f32.mxu1 %vm807_vm0, %v10076_v14 }
 0x358   :  { %v1333_v19 = vpop.f32.mrf.mxu1  ;;  %v10082_v20 = vpop.f32.mrf.mxu0 }
 0x359   :  { %v1334_v25 = vadd.f32 %v1333_v19, %v958_v9  ;;  %1448 = vrot.lane.b32.xlu1 %v10078_v18, %s12317_s28 }
 0x35a   :  { %v1335_v26 = vpop.f32.mrf.mxu1  ;;  %v1420_v27 = vpop.f32.mrf.mxu0 }
 0x35b   :  { %v10086_v28 = vadd.f32 %v1335_v26, %v962_v10 }
 0x35d   :  { %1450 = vrot.lane.b32.xlu0 %v10086_v28, %s12317_s28 }
 0x384   :  { %v1372_v31 = vpop.f32.mrf.mxu1 }
 0x385   :  { %v10095_v32 = vadd.f32 %v1372_v31, %v966_v30 }
 0x386   :  { %v1374_v33 = vpop.f32.mrf.mxu1 }
 0x387   :  { %v10110_v37 = vadd.f32 %v1374_v33, %v970_v41  ;;  %v8553_v33 = vld [vmem:[%s12295_s9 + $0x70] ss:$8 sps:$4 sm:$0xff]  }
 0x388   :  { %v1376_v34 = vpop.f32.mrf.mxu1 }
 0x389   :  { %v10115_v45 = vadd.f32 %v1376_v34, %v966_v30  ;;  %v8555_v34 = vld [vmem:[%s12295_s9 + $0x74] ss:$8 sps:$4 sm:$0xff]  }
 0x38a   :  { %v1378_v39 = vpop.f32.mrf.mxu1 }
 0x38b   :  { %v10105_v44 = vadd.f32 %v1378_v39, %v970_v41  ;;  %v8556_v39 = vld [vmem:[%s12295_s9 + $0x60] ss:$8 sps:$4 sm:$0xff]  }
 0x3cb   :  { %v1449_v40 = vpop.permute.xlu1 %1448 }
 0x3cf   :  { %v1451_v38 = vpop.permute.xlu0 %1450 }
 0x3d0   :  { %8201 = vmatprep.subr.msk.mxu1 %vm807_vm0, %v1451_v38 }
 0x3d1   :  { %8202 = vmatpush3.xpose.msk.msra.mxu1 %vm807_vm0, %v1451_v38  ;;  %v8558_v38 = vld [vmem:[%s12295_s9 + $0x64] ss:$8 sps:$4 sm:$0xff]  }
 0x3d2   :  { %8203 = vmatprep.subr.msk.mxu1 %vm807_vm0, %v1449_v40 }
 0x3d5   :  { %8204 = vmatpush3.xpose.msk.msra.mxu1 %vm807_vm0, %v1449_v40 }
 0x3d6   :  { %8208 = vmatprep.subr.msk.mxu1 %vm812_vm1, %v10105_v44 }
 0x3d8   :  { %8206 = vmatmul.mubr.msk.f32.vlgmr.msra.gmra.mxu1 %vm807_vm0, %v1334_v25 }
 0x3d9   :  { %8209 = vmatpush3.msk.msra.mxu1 %vm812_vm1, %v10105_v44 }
 0x3da   :  { %8210 = vmatprep.subr.mxu1 %v10110_v37 }
 0x3db   :  { %8211 = vmatpush3.msra.mxu1 %v10110_v37 }
 0x3dc   :  { %8215 = vmatprep.subr.msk.mxu1 %vm807_vm0, %v10115_v45 }
 0x498   :  { %v8207_v46 = vpop.f32.mrf.mxu1 }
 0x499   :  { %v1538_v36 = vmul.f32 0.125, %v8207_v46 }
 0x49a   :  { %v1528_v48 = vpop.f32.mrf.mxu1 }
 0x49b   :  { %v1537_v43 = vmul.f32 0.125, %v1528_v48  ;;  %v1540_v42 = vadd.f32 %v1538_v36, %v10124_v47 }
 0x49d   :  { %v1546_v50 = vsel %vm1545_vm3, %v1540_v42, -inf  ;;  %v1539_v51 = vadd.f32 %v1537_v43, %v10129_v49 }
 0x49e   :  { %1547 = vmax.xlane.f32.xlu0 %v1546_v50 }
 0x49f   :  { %v1542_v52 = vsel %vm1541_vm4, %v1539_v51, -inf }
 0x4a0   :  { %1543 = vmax.xlane.f32.xlu1 %v1542_v52 }
 0x527   :  { %v1548_v53 = vpop.xlane.xlu0 %1547 }
 0x528   :  { %v1550_v54 = vsub.f32 %v1540_v42, %v1548_v53  ;;  %v8561_v53 = vld [vmem:[%s12295_s9 + $0x54] ss:$8 sps:$4 sm:$0xff]  }
 0x529   :  { %v1544_v55 = vpop.xlane.xlu1 %1543 }
 0x52a   :  { %v1553_v56 = vmul.f32 1.442695, %v1550_v54  ;;  %v1549_v57 = vsub.f32 %v1539_v51, %v1544_v55  ;;  %v8559_v54 = vld [vmem:[%s12295_s9 + $0x50] ss:$8 sps:$4 sm:$0xff]   ;;  %v8564_v55 = vld [vmem:[%s12295_s9 + $0x44] ss:$8 sps:$4 sm:$0xff]  }
 0x52c   :  { %9217 = vpow2.f32 %v1553_v56  ;;  %v1551_v58 = vmul.f32 1.442695, %v1549_v57  ;;  %v8562_v56 = vld [vmem:[%s12295_s9 + $0x40] ss:$8 sps:$4 sm:$0xff]  }
 0x52e   :  { %9219 = vpow2.f32 %v1551_v58 }
 0x539   :  { %v9218_v59 = vpop.eup %9217 }
 0x53a   :  { %v1558_v60 = vsel %vm1545_vm3, %v9218_v59, 0.0 }
 0x53b   :  { %v9220_v61 = vpop.eup %9219  ;;  %1559 = vadd.xlane.f32.xlu1 %v1558_v60 }
 0x53c   :  { %v1555_v62 = vsel %vm1541_vm4, %v9220_v61, 0.0 }
 0x53d   :  { %1556 = vadd.xlane.f32.xlu0 %v1555_v62  ;;  %v8565_v62 = vld [vmem:[%s12295_s9 + $0x30] ss:$8 sps:$4 sm:$0xff]  }
 0x54c   :  { %1652 = vrot.lane.b32.xlu1 %v1334_v25, %s12317_s28 }
 0x553   :  { %1650 = vrot.lane.b32.xlu0 %v10076_v14, %s12317_s28 }
 0x5c4   :  { %v1560_v63 = vpop.xlane.xlu1 %1559 }
 0x5c5   :  { %9221 = vrcp.f32 %v1560_v63 }
 0x5c6   :  { %v1557_v0 = vpop.xlane.xlu0 %1556 }
 0x5c7   :  { %9223 = vrcp.f32 %v1557_v0  ;;  %v8570_v0 = vld [vmem:[%s12295_s9 + $0x24] ss:$8 sps:$4 sm:$0xff]  }
 0x5c8   :  { %v1653_v9 = vpop.permute.xlu1 %1652 }
 0x5ca   :  { %v1651_v5 = vpop.permute.xlu0 %1650 }
 0x5d2   :  { %v9222_v1 = vpop.eup %9221 }
 0x5d3   :  { %v1564_v4 = vmul.f32 %v9222_v1, %v9218_v59  ;;  %v8568_v1 = vld [vmem:[%s12295_s9 + $0x20] ss:$8 sps:$4 sm:$0xff]  }
 0x5d4   :  { %v9224_v2 = vpop.eup %9223 }
 0x5d5   :  { %v1562_v3 = vmul.f32 %v9224_v2, %v9220_v61  ;;  %v8573_v2 = vld [vmem:[%s12295_s9 + $0x14] ss:$8 sps:$4 sm:$0xff]  }
 0x5d7   :  { %8212 = vmatprep.mubr.msk.f32.mxu1 %vm1541_vm4, %v1562_v3  ;;  %v8571_v3 = vld [vmem:[%s12295_s9 + $0x10] ss:$8 sps:$4 sm:$0xff]  }
 0x5d8   :  { %8213 = vmatmul.mubr.msk.f32.vlgmr.msra.gmra.mxu1 %vm1541_vm4, %v1564_v4  ;;  %v10220_v4 = vsub.s32 4, %v9971_v22 }
 0x5d9   :  { %8216 = vmatpush3.xpose.msk.msra.mxu1 %vm807_vm0, %v10115_v45  ;;  %8219 = vmatprep.mubr.msk.f32.mxu1 %vm807_vm0, %v1651_v5  ;;  %v8576_v5 = vld [vmem:[%s12295_s9 + $0x4] ss:$8 sps:$4 sm:$0xff]  }
 0x5da   :  { %8217 = vmatprep.subr.msk.mxu1 %vm807_vm0, %v10095_v32 }
 0x5dd   :  { %8218 = vmatpush3.xpose.msk.msra.mxu1 %vm807_vm0, %v10095_v32 }
 0x5de   :  { %1906 = vmatprep.subr.bf16.mxu1 %v8555_v34 }
 0x5e0   :  { %8220 = vmatmul.mubr.msk.f32.vlgmr.msra.gmra.mxu1 %vm807_vm0, %v1653_v9  ;;  %v8574_v9 = vld [vmem:[%s12295_s9] ss:$8 sps:$4 sm:$0xff]  }
 0x5e1   :  { %1930 = vmatprep.mubr.bf16.mxu1 %v9349_v21  ;;  %1907 = vmatpush1.bf16.msra.mxu1 %v8553_v33 }
 0x5e2   :  { %1908 = vmatprep.subr.bf16.mxu1 %v8558_v38 }
 0x5e5   :  { %1909 = vmatpush1.bf16.msra.mxu1 %v8556_v39 }
 0x5e6   :  { %1910 = vmatprep.subr.bf16.mxu1 %v8561_v53  ;;  %v8580_v53 = vld [vmem:[%s12295_s9 + $0xa0] ss:$8 sps:$4 sm:$0xff]  }
 0x5e9   :  { %1911 = vmatpush1.bf16.msra.mxu1 %v8559_v54  ;;  %v8585_v54 = vld [vmem:[%s12295_s9 + $0x94] ss:$8 sps:$4 sm:$0xff]  }
 0x5ea   :  { %1912 = vmatprep.subr.bf16.mxu1 %v8564_v55  ;;  %v8583_v55 = vld [vmem:[%s12295_s9 + $0x90] ss:$8 sps:$4 sm:$0xff]  }
 0x5ed   :  { %1913 = vmatpush1.bf16.msra.mxu1 %v8562_v56 }
 0x698   :  { %v10151_v10 = vpop.f32.mrf.mxu1 }
 0x69a   :  { %v10153_v12 = vpop.f32.mrf.mxu1 }
 0x69b   :  { %v1649_v14 = vpack.c.bf16 %v10151_v10, %v10153_v12 }
 0x6a0   :  { %v8221_v16 = vpop.f32.mrf.mxu1 }
 0x6a1   :  { %v1740_v17 = vmul.f32 0.125, %v8221_v16  ;;  %v974_v16 = vrot.slane %v10068_v6, %v10220_v4 }
 0x6a2   :  { %v1730_v19 = vpop.f32.mrf.mxu1 }
 0x6a3   :  { %v1739_v25 = vmul.f32 0.125, %v1730_v19  ;;  %v1742_v26 = vadd.f32 %v1740_v17, %v10124_v47  ;;  %v1419_v17 = vadd.f32 %v10082_v20, %v974_v16  ;;  %v1416_v19 = vadd.f32 %v10074_v13, %v974_v16 }
 0x6a5   :  { %v1746_v27 = vsel %vm1545_vm3, %v1742_v26, -inf  ;;  %v1741_v30 = vadd.f32 %v1739_v25, %v10129_v49 }
 0x6a6   :  { %1747 = vmax.xlane.f32.xlu0 %v1746_v27 }
 0x6a7   :  { %v1743_v31 = vsel %vm1541_vm4, %v1741_v30, -inf }
 0x6a8   :  { %1744 = vmax.xlane.f32.xlu1 %v1743_v31 }
 0x72f   :  { %v1748_v40 = vpop.xlane.xlu0 %1747 }
 0x730   :  { %v1750_v41 = vsub.f32 %v1742_v26, %v1748_v40 }
 0x731   :  { %v1745_v46 = vpop.xlane.xlu1 %1744 }
 0x732   :  { %v1753_v36 = vmul.f32 1.442695, %v1750_v41  ;;  %v1749_v48 = vsub.f32 %v1741_v30, %v1745_v46 }
 0x734   :  { %9225 = vpow2.f32 %v1753_v36  ;;  %v1751_v43 = vmul.f32 1.442695, %v1749_v48 }
 0x736   :  { %9227 = vpow2.f32 %v1751_v43 }
 0x741   :  { %v9226_v42 = vpop.eup %9225 }
 0x742   :  { %v1758_v50 = vsel %vm1545_vm3, %v9226_v42, 0.0 }
 0x743   :  { %v9228_v51 = vpop.eup %9227  ;;  %1759 = vadd.xlane.f32.xlu1 %v1758_v50 }
 0x744   :  { %v1755_v52 = vsel %vm1541_vm4, %v9228_v51, 0.0 }
 0x745   :  { %1756 = vadd.xlane.f32.xlu0 %v1755_v52  ;;  %v8582_v52 = vld [vmem:[%s12295_s9 + $0xa4] ss:$8 sps:$4 sm:$0xff]  }
 0x754   :  { %1766 = vrot.lane.b32.xlu1 %v10110_v37, %s12317_s28  ;;  %v8567_v37 = vld [vmem:[%s12295_s9 + $0x34] ss:$8 sps:$4 sm:$0xff]  }
 0x758   :  { %2029 = vrot.lane.b32.xlu1 %v10115_v45, %s12317_s28 }
 0x75b   :  { %1768 = vrot.lane.b32.xlu0 %v10105_v44, %s12317_s28 }
 0x75c   :  { %2027 = vrot.lane.b32.xlu1 %v10095_v32, %s12317_s28 }
 0x7cc   :  { %v1760_v57 = vpop.xlane.xlu1 %1759 }
 0x7cd   :  { %9229 = vrcp.f32 %v1760_v57 }
 0x7ce   :  { %v1757_v58 = vpop.xlane.xlu0 %1756 }
 0x7cf   :  { %9231 = vrcp.f32 %v1757_v58 }
 0x7d0   :  { %v1767_v59 = vpop.permute.xlu1 %1766 }
 0x7d2   :  { %v1769_v60 = vpop.permute.xlu0 %1768 }
 0x7d3   :  { %8222 = vmatprep.subr.msk.mxu0 %vm812_vm1, %v1769_v60 }
 0x7d4   :  { %8223 = vmatpush3.msk.msra.mxu0 %vm812_vm1, %v1769_v60  ;;  %v2030_v45 = vpop.permute.xlu1 %2029 }
 0x7d5   :  { %8224 = vmatprep.subr.mxu0 %v1767_v59  ;;  %8229 = vmatprep.subr.msk.mxu1 %vm807_vm0, %v2030_v45 }
 0x7d6   :  { %8225 = vmatpush3.msra.mxu0 %v1767_v59 }
 0x7d7   :  { %1992 = vmatprep.subr.bf16.mxu0 %v8567_v37 }
 0x7d8   :  { %v2028_v20 = vpop.permute.xlu1 %2027 }
 0x7da   :  { %v9230_v32 = vpop.eup %9229 }
 0x7db   :  { %v1764_v63 = vmul.f32 %v9230_v32, %v9226_v42  ;;  %v8588_v32 = vld [vmem:[%s12295_s9 + $0x84] ss:$8 sps:$4 sm:$0xff]  }
 0x7dc   :  { %v9232_v44 = vpop.eup %9231 }
 0x7dd   :  { %v1762_v61 = vmul.f32 %v9232_v44, %v9228_v51  ;;  %v8579_v51 = vld [vmem:[%s12295_s9 + $0xb4] ss:$8 sps:$4 sm:$0xff]  }
 0x7df   :  { %8226 = vmatprep.mubr.msk.f32.mxu0 %vm1541_vm4, %v1762_v61 }
 0x7e0   :  { %8227 = vmatmul.mubr.msk.f32.vlgmr.msra.gmra.mxu0 %vm1541_vm4, %v1764_v63 }
 0x7e1   :  { %1993 = vmatpush1.bf16.msra.mxu0 %v8565_v62  ;;  %2016 = vmatprep.mubr.bf16.mxu0 %v9349_v21 }
 0x7e2   :  { %1994 = vmatprep.subr.bf16.mxu0 %v8570_v0 }
 0x7e5   :  { %1995 = vmatpush1.bf16.msra.mxu0 %v8568_v1 }
 0x7e6   :  { %1996 = vmatprep.subr.bf16.mxu0 %v8573_v2 }
 0x7e9   :  { %1997 = vmatpush1.bf16.msra.mxu0 %v8571_v3 }
 0x7ea   :  { %1998 = vmatprep.subr.bf16.mxu0 %v8576_v5 }
 0x7ed   :  { %1999 = vmatpush1.bf16.msra.mxu0 %v8574_v9 }
 0x7ee   :  { %8236 = vmatprep.subr.msk.mxu0 %vm812_vm1, %v1419_v17 }
 0x7f0   :  { %7386 = vmatmul.mubr.msk.bf16.vlgmr.msra.gmra.mxu0 %vm807_vm0, %v1649_v14 }
 0x7f1   :  { %8237 = vmatpush3.msk.msra.mxu0 %vm812_vm1, %v1419_v17  ;;  %v2319_v17 = vld [vmem:[%s12296_s10] sm:$0x3] }
 0x7f2   :  { %8238 = vmatprep.subr.mxu0 %v1416_v19 }
 0x7f3   :  { %8239 = vmatpush3.msra.mxu0 %v1416_v19 }
 0x8a0   :  { %v8228_v25 = vpop.f32.mrf.mxu0 }
 0x8a2   :  { %v1845_v26 = vpop.f32.mrf.mxu0 }
 0x8a3   :  { %v1854_v6 = vpack.c.bf16 %v8228_v25, %v1845_v26 }
 0x8a5   :  { %7377 = vmatmul.mubr.msk.bf16.vlgmr.msra.gmra.mxu1 %vm807_vm0, %v1854_v6  ;;  %v2328_v6 = vrot.slane %v2319_v17, %v9974_v23 }
 0x8a6   :  { %8230 = vmatpush3.xpose.msk.msra.mxu1 %vm807_vm0, %v2030_v45  ;;  %8233 = vmatprep.mubr.msk.f32.mxu1 %vm807_vm0, %v10078_v18  ;;  %v8586_v45 = vld [vmem:[%s12295_s9 + $0x80] ss:$8 sps:$4 sm:$0xff]  }
 0x8a7   :  { %8231 = vmatprep.subr.msk.mxu1 %vm807_vm0, %v2028_v20 }
 0x8aa   :  { %8232 = vmatpush3.xpose.msk.msra.mxu1 %vm807_vm0, %v2028_v20 }
 0x8ab   :  { %2276 = vmatprep.subr.bf16.mxu1 %v8579_v51  ;;  %v8606_v51 = vld [vmem:[%s12299_s13 + $0xfc] ss:$24 sps:$4 sm:$0xff]  }
 0x8ad   :  { %8234 = vmatmul.mubr.msk.f32.vlgmr.msra.gmra.mxu1 %vm807_vm0, %v10086_v28 }
 0x8ae   :  { %2300 = vmatprep.mubr.bf16.mxu1 %v9349_v21 }
 0x8b0   :  { %v2018_v44 = vpop.f32.mrf.mxu0 }
 0x8b2   :  { %v2020_v61 = vpop.f32.mrf.mxu0 }
 0x8b4   :  { %v2022_v62 = vpop.f32.mrf.mxu0 }
 0x8b6   :  { %v2024_v63 = vpop.f32.mrf.mxu0 }
 0x965   :  { %v1932_v13 = vpop.f32.mrf.mxu1 }
 0x966   :  { %v2019_v3 = vadd.f32 %v2018_v44, %v1932_v13 }
 0x967   :  { %v10247_v10 = vpop.f32.mrf.mxu1 }
 0x968   :  { %v2021_v9 = vadd.f32 %v2020_v61, %v10247_v10 }
 0x969   :  { %v10249_v12 = vpop.f32.mrf.mxu1 }
 0x96a   :  { %v2023_v25 = vadd.f32 %v2022_v62, %v10249_v12 }
 0x96b   :  { %v10251_v14 = vpop.f32.mrf.mxu1 }
 0x96c   :  { %v2025_v13 = vadd.f32 %v2024_v63, %v10251_v14 }
 0x96d   :  { %v8235_v27 = vpop.f32.mrf.mxu1 }
 0x96e   :  { %v2115_v30 = vmul.f32 0.125, %v8235_v27  ;;  %v2324_v27 = vrot.slane %v2319_v17, %v9977_v24 }
 0x96f   :  { %v2105_v31 = vpop.f32.mrf.mxu1 }
 0x970   :  { %v2114_v18 = vmul.f32 0.125, %v2105_v31  ;;  %v2117_v33 = vadd.f32 %v2115_v30, %v10124_v47 }
 0x972   :  { %v2121_v34 = vsel %vm1545_vm3, %v2117_v33, -inf  ;;  %v2116_v38 = vadd.f32 %v2114_v18, %v10129_v49  ;;  %v8577_v49 = vld [vmem:[%s12295_s9 + $0xb0] ss:$8 sps:$4 sm:$0xff]  }
 0x973   :  { %2122 = vmax.xlane.f32.xlu1 %v2121_v34  ;;  %2277 = vmatpush1.bf16.msra.mxu1 %v8577_v49  ;;  %v8603_v49 = vld [vmem:[%s12299_s13 + $0xf4] ss:$24 sps:$4 sm:$0xff]  }
 0x974   :  { %v2118_v28 = vsel %vm1541_vm4, %v2116_v38, -inf  ;;  %2278 = vmatprep.subr.bf16.mxu1 %v8582_v52  ;;  %v8601_v52 = vld [vmem:[%s12299_s13 + $0xf0] ss:$24 sps:$4 sm:$0xff]  }
 0x975   :  { %2119 = vmax.xlane.f32.xlu0 %v2118_v28 }
 0x977   :  { %2279 = vmatpush1.bf16.msra.mxu1 %v8580_v53  ;;  %v8604_v53 = vld [vmem:[%s12299_s13 + $0xf8] ss:$24 sps:$4 sm:$0xff]  }
 0x978   :  { %2280 = vmatprep.subr.bf16.mxu1 %v8585_v54  ;;  %v8609_v54 = vld [vmem:[%s12299_s13 + $0xc4] ss:$24 sps:$4 sm:$0xff]  }
 0x97b   :  { %2281 = vmatpush1.bf16.msra.mxu1 %v8583_v55  ;;  %v8612_v55 = vld [vmem:[%s12299_s13 + $0xcc] ss:$24 sps:$4 sm:$0xff]  }
 0x97c   :  { %2282 = vmatprep.subr.bf16.mxu1 %v8588_v32 }
 0x97f   :  { %2283 = vmatpush1.bf16.msra.mxu1 %v8586_v45 }
 0x9fc   :  { %v2123_v39 = vpop.xlane.xlu1 %2122 }
 0x9fd   :  { %v2125_v40 = vsub.f32 %v2117_v33, %v2123_v39 }
 0x9fe   :  { %v2120_v41 = vpop.xlane.xlu0 %2119 }
 0x9ff   :  { %v2124_v46 = vsub.f32 %v2116_v38, %v2120_v41  ;;  %v2128_v36 = vmul.f32 1.442695, %v2125_v40 }
 0xa01   :  { %v2126_v48 = vmul.f32 1.442695, %v2124_v46  ;;  %v8591_v46 = vld [vmem:[%s12299_s13 + $0x154] ss:$24 sps:$4 sm:$0xff]  }
 0xa02   :  { %2874 = vmatprep.subr.bf16.mxu0 %v8591_v46  ;;  %v8648_v46 = vld [vmem:[%s12299_s13 + $0x1ec] ss:$24 sps:$4 sm:$0xff]  }
 0xa03   :  { %9233 = vpow2.f32 %v2126_v48  ;;  %v8594_v48 = vld [vmem:[%s12299_s13 + $0x15c] ss:$24 sps:$4 sm:$0xff]  }
 0xa04   :  { %9235 = vpow2.f32 %v2128_v36  ;;  %v8592_v36 = vld [vmem:[%s12299_s13 + $0x158] ss:$24 sps:$4 sm:$0xff]   ;;  %2917 = vmatprep.subr.bf16.mxu1 %v8594_v48  ;;  %v8646_v48 = vld [vmem:[%s12299_s13 + $0x1e8] ss:$24 sps:$4 sm:$0xff]  }
 0xa10   :  { %v9234_v43 = vpop.eup %9233 }
 0xa11   :  { %v2130_v42 = vsel %vm1541_vm4, %v9234_v43, 0.0  ;;  %v9236_v47 = vpop.eup %9235 }
 0xa12   :  { %2131 = vadd.xlane.f32.xlu0 %v2130_v42  ;;  %v2133_v50 = vsel %vm1545_vm3, %v9236_v47, 0.0  ;;  %v8600_v42 = vld [vmem:[%s12299_s13 + $0x12c] ss:$24 sps:$4 sm:$0xff]  }
 0xa16   :  { %2134 = vadd.xlane.f32.xlu0 %v2133_v50  ;;  %v8598_v50 = vld [vmem:[%s12299_s13 + $0x128] ss:$24 sps:$4 sm:$0xff]  }
 0xa9b   :  { %v2132_v56 = vpop.xlane.xlu0 %2131 }
 0xa9c   :  { %9237 = vrcp.f32 %v2132_v56  ;;  %v8607_v56 = vld [vmem:[%s12299_s13 + $0xc0] ss:$24 sps:$4 sm:$0xff]  }
 0xa9f   :  { %v2135_v57 = vpop.xlane.xlu0 %2134 }
 0xaa0   :  { %9239 = vrcp.f32 %v2135_v57  ;;  %v8610_v57 = vld [vmem:[%s12299_s13 + $0xc8] ss:$24 sps:$4 sm:$0xff]  }
 0xaa9   :  { %v9238_v58 = vpop.eup %9237 }
 0xaaa   :  { %v2137_v59 = vmul.f32 %v9238_v58, %v9234_v43  ;;  %v8597_v43 = vld [vmem:[%s12299_s13 + $0x124] ss:$24 sps:$4 sm:$0xff]   ;;  %v8615_v58 = vld [vmem:[%s12299_s13 + $0x94] ss:$24 sps:$4 sm:$0xff]  }
 0xaac   :  { %8240 = vmatprep.mubr.msk.f32.mxu0 %vm1541_vm4, %v2137_v59  ;;  %v8618_v59 = vld [vmem:[%s12299_s13 + $0x9c] ss:$24 sps:$4 sm:$0xff]  }
 0xaad   :  { %v9240_v60 = vpop.eup %9239 }
 0xaae   :  { %v2139_v37 = vmul.f32 %v9240_v60, %v9236_v47  ;;  %v8595_v47 = vld [vmem:[%s12299_s13 + $0x120] ss:$24 sps:$4 sm:$0xff]   ;;  %v8613_v60 = vld [vmem:[%s12299_s13 + $0x90] ss:$24 sps:$4 sm:$0xff]  }
 0xab0   :  { %8241 = vmatmul.mubr.msk.f32.vlgmr.msra.gmra.mxu0 %vm1541_vm4, %v2139_v37  ;;  %v8616_v37 = vld [vmem:[%s12299_s13 + $0x98] ss:$24 sps:$4 sm:$0xff]  }
 0xb70   :  { %v8242_v0 = vpop.f32.mrf.mxu0 }
 0xb72   :  { %v2215_v1 = vpop.f32.mrf.mxu0 }
 0xb73   :  { %v2224_v2 = vpack.c.bf16 %v8242_v0, %v2215_v1 }
 0xb75   :  { %7402 = vmatmul.mubr.msk.bf16.vlgmr.msra.gmra.mxu1 %vm807_vm0, %v2224_v2 }
 0xb76   :  { %2918 = vmatpush1.bf16.msra.mxu1 %v8592_v36  ;;  %v8643_v36 = vld [vmem:[%s12299_s13 + $0x1e0] ss:$24 sps:$4 sm:$0xff]  }
 0xb77   :  { %2919 = vmatprep.subr.bf16.mxu1 %v8600_v42  ;;  %v8654_v42 = vld [vmem:[%s12299_s13 + $0x1bc] ss:$24 sps:$4 sm:$0xff]  }
 0xb7a   :  { %2920 = vmatpush1.bf16.msra.mxu1 %v8598_v50  ;;  %v8652_v50 = vld [vmem:[%s12299_s13 + $0x1b8] ss:$24 sps:$4 sm:$0xff]  }
 0xb7b   :  { %2921 = vmatprep.subr.bf16.mxu1 %v8606_v51  ;;  %v8660_v51 = vld [vmem:[%s12299_s13 + $0x18c] ss:$24 sps:$4 sm:$0xff]  }
 0xb7e   :  { %2922 = vmatpush1.bf16.msra.mxu1 %v8604_v53  ;;  %v8658_v53 = vld [vmem:[%s12299_s13 + $0x188] ss:$24 sps:$4 sm:$0xff]  }
 0xb7f   :  { %2923 = vmatprep.subr.bf16.mxu1 %v8612_v55  ;;  %v8699_v55 = vld [vmem:[%s12301_s15 + $0x74] ss:$8 sps:$4 sm:$0xff]  }
 0xb82   :  { %2924 = vmatpush1.bf16.msra.mxu1 %v8610_v57 }
 0xb83   :  { %2925 = vmatprep.subr.bf16.mxu1 %v8618_v59 }
 0xb86   :  { %2926 = vmatpush1.bf16.msra.mxu1 %v8616_v37 }
 0xc35   :  { %v2302_v5 = vpop.f32.mrf.mxu1 }
 0xc36   :  { %v2311_v16 = vadd.f32 %v2302_v5, %v2019_v3 }
 0xc37   :  { %v2304_v19 = vpop.f32.mrf.mxu1 }
 0xc38   :  { %v2312_v26 = vadd.f32 %v2304_v19, %v2021_v9  ;;  %v2315_v20 = vadd.f32 %v2311_v16, %v9812_v8 }
 0xc39   :  { %v2306_v30 = vpop.f32.mrf.mxu1 }
 0xc3a   :  { %v2316_v10 = vadd.f32 %v2312_v26, %v9810_v7  ;;  %v2313_v31 = vadd.f32 %v2306_v30, %v2023_v25  ;;  %v10299_v12 = vadd.f32 %v2324_v27, %v2315_v20  ;;  %v8619_v20 = vld [vmem:[%s12299_s13 + $0x60] ss:$24 sps:$4 sm:$0xff]  }
 0xc3b   :  { %v2308_v18 = vpop.f32.mrf.mxu1  ;;  %v8622_v30 = vld [vmem:[%s12299_s13 + $0x68] ss:$24 sps:$4 sm:$0xff]  }
 0xc3c   :  { %v10296_v33 = vadd.f32 %v2328_v6, %v2316_v10  ;;  %v2317_v34 = vadd.f32 %v2313_v31, %v9814_v11  ;;  %v2314_v38 = vadd.f32 %v2308_v18, %v2025_v13  ;;  %v8627_v13 = vld [vmem:[%s12299_s13 + $0x34] ss:$24 sps:$4 sm:$0xff]   ;;  %v8625_v10 = vld [vmem:[%s12299_s13 + $0x30] ss:$24 sps:$4 sm:$0xff]  }
 0xc3d   :  { %v8630_v31 = vld [vmem:[%s12299_s13 + $0x3c] ss:$24 sps:$4 sm:$0xff]   ;;  %v8628_v18 = vld [vmem:[%s12299_s13 + $0x38] ss:$24 sps:$4 sm:$0xff]  }
 0xc3e   :  { %v10301_v28 = vadd.f32 %v2324_v27, %v2317_v34  ;;  %v2318_v8 = vadd.f32 %v2314_v38, %v9819_v15  ;;  %v2337_v39 = vsel %vm807_vm0, %v10296_v33, 0.0  ;;  %v8589_v15 = vld [vmem:[%s12299_s13 + $0x150] ss:$24 sps:$4 sm:$0xff]   ;;  %v8624_v27 = vld [vmem:[%s12299_s13 + $0x6c] ss:$24 sps:$4 sm:$0xff]  }
 0xc3f   :  { %v2338_v14 = vadd.f32 %v2337_v39, %v10299_v12  ;;  %2875 = vmatpush1.bf16.msra.mxu0 %v8589_v15  ;;  %2927 = vmatprep.subr.bf16.mxu1 %v8624_v27  ;;  %v8631_v34 = vld [vmem:[%s12299_s13] ss:$24 sps:$4 sm:$0xff]   ;;  %v8633_v38 = vld [vmem:[%s12299_s13 + $0x4] ss:$24 sps:$4 sm:$0xff]  }
 0xc40   :  { %v10307_v40 = vadd.f32 %v2328_v6, %v2318_v8  ;;  %v2341_v7 = vsel %vm812_vm1, %v10301_v28, 0.0  ;;  %2876 = vmatprep.subr.bf16.mxu0 %v8597_v43  ;;  %v8621_v6 = vld [vmem:[%s12299_s13 + $0x64] ss:$24 sps:$4 sm:$0xff]   ;;  %2928 = vmatpush1.bf16.msra.mxu1 %v8622_v30  ;;  %v8634_v8 = vld [vmem:[%s12299_s13 + $0x8] ss:$24 sps:$4 sm:$0xff]  }
 0xc41   :  { %2339 = vadd.xlane.f32.xlu0 %v2338_v14  ;;  %2929 = vmatprep.subr.bf16.mxu1 %v8630_v31  ;;  %v8636_v39 = vld [vmem:[%s12299_s13 + $0xc] ss:$24 sps:$4 sm:$0xff]   ;;  %v8661_v31 = vld [vmem:[%s12299_s13 + $0x160] ss:$24 sps:$4 sm:$0xff]  }
 0xc42   :  { %v2342_v11 = vsel %vm814_vm2, %v10307_v40, 0.0  ;;  %v8639_v14 = vld [vmem:[%s12299_s13 + $0x214] ss:$24 sps:$4 sm:$0xff]   ;;  %v8645_v15 = vld [vmem:[%s12299_s13 + $0x1e4] ss:$24 sps:$4 sm:$0xff]  }
 0xc43   :  { %v2343_v41 = vadd.f32 %v2342_v11, %v2341_v7  ;;  %2877 = vmatpush1.bf16.msra.mxu0 %v8595_v47  ;;  %v8642_v7 = vld [vmem:[%s12299_s13 + $0x21c] ss:$24 sps:$4 sm:$0xff]   ;;  %v8637_v11 = vld [vmem:[%s12299_s13 + $0x210] ss:$24 sps:$4 sm:$0xff]  }
 0xc44   :  { %2878 = vmatprep.subr.bf16.mxu0 %v8603_v49  ;;  %2930 = vmatpush1.bf16.msra.mxu1 %v8628_v18  ;;  %v8651_v43 = vld [vmem:[%s12299_s13 + $0x1b4] ss:$24 sps:$4 sm:$0xff]   ;;  %v8649_v47 = vld [vmem:[%s12299_s13 + $0x1b0] ss:$24 sps:$4 sm:$0xff]   ;;  %v8657_v49 = vld [vmem:[%s12299_s13 + $0x184] ss:$24 sps:$4 sm:$0xff]  }
 0xc45   :  { %2344 = vadd.xlane.f32.xlu1 %v2343_v41  ;;  %2931 = vmatprep.subr.bf16.mxu1 %v8636_v39  ;;  %v8640_v41 = vld [vmem:[%s12299_s13 + $0x218] ss:$24 sps:$4 sm:$0xff]   ;;  %v8703_v39 = vld [vmem:[%s12301_s15 + $0x60] ss:$8 sps:$4 sm:$0xff]  }
 0xc47   :  { %2879 = vmatpush1.bf16.msra.mxu0 %v8601_v52  ;;  %v8655_v52 = vld [vmem:[%s12299_s13 + $0x180] ss:$24 sps:$4 sm:$0xff]  }
 0xc48   :  { %2880 = vmatprep.subr.bf16.mxu0 %v8609_v54  ;;  %2932 = vmatpush1.bf16.msra.mxu1 %v8634_v8  ;;  %v8663_v54 = vld [vmem:[%s12299_s13 + $0x164] ss:$24 sps:$4 sm:$0xff]  }
 0xc49   :  { %2941 = vmatprep.subr.bf16.mxu1 %v8642_v7  ;;  %v8669_v8 = vld [vmem:[%s12299_s13 + $0x104] ss:$24 sps:$4 sm:$0xff]   ;;  %v8667_v7 = vld [vmem:[%s12299_s13 + $0x100] ss:$24 sps:$4 sm:$0xff]  }
 0xc4b   :  { %2881 = vmatpush1.bf16.msra.mxu0 %v8607_v56 }
 0xc4c   :  { %2882 = vmatprep.subr.bf16.mxu0 %v8615_v58  ;;  %2942 = vmatpush2.bf16.msra.mxu1 %v8640_v41  ;;  %v8709_v41 = vld [vmem:[%s12301_s15 + $0x50] ss:$8 sps:$4 sm:$0xff]  }
 0xc4d   :  { %2943 = vmatprep.subr.bf16.mxu1 %v8648_v46  ;;  %v8670_v46 = vld [vmem:[%s12299_s13 + $0xd0] ss:$24 sps:$4 sm:$0xff]  }
 0xc4f   :  { %2883 = vmatpush1.bf16.msra.mxu0 %v8613_v60 }
 0xc50   :  { %2884 = vmatprep.subr.bf16.mxu0 %v8621_v6  ;;  %2944 = vmatpush2.bf16.msra.mxu1 %v8646_v48  ;;  %v8715_v48 = vld [vmem:[%s12301_s15 + $0x40] ss:$8 sps:$4 sm:$0xff]  }
 0xc51   :  { %2945 = vmatprep.subr.bf16.mxu1 %v8654_v42  ;;  %v8673_v42 = vld [vmem:[%s12299_s13 + $0xa0] ss:$24 sps:$4 sm:$0xff]  }
 0xc53   :  { %2885 = vmatpush1.bf16.msra.mxu0 %v8619_v20 }
 0xc54   :  { %2886 = vmatprep.subr.bf16.mxu0 %v8627_v13  ;;  %2946 = vmatpush2.bf16.msra.mxu1 %v8652_v50  ;;  %v8721_v50 = vld [vmem:[%s12301_s15 + $0x30] ss:$8 sps:$4 sm:$0xff]  }
 0xc55   :  { %2947 = vmatprep.subr.bf16.mxu1 %v8660_v51  ;;  %v8676_v51 = vld [vmem:[%s12299_s13 + $0x70] ss:$24 sps:$4 sm:$0xff]  }
 0xc57   :  { %2887 = vmatpush1.bf16.msra.mxu0 %v8625_v10 }
 0xc58   :  { %2888 = vmatprep.subr.bf16.mxu0 %v8633_v38  ;;  %2948 = vmatpush2.bf16.msra.mxu1 %v8658_v53  ;;  %v8664_v38 = vld [vmem:[%s12299_s13 + $0x130] ss:$24 sps:$4 sm:$0xff]  }
 0xc59   :  { %3693 = vmatprep.subr.bf16.mxu1 %v8699_v55  ;;  %v8727_v53 = vld [vmem:[%s12301_s15 + $0x20] ss:$8 sps:$4 sm:$0xff]   ;;  %v8684_v55 = vld [vmem:[%s12299_s13 + $0x14] ss:$24 sps:$4 sm:$0xff]  }
 0xc5b   :  { %2889 = vmatpush1.bf16.msra.mxu0 %v8631_v34  ;;  %v8705_v34 = vld [vmem:[%s12301_s15 + $0x64] ss:$8 sps:$4 sm:$0xff]  }
 0xc5c   :  { %2898 = vmatprep.subr.bf16.mxu0 %v8639_v14  ;;  %v8711_v14 = vld [vmem:[%s12301_s15 + $0x54] ss:$8 sps:$4 sm:$0xff]  }
 0xc5f   :  { %2899 = vmatpush2.bf16.msra.mxu0 %v8637_v11  ;;  %v8672_v11 = vld [vmem:[%s12299_s13 + $0xd4] ss:$24 sps:$4 sm:$0xff]  }
 0xc60   :  { %2900 = vmatprep.subr.bf16.mxu0 %v8645_v15  ;;  %v8717_v15 = vld [vmem:[%s12301_s15 + $0x44] ss:$8 sps:$4 sm:$0xff]  }
 0xc63   :  { %2901 = vmatpush2.bf16.msra.mxu0 %v8643_v36  ;;  %v8675_v36 = vld [vmem:[%s12299_s13 + $0xa4] ss:$24 sps:$4 sm:$0xff]  }
 0xc64   :  { %2902 = vmatprep.subr.bf16.mxu0 %v8651_v43  ;;  %v8723_v43 = vld [vmem:[%s12301_s15 + $0x34] ss:$8 sps:$4 sm:$0xff]  }
 0xc67   :  { %2903 = vmatpush2.bf16.msra.mxu0 %v8649_v47  ;;  %v8678_v47 = vld [vmem:[%s12299_s13 + $0x74] ss:$24 sps:$4 sm:$0xff]  }
 0xc68   :  { %2904 = vmatprep.subr.bf16.mxu0 %v8657_v49  ;;  %v8729_v49 = vld [vmem:[%s12301_s15 + $0x24] ss:$8 sps:$4 sm:$0xff]  }
 0xc6b   :  { %2905 = vmatpush2.bf16.msra.mxu0 %v8655_v52  ;;  %v8681_v52 = vld [vmem:[%s12299_s13 + $0x44] ss:$24 sps:$4 sm:$0xff]  }
 0xc6c   :  { %2960 = vmatprep.subr.bf16.mxu0 %v8663_v54  ;;  %v8679_v54 = vld [vmem:[%s12299_s13 + $0x40] ss:$24 sps:$4 sm:$0xff]  }
 0xcca   :  { %v2340_v45 = vpop.xlane.xlu0 %2339 }
 0xccb   :  { %v2346_v32 = vmul.f32 0.0052083335, %v2340_v45  ;;  %v2335_v45 = vld [vmem:[%s12297_s11] sm:$0x3] }
 0xccd   :  { %v10374_v44 = vsub.f32 %v10299_v12, %v2346_v32  ;;  %v10377_v61 = vsub.f32 %v10296_v33, %v2346_v32 }
 0xcce   :  { %v2345_v62 = vpop.xlane.xlu1 %2344 }
 0xccf   :  { %v2347_v63 = vmul.f32 0.0052083335, %v2345_v62  ;;  %v2352_v0 = vmul.f32 %v10374_v44, %v10374_v44  ;;  %v2353_v1 = vmul.f32 %v10377_v61, %v10377_v61  ;;  %v2336_v62 = vld [vmem:[%s12298_s12] sm:$0x3] }
 0xcd1   :  { %v10384_v2 = vsub.f32 %v10301_v28, %v2347_v63  ;;  %v10387_v3 = vsub.f32 %v10307_v40, %v2347_v63  ;;  %v2356_v5 = vsel %vm807_vm0, %v2353_v1, 0.0 }
 0xcd2   :  { %v2357_v9 = vadd.f32 %v2356_v5, %v2352_v0  ;;  %v2383_v0 = vrot.slane %v2335_v45, %v9974_v23  ;;  %v2379_v5 = vrot.slane %v2335_v45, %v9977_v24  ;;  %v8691_v45 = vld [vmem:[%s12299_s13 + $0x1c0] ss:$24 sps:$4 sm:$0xff]  }
 0xcd3   :  { %v2354_v16 = vmul.f32 %v10384_v2, %v10384_v2  ;;  %v2355_v17 = vmul.f32 %v10387_v3, %v10387_v3 }
 0xcd4   :  { %2358 = vadd.xlane.f32.xlu0 %v2357_v9 }
 0xcd5   :  { %v2360_v19 = vsel %vm812_vm1, %v2354_v16, 0.0  ;;  %v2361_v25 = vsel %vm814_vm2, %v2355_v17, 0.0  ;;  %v2398_v16 = vrot.slane %v2336_v62, %v9974_v23  ;;  %v2394_v17 = vrot.slane %v2336_v62, %v9977_v24  ;;  %v8694_v62 = vld [vmem:[%s12299_s13 + $0x190] ss:$24 sps:$4 sm:$0xff]  }
 0xcd6   :  { %v2362_v26 = vadd.f32 %v2361_v25, %v2360_v19 }
 0xcd8   :  { %2363 = vadd.xlane.f32.xlu1 %v2362_v26 }
 0xd5d   :  { %v2359_v56 = vpop.xlane.xlu0 %2358 }
 0xd5e   :  { %v2365_v57 = vmul.f32 0.0052083335, %v2359_v56  ;;  %v8682_v56 = vld [vmem:[%s12299_s13 + $0x10] ss:$24 sps:$4 sm:$0xff]  }
 0xd60   :  { %v2367_v58 = vadd.f32 1e-12, %v2365_v57  ;;  %v8687_v57 = vld [vmem:[%s12299_s13 + $0x224] ss:$24 sps:$4 sm:$0xff]  }
 0xd61   :  { %v2364_v59 = vpop.xlane.xlu1 %2363 }
 0xd62   :  { %9241 = vrsqrt.f32 %v2367_v58  ;;  %v2366_v60 = vmul.f32 0.0052083335, %v2364_v59  ;;  %v8685_v58 = vld [vmem:[%s12299_s13 + $0x220] ss:$24 sps:$4 sm:$0xff]   ;;  %v8690_v59 = vld [vmem:[%s12299_s13 + $0x1f4] ss:$24 sps:$4 sm:$0xff]  }
 0xd64   :  { %v2368_v37 = vadd.f32 1e-12, %v2366_v60  ;;  %v8688_v60 = vld [vmem:[%s12299_s13 + $0x1f0] ss:$24 sps:$4 sm:$0xff]  }
 0xd66   :  { %9243 = vrsqrt.f32 %v2368_v37  ;;  %v8693_v37 = vld [vmem:[%s12299_s13 + $0x1c4] ss:$24 sps:$4 sm:$0xff]  }
 0xd6f   :  { %v9242_v32 = vpop.eup %9241 }
 0xd70   :  { %v2372_v63 = vmul.f32 %v9242_v32, %v10377_v61  ;;  %v2371_v1 = vmul.f32 %v9242_v32, %v10374_v44  ;;  %v8696_v32 = vld [vmem:[%s12299_s13 + $0x194] ss:$24 sps:$4 sm:$0xff]  }
 0xd72   :  { %v2387_v25 = vmul.f32 %v2383_v0, %v2372_v63  ;;  %v2386_v6 = vmul.f32 %v2379_v5, %v2371_v1  ;;  %v8702_v63 = vld [vmem:[%s12301_s15 + $0x174] ss:$8 sps:$4 sm:$0xff]   ;;  %v8708_v1 = vld [vmem:[%s12301_s15 + $0x164] ss:$8 sps:$4 sm:$0xff]  }
 0xd73   :  { %v9244_v9 = vpop.eup %9243 }
 0xd74   :  { %v2374_v19 = vmul.f32 %v9244_v9, %v10387_v3  ;;  %v2373_v26 = vmul.f32 %v9244_v9, %v10384_v2  ;;  %v2402_v61 = vadd.f32 %v2398_v16, %v2387_v25  ;;  %v2401_v13 = vadd.f32 %v2394_v17, %v2386_v6  ;;  %v8666_v3 = vld [vmem:[%s12299_s13 + $0x134] ss:$24 sps:$4 sm:$0xff]   ;;  %v8697_v2 = vld [vmem:[%s12301_s15 + $0x70] ss:$8 sps:$4 sm:$0xff]  }
 0xd75   :  { %v8714_v9 = vld [vmem:[%s12301_s15 + $0x154] ss:$8 sps:$4 sm:$0xff]   ;;  %v8732_v6 = vld [vmem:[%s12301_s15 + $0x124] ss:$8 sps:$4 sm:$0xff]  }
 0xd76   :  { %v2389_v20 = vmul.f32 %v2383_v0, %v2374_v19  ;;  %v2388_v27 = vmul.f32 %v2379_v5, %v2373_v26  ;;  %v8700_v0 = vld [vmem:[%s12301_s15 + $0x170] ss:$8 sps:$4 sm:$0xff]   ;;  %v8706_v5 = vld [vmem:[%s12301_s15 + $0x160] ss:$8 sps:$4 sm:$0xff]   ;;  %v8726_v25 = vld [vmem:[%s12301_s15 + $0x134] ss:$8 sps:$4 sm:$0xff]  }
 0xd77   :  { %v8718_v19 = vld [vmem:[%s12301_s15 + $0x140] ss:$8 sps:$4 sm:$0xff]   ;;  %v8724_v26 = vld [vmem:[%s12301_s15 + $0x130] ss:$8 sps:$4 sm:$0xff]  }
 0xd78   :  { %v2404_v30 = vadd.f32 %v2398_v16, %v2389_v20  ;;  %v2403_v10 = vadd.f32 %v2394_v17, %v2388_v27  ;;  %v8712_v16 = vld [vmem:[%s12301_s15 + $0x150] ss:$8 sps:$4 sm:$0xff]   ;;  %v8720_v17 = vld [vmem:[%s12301_s15 + $0x144] ss:$8 sps:$4 sm:$0xff]   ;;  %v8735_v20 = vld [vmem:[%s12301_s15 + $0x14] ss:$8 sps:$4 sm:$0xff]  }
 0xd79   :  { %v8730_v27 = vld [vmem:[%s12301_s15 + $0x120] ss:$8 sps:$4 sm:$0xff]  }
 0xd7a   :  { %v2406_v44 = vpack.c.bf16 %v2404_v30, %v2402_v61  ;;  %v10503_v18 = vpack.c.bf16 %v2403_v10, %v2401_v13  ;;  %v8733_v61 = vld [vmem:[%s12301_s15 + $0x10] ss:$8 sps:$4 sm:$0xff]   ;;  %v8738_v30 = vld [vmem:[%s12301_s15 + $0x114] ss:$8 sps:$4 sm:$0xff]   ;;  %v8741_v10 = vld [vmem:[%s12301_s15 + $0x4] ss:$8 sps:$4 sm:$0xff]  }
 0xd7b   :  { %v8736_v13 = vld [vmem:[%s12301_s15 + $0x110] ss:$8 sps:$4 sm:$0xff]  }
 0xd7c   :  { %7475 = vmatprep.mubr.msk.bf16.mxu0 %vm807_vm0, %v2406_v44  ;;  %7476 = vmatprep.mubr.msk.bf16.mxu1 %vm807_vm0, %v2406_v44 }
 0xd7d   :  { %2907 = vmatmul.mubr.bf16.vlgmr.msra.gmra.mxu0 %v10503_v18  ;;  %2950 = vmatmul.mubr.bf16.vlgmr.msra.gmra.mxu1 %v10503_v18 }
 0xd7e   :  { %2961 = vmatpush1.bf16.msra.mxu0 %v8661_v31  ;;  %7477 = vmatprep.mubr.msk.bf16.mxu0 %vm807_vm0, %v2406_v44  ;;  %v8739_v44 = vld [vmem:[%s12301_s15] ss:$8 sps:$4 sm:$0xff]   ;;  %v8744_v31 = vld [vmem:[%s12301_s15 + $0x104] ss:$8 sps:$4 sm:$0xff]  }
 0xd7f   :  { %2962 = vmatprep.subr.bf16.mxu0 %v8666_v3  ;;  %3694 = vmatpush1.bf16.msra.mxu1 %v8697_v2  ;;  %v8747_v3 = vld [vmem:[%s12301_s15 + $0xf4] ss:$8 sps:$4 sm:$0xff]   ;;  %v8745_v2 = vld [vmem:[%s12301_s15 + $0xf0] ss:$8 sps:$4 sm:$0xff]  }
 0xd80   :  { %3695 = vmatprep.subr.bf16.mxu1 %v8705_v34  ;;  %v8750_v34 = vld [vmem:[%s12301_s15 + $0x1f4] ss:$8 sps:$4 sm:$0xff]  }
 0xd82   :  { %2963 = vmatpush1.bf16.msra.mxu0 %v8664_v38  ;;  %v8748_v38 = vld [vmem:[%s12301_s15 + $0x1f0] ss:$8 sps:$4 sm:$0xff]  }
 0xd83   :  { %2964 = vmatprep.subr.bf16.mxu0 %v8669_v8  ;;  %3696 = vmatpush1.bf16.msra.mxu1 %v8703_v39  ;;  %v8753_v8 = vld [vmem:[%s12301_s15 + $0xe4] ss:$8 sps:$4 sm:$0xff]   ;;  %v8751_v39 = vld [vmem:[%s12301_s15 + $0xe0] ss:$8 sps:$4 sm:$0xff]  }
 0xd84   :  { %3697 = vmatprep.subr.bf16.mxu1 %v8711_v14  ;;  %v8756_v14 = vld [vmem:[%s12301_s15 + $0x1e4] ss:$8 sps:$4 sm:$0xff]  }
 0xd86   :  { %2965 = vmatpush1.bf16.msra.mxu0 %v8667_v7  ;;  %v8754_v7 = vld [vmem:[%s12301_s15 + $0x1e0] ss:$8 sps:$4 sm:$0xff]  }
 0xd87   :  { %2966 = vmatprep.subr.bf16.mxu0 %v8672_v11  ;;  %3698 = vmatpush1.bf16.msra.mxu1 %v8709_v41  ;;  %v8759_v11 = vld [vmem:[%s12301_s15 + $0xd4] ss:$8 sps:$4 sm:$0xff]   ;;  %v8757_v41 = vld [vmem:[%s12301_s15 + $0xd0] ss:$8 sps:$4 sm:$0xff]  }
 0xd88   :  { %3699 = vmatprep.subr.bf16.mxu1 %v8717_v15  ;;  %v8762_v15 = vld [vmem:[%s12301_s15 + $0x1d4] ss:$8 sps:$4 sm:$0xff]  }
 0xd8a   :  { %2967 = vmatpush1.bf16.msra.mxu0 %v8670_v46  ;;  %v8760_v46 = vld [vmem:[%s12301_s15 + $0x1d0] ss:$8 sps:$4 sm:$0xff]  }
 0xd8b   :  { %2968 = vmatprep.subr.bf16.mxu0 %v8675_v36  ;;  %3700 = vmatpush1.bf16.msra.mxu1 %v8715_v48  ;;  %v8765_v36 = vld [vmem:[%s12301_s15 + $0xc4] ss:$8 sps:$4 sm:$0xff]   ;;  %v8763_v48 = vld [vmem:[%s12301_s15 + $0xc0] ss:$8 sps:$4 sm:$0xff]  }
 0xd8c   :  { %3701 = vmatprep.subr.bf16.mxu1 %v8723_v43  ;;  %v8768_v43 = vld [vmem:[%s12301_s15 + $0x1c4] ss:$8 sps:$4 sm:$0xff]  }
 0xd8e   :  { %2969 = vmatpush1.bf16.msra.mxu0 %v8673_v42  ;;  %v8766_v42 = vld [vmem:[%s12301_s15 + $0x1c0] ss:$8 sps:$4 sm:$0xff]  }
 0xd8f   :  { %2970 = vmatprep.subr.bf16.mxu0 %v8678_v47  ;;  %3702 = vmatpush1.bf16.msra.mxu1 %v8721_v50  ;;  %v8771_v47 = vld [vmem:[%s12301_s15 + $0xb4] ss:$8 sps:$4 sm:$0xff]   ;;  %v8769_v50 = vld [vmem:[%s12301_s15 + $0xb0] ss:$8 sps:$4 sm:$0xff]  }
 0xd90   :  { %3703 = vmatprep.subr.bf16.mxu1 %v8729_v49  ;;  %v8774_v49 = vld [vmem:[%s12301_s15 + $0x1b4] ss:$8 sps:$4 sm:$0xff]  }
 0xd92   :  { %2971 = vmatpush1.bf16.msra.mxu0 %v8676_v51  ;;  %v8772_v51 = vld [vmem:[%s12301_s15 + $0x1b0] ss:$8 sps:$4 sm:$0xff]  }
 0xd93   :  { %2972 = vmatprep.subr.bf16.mxu0 %v8681_v52  ;;  %3704 = vmatpush1.bf16.msra.mxu1 %v8727_v53  ;;  %v8777_v52 = vld [vmem:[%s12301_s15 + $0xa4] ss:$8 sps:$4 sm:$0xff]   ;;  %v8775_v53 = vld [vmem:[%s12301_s15 + $0xa0] ss:$8 sps:$4 sm:$0xff]  }
 0xd94   :  { %3705 = vmatprep.subr.bf16.mxu1 %v8735_v20 }
 0xd96   :  { %2973 = vmatpush1.bf16.msra.mxu0 %v8679_v54  ;;  %v8780_v54 = vld [vmem:[%s12301_s15 + $0x1a4] ss:$8 sps:$4 sm:$0xff]  }
 0xd97   :  { %2974 = vmatprep.subr.bf16.mxu0 %v8684_v55  ;;  %3706 = vmatpush1.bf16.msra.mxu1 %v8733_v61  ;;  %v8778_v55 = vld [vmem:[%s12301_s15 + $0x1a0] ss:$8 sps:$4 sm:$0xff]  }
 0xd98   :  { %3707 = vmatprep.subr.bf16.mxu1 %v8741_v10 }
 0xd9a   :  { %2975 = vmatpush1.bf16.msra.mxu0 %v8682_v56  ;;  %v8783_v56 = vld [vmem:[%s12301_s15 + $0x94] ss:$8 sps:$4 sm:$0xff]  }
 0xd9b   :  { %2984 = vmatprep.subr.bf16.mxu0 %v8687_v57  ;;  %3708 = vmatpush1.bf16.msra.mxu1 %v8739_v44  ;;  %v8781_v57 = vld [vmem:[%s12301_s15 + $0x90] ss:$8 sps:$4 sm:$0xff]  }
 0xd9c   :  { %3709 = vmatprep.subr.bf16.mxu1 %v8747_v3 }
 0xd9e   :  { %2985 = vmatpush2.bf16.msra.mxu0 %v8685_v58  ;;  %v8786_v58 = vld [vmem:[%s12301_s15 + $0x194] ss:$8 sps:$4 sm:$0xff]  }
 0xd9f   :  { %2986 = vmatprep.subr.bf16.mxu0 %v8690_v59  ;;  %3710 = vmatpush2.bf16.msra.mxu1 %v8745_v2  ;;  %v8784_v59 = vld [vmem:[%s12301_s15 + $0x190] ss:$8 sps:$4 sm:$0xff]  }
 0xda0   :  { %3711 = vmatprep.subr.bf16.mxu1 %v8753_v8 }
 0xda2   :  { %2987 = vmatpush2.bf16.msra.mxu0 %v8688_v60  ;;  %v8787_v60 = vld [vmem:[%s12301_s15 + $0x80] ss:$8 sps:$4 sm:$0xff]  }
 0xda3   :  { %2988 = vmatprep.subr.bf16.mxu0 %v8693_v37  ;;  %3712 = vmatpush2.bf16.msra.mxu1 %v8751_v39  ;;  %v8789_v37 = vld [vmem:[%s12301_s15 + $0x84] ss:$8 sps:$4 sm:$0xff]  }
 0xda4   :  { %3713 = vmatprep.subr.bf16.mxu1 %v8759_v11 }
 0xda6   :  { %2989 = vmatpush2.bf16.msra.mxu0 %v8691_v45  ;;  %v8792_v45 = vld [vmem:[%s12301_s15 + $0x184] ss:$8 sps:$4 sm:$0xff]  }
 0xda7   :  { %2990 = vmatprep.subr.bf16.mxu0 %v8696_v32  ;;  %3714 = vmatpush2.bf16.msra.mxu1 %v8757_v41  ;;  %v8790_v32 = vld [vmem:[%s12301_s15 + $0x180] ss:$8 sps:$4 sm:$0xff]  }
 0xda8   :  { %3715 = vmatprep.subr.bf16.mxu1 %v8765_v36 }
 0xdaa   :  { %2991 = vmatpush2.bf16.msra.mxu0 %v8694_v62  ;;  %v8795_v62 = vld [vmem:[%s12301_s15 + $0x274] ss:$8 sps:$4 sm:$0xff]  }
 0xdab   :  { %3736 = vmatprep.subr.bf16.mxu0 %v8702_v63  ;;  %3716 = vmatpush2.bf16.msra.mxu1 %v8763_v48  ;;  %v10772_v63 = vld [vmem:[%s12300_s14] sm:$0x3f] }
 0xdac   :  { %3717 = vmatprep.subr.bf16.mxu1 %v8771_v47 }
 0xdad   :  { %2993 = vmatmul.mubr.bf16.vlgmr.msra.gmra.mxu0 %v10503_v18  ;;  %v8742_v18 = vld [vmem:[%s12301_s15 + $0x100] ss:$8 sps:$4 sm:$0xff]  }
 0xdae   :  { %3737 = vmatpush1.bf16.msra.mxu0 %v8700_v0  ;;  %v2484_v0 = vrot.slane %v10772_v63, %v9977_v24 }
 0xdaf   :  { %3738 = vmatprep.subr.bf16.mxu0 %v8708_v1  ;;  %3718 = vmatpush2.bf16.msra.mxu1 %v8769_v50  ;;  %v2492_v1 = vrot.slane %v10772_v63, %v10091_v29 }
 0xdb0   :  { %3719 = vmatprep.subr.bf16.mxu1 %v8777_v52 }
 0xdb2   :  { %3739 = vmatpush1.bf16.msra.mxu0 %v8706_v5  ;;  %v2488_v5 = vrot.slane %v10772_v63, %v9974_v23 }
 0xdb3   :  { %3740 = vmatprep.subr.bf16.mxu0 %v8714_v9  ;;  %3720 = vmatpush2.bf16.msra.mxu1 %v8775_v53  ;;  %v2496_v9 = vrot.slane %v10772_v63, %v10098_v35 }
 0xdb4   :  { %3721 = vmatprep.subr.bf16.mxu1 %v8783_v56 }
 0xdb6   :  { %3741 = vmatpush1.bf16.msra.mxu0 %v8712_v16 }
 0xdb7   :  { %3742 = vmatprep.subr.bf16.mxu0 %v8720_v17  ;;  %3722 = vmatpush2.bf16.msra.mxu1 %v8781_v57 }
 0xdb8   :  { %3723 = vmatprep.subr.bf16.mxu1 %v8789_v37 }
 0xdba   :  { %3743 = vmatpush1.bf16.msra.mxu0 %v8718_v19 }
 0xdbb   :  { %3744 = vmatprep.subr.bf16.mxu0 %v8726_v25  ;;  %3724 = vmatpush2.bf16.msra.mxu1 %v8787_v60 }
 0xdbc   :  { %3779 = vmatprep.subr.bf16.mxu1 %v8795_v62 }
 0xdbe   :  { %3745 = vmatpush1.bf16.msra.mxu0 %v8724_v26 }
 0xdbf   :  { %3746 = vmatprep.subr.bf16.mxu0 %v8732_v6 }
 0xdc2   :  { %3747 = vmatpush1.bf16.msra.mxu0 %v8730_v27 }
 0xdc3   :  { %3748 = vmatprep.subr.bf16.mxu0 %v8738_v30 }
 0xdc6   :  { %3749 = vmatpush1.bf16.msra.mxu0 %v8736_v13 }
 0xdc7   :  { %3750 = vmatprep.subr.bf16.mxu0 %v8744_v31 }
 0xdca   :  { %3751 = vmatpush1.bf16.msra.mxu0 %v8742_v18 }
 0xdcb   :  { %3752 = vmatprep.subr.bf16.mxu0 %v8750_v34 }
 0xdce   :  { %3753 = vmatpush2.bf16.msra.mxu0 %v8748_v38 }
 0xdcf   :  { %3754 = vmatprep.subr.bf16.mxu0 %v8756_v14 }
 0xdd2   :  { %3755 = vmatpush2.bf16.msra.mxu0 %v8754_v7 }
 0xdd3   :  { %3756 = vmatprep.subr.bf16.mxu0 %v8762_v15 }
 0xdd6   :  { %3757 = vmatpush2.bf16.msra.mxu0 %v8760_v46 }
 0xdd7   :  { %3758 = vmatprep.subr.bf16.mxu0 %v8768_v43 }
 0xdda   :  { %3759 = vmatpush2.bf16.msra.mxu0 %v8766_v42 }
 0xddb   :  { %3760 = vmatprep.subr.bf16.mxu0 %v8774_v49 }
 0xdde   :  { %3761 = vmatpush2.bf16.msra.mxu0 %v8772_v51 }
 0xddf   :  { %3762 = vmatprep.subr.bf16.mxu0 %v8780_v54 }
 0xde2   :  { %3763 = vmatpush2.bf16.msra.mxu0 %v8778_v55 }
 0xde3   :  { %3764 = vmatprep.subr.bf16.mxu0 %v8786_v58 }
 0xde6   :  { %3765 = vmatpush2.bf16.msra.mxu0 %v8784_v59 }
 0xde7   :  { %3766 = vmatprep.subr.bf16.mxu0 %v8792_v45 }
 0xdea   :  { %3767 = vmatpush2.bf16.msra.mxu0 %v8790_v32 }
 0xe3d   :  { %v2908_v16 = vpop.f32.mrf.mxu0  ;;  %v2951_v17 = vpop.f32.mrf.mxu1 }
 0xe3e   :  { %v10782_v19 = vadd.f32 %v2908_v16, %v2484_v0  ;;  %v10784_v25 = vadd.f32 %v2951_v17, %v2492_v1 }
 0xe3f   :  { %v2910_v26 = vpop.f32.mrf.mxu0  ;;  %v2953_v6 = vpop.f32.mrf.mxu1 }
 0xe40   :  { %v3003_v20 = vmul.f32 %v10782_v19, %v10782_v19  ;;  %v3005_v27 = vmul.f32 %v10784_v25, %v10784_v25  ;;  %v10790_v61 = vadd.f32 %v2910_v26, %v2488_v5  ;;  %v10792_v30 = vadd.f32 %v2953_v6, %v2496_v9 }
 0xe41   :  { %v2912_v13 = vpop.f32.mrf.mxu0  ;;  %v2955_v10 = vpop.f32.mrf.mxu1 }
 0xe42   :  { %v3015_v44 = vmul.f32 %v3003_v20, %v10782_v19  ;;  %v3017_v31 = vmul.f32 %v3005_v27, %v10784_v25  ;;  %v3004_v18 = vmul.f32 %v10790_v61, %v10790_v61  ;;  %v3006_v3 = vmul.f32 %v10792_v30, %v10792_v30 }
 0xe43   :  { %v10800_v2 = vadd.f32 %v2912_v13, %v2484_v0  ;;  %v10802_v34 = vadd.f32 %v2955_v10, %v2492_v1  ;;  %v2914_v38 = vpop.f32.mrf.mxu0  ;;  %v2957_v8 = vpop.f32.mrf.mxu1 }
 0xe44   :  { %v3027_v39 = vmul.f32 0.044715, %v3015_v44  ;;  %v3029_v14 = vmul.f32 0.044715, %v3017_v31  ;;  %v3016_v7 = vmul.f32 %v3004_v18, %v10790_v61  ;;  %v3018_v11 = vmul.f32 %v3006_v3, %v10792_v30 }
 0xe45   :  { %v3009_v41 = vmul.f32 %v10800_v2, %v10800_v2  ;;  %v3011_v15 = vmul.f32 %v10802_v34, %v10802_v34  ;;  %v10810_v46 = vadd.f32 %v2914_v38, %v2488_v5  ;;  %v10812_v36 = vadd.f32 %v2957_v8, %v2496_v9 }
 0xe46   :  { %v3039_v48 = vadd.f32 %v3027_v39, %v10782_v19  ;;  %v3041_v43 = vadd.f32 %v3029_v14, %v10784_v25  ;;  %v3028_v42 = vmul.f32 0.044715, %v3016_v7  ;;  %v3030_v47 = vmul.f32 0.044715, %v3018_v11 }
 0xe47   :  { %v3021_v50 = vmul.f32 %v3009_v41, %v10800_v2  ;;  %v3023_v49 = vmul.f32 %v3011_v15, %v10802_v34  ;;  %v3010_v51 = vmul.f32 %v10810_v46, %v10810_v46  ;;  %v3012_v52 = vmul.f32 %v10812_v36, %v10812_v36 }
 0xe48   :  { %v3051_v53 = vmul.f32 0.7978846, %v3039_v48  ;;  %v3053_v54 = vmul.f32 0.7978846, %v3041_v43  ;;  %v3040_v55 = vadd.f32 %v3028_v42, %v10790_v61  ;;  %v3042_v56 = vadd.f32 %v3030_v47, %v10792_v30 }
 0xe49   :  { %v3033_v57 = vmul.f32 0.044715, %v3021_v50  ;;  %v3035_v58 = vmul.f32 0.044715, %v3023_v49  ;;  %v3022_v59 = vmul.f32 %v3010_v51, %v10810_v46  ;;  %v3024_v60 = vmul.f32 %v3012_v52, %v10812_v36 }
 0xe4a   :  { %9245 = vtanh.f32 %v3051_v53  ;;  %v3052_v37 = vmul.f32 0.7978846, %v3040_v55  ;;  %v3054_v45 = vmul.f32 0.7978846, %v3042_v56 }
 0xe4b   :  { %9247 = vtanh.f32 %v3053_v54  ;;  %v3045_v32 = vadd.f32 %v3033_v57, %v10800_v2  ;;  %v3047_v62 = vadd.f32 %v3035_v58, %v10802_v34  ;;  %v3034_v0 = vmul.f32 0.044715, %v3022_v59 }
 0xe4c   :  { %9249 = vtanh.f32 %v3052_v37  ;;  %v3036_v1 = vmul.f32 0.044715, %v3024_v60 }
 0xe4d   :  { %9251 = vtanh.f32 %v3054_v45  ;;  %v3057_v5 = vmul.f32 0.7978846, %v3045_v32  ;;  %v3059_v9 = vmul.f32 0.7978846, %v3047_v62  ;;  %v3046_v16 = vadd.f32 %v3034_v0, %v10810_v46  ;;  %v8799_v62 = vld [vmem:[%s12301_s15 + $0x250] ss:$8 sps:$4 sm:$0xff]  }
 0xe4e   :  { %v3048_v17 = vadd.f32 %v3036_v1, %v10812_v36  ;;  %v8804_v0 = vld [vmem:[%s12301_s15 + $0x244] ss:$8 sps:$4 sm:$0xff]  }
 0xe4f   :  { %9253 = vtanh.f32 %v3057_v5  ;;  %v3058_v26 = vmul.f32 0.7978846, %v3046_v16  ;;  %v2500_v5 = vrot.slane %v10772_v63, %v10220_v4 }
 0xe50   :  { %9255 = vtanh.f32 %v3059_v9  ;;  %v3060_v6 = vmul.f32 0.7978846, %v3048_v17  ;;  %v8802_v17 = vld [vmem:[%s12301_s15 + $0x240] ss:$8 sps:$4 sm:$0xff]  }
 0xe51   :  { %9257 = vtanh.f32 %v3058_v26 }
 0xe52   :  { %9259 = vtanh.f32 %v3060_v6 }
 0xe57   :  { %v9246_v20 = vpop.eup %9245 }
 0xe58   :  { %v9248_v27 = vpop.eup %9247  ;;  %v3075_v18 = vadd.f32 1.0, %v9246_v20  ;;  %v8807_v20 = vld [vmem:[%s12301_s15 + $0x234] ss:$8 sps:$4 sm:$0xff]  }
 0xe59   :  { %v9250_v13 = vpop.eup %9249  ;;  %v3077_v8 = vadd.f32 1.0, %v9248_v27 }
 0xe5a   :  { %v9252_v10 = vpop.eup %9251  ;;  %v3076_v44 = vadd.f32 1.0, %v9250_v13  ;;  %v3087_v43 = vmul.f32 0.5, %v3075_v18 }
 0xe5b   :  { %v3078_v3 = vadd.f32 1.0, %v9252_v10  ;;  %v3089_v49 = vmul.f32 0.5, %v3077_v8 }
 0xe5c   :  { %v9254_v31 = vpop.eup %9253  ;;  %v3088_v48 = vmul.f32 0.5, %v3076_v44  ;;  %v3099_v57 = vmul.f32 %v3087_v43, %v10782_v19  ;;  %v2503_v19 = vsub.s32 5, %v9971_v22  ;;  %v8805_v44 = vld [vmem:[%s12301_s15 + $0x230] ss:$8 sps:$4 sm:$0xff]  }
 0xe5d   :  { %v9256_v38 = vpop.eup %9255  ;;  %v3081_v39 = vadd.f32 1.0, %v9254_v31  ;;  %v3090_v50 = vmul.f32 0.5, %v3078_v3  ;;  %v3101_v60 = vmul.f32 %v3089_v49, %v10784_v25  ;;  %v8796_v25 = vld [vmem:[%s12301_s15 + $0x260] ss:$8 sps:$4 sm:$0xff]  }
 0xe5e   :  { %v9258_v14 = vpop.eup %9257  ;;  %v3083_v7 = vadd.f32 1.0, %v9256_v38  ;;  %v3100_v55 = vmul.f32 %v3088_v48, %v10790_v61  ;;  %v8798_v61 = vld [vmem:[%s12301_s15 + $0x264] ss:$8 sps:$4 sm:$0xff]   ;;  %v8813_v48 = vld [vmem:[%s12301_s15 + $0x214] ss:$8 sps:$4 sm:$0xff]  }
 0xe5f   :  { %v9260_v11 = vpop.eup %9259  ;;  %v3093_v41 = vmul.f32 0.5, %v3081_v39  ;;  %v3082_v15 = vadd.f32 1.0, %v9258_v14  ;;  %v3102_v58 = vmul.f32 %v3090_v50, %v10792_v30  ;;  %v8801_v30 = vld [vmem:[%s12301_s15 + $0x254] ss:$8 sps:$4 sm:$0xff]   ;;  %v8810_v38 = vld [vmem:[%s12301_s15 + $0x224] ss:$8 sps:$4 sm:$0xff]  }
 0xe60   :  { %v3095_v42 = vmul.f32 0.5, %v3083_v7  ;;  %v3084_v47 = vadd.f32 1.0, %v9260_v11  ;;  %v8808_v7 = vld [vmem:[%s12301_s15 + $0x220] ss:$8 sps:$4 sm:$0xff]  }
 0xe61   :  { %v3094_v51 = vmul.f32 0.5, %v3082_v15  ;;  %v3105_v52 = vmul.f32 %v3093_v41, %v10800_v2  ;;  %v8793_v2 = vld [vmem:[%s12301_s15 + $0x270] ss:$8 sps:$4 sm:$0xff]  }
 0xe62   :  { %v3096_v53 = vmul.f32 0.5, %v3084_v47  ;;  %v3107_v54 = vmul.f32 %v3095_v42, %v10802_v34  ;;  %v8811_v47 = vld [vmem:[%s12301_s15 + $0x210] ss:$8 sps:$4 sm:$0xff]  }
 0xe63   :  { %v3106_v56 = vmul.f32 %v3094_v51, %v10810_v46  ;;  %v3111_v32 = vpack.c.bf16 %v3105_v52, %v3099_v57  ;;  %v2504_v46 = vrot.slane %v10772_v63, %v2503_v19  ;;  %v8816_v51 = vld [vmem:[%s12301_s15 + $0x204] ss:$8 sps:$4 sm:$0xff]   ;;  %v8817_v57 = vld [vmem:[%s12301_s15 + $0x2f0] ss:$8 sps:$4 sm:$0xff]  }
 0xe64   :  { %v3108_v59 = vmul.f32 %v3096_v53, %v10812_v36  ;;  %v3113_v34 = vpack.c.bf16 %v3107_v54, %v3101_v60  ;;  %v8814_v53 = vld [vmem:[%s12301_s15 + $0x200] ss:$8 sps:$4 sm:$0xff]  }
 0xe65   :  { %v3112_v37 = vpack.c.bf16 %v3106_v56, %v3100_v55  ;;  %v8819_v55 = vld [vmem:[%s12301_s15 + $0x2f4] ss:$8 sps:$4 sm:$0xff]  }
 0xe66   :  { %v3114_v45 = vpack.c.bf16 %v3108_v59, %v3102_v58  ;;  %v8822_v59 = vld [vmem:[%s12301_s15 + $0x2e4] ss:$8 sps:$4 sm:$0xff]  }
 0xe67   :  { %3725 = vmatprep.mubr.bf16.mxu1 %v3112_v37 }
 0xe68   :  { %3768 = vmatprep.mubr.bf16.mxu0 %v3114_v45  ;;  %3726 = vmatmul.mubr.bf16.vlgmr.msra.gmra.mxu1 %v3111_v32  ;;  %v8825_v45 = vld [vmem:[%s12301_s15 + $0x2d4] ss:$8 sps:$4 sm:$0xff]  }
 0xe69   :  { %3769 = vmatmul.mubr.bf16.vlgmr.msra.gmra.mxu0 %v3113_v34  ;;  %3780 = vmatpush1.bf16.msra.mxu1 %v8793_v2  ;;  %v8820_v2 = vld [vmem:[%s12301_s15 + $0x2e0] ss:$8 sps:$4 sm:$0xff]   ;;  %v8823_v34 = vld [vmem:[%s12301_s15 + $0x2d0] ss:$8 sps:$4 sm:$0xff]  }
 0xe6a   :  { %3781 = vmatprep.subr.bf16.mxu1 %v8798_v61 }
 0xe6d   :  { %3782 = vmatpush1.bf16.msra.mxu1 %v8796_v25  ;;  %v2994_v36 = vpop.f32.mrf.mxu0  ;;  %v8828_v25 = vld [vmem:[%s12301_s15 + $0x2c4] ss:$8 sps:$4 sm:$0xff]  }
 0xe6e   :  { %3783 = vmatprep.subr.bf16.mxu1 %v8801_v30  ;;  %v10874_v63 = vadd.f32 %v2994_v36, %v2500_v5 }
 0xe6f   :  { %v2996_v1 = vpop.f32.mrf.mxu0 }
 0xe70   :  { %v10862_v9 = vadd.f32 %v2996_v1, %v2504_v46  ;;  %v3007_v8 = vmul.f32 %v10874_v63, %v10874_v63 }
 0xe71   :  { %3784 = vmatpush1.bf16.msra.mxu1 %v8799_v62  ;;  %v2998_v16 = vpop.f32.mrf.mxu0  ;;  %v8826_v62 = vld [vmem:[%s12301_s15 + $0x2c0] ss:$8 sps:$4 sm:$0xff]  }
 0xe72   :  { %v3008_v26 = vmul.f32 %v10862_v9, %v10862_v9  ;;  %v10869_v6 = vadd.f32 %v2998_v16, %v2500_v5  ;;  %3785 = vmatprep.subr.bf16.mxu1 %v8804_v0  ;;  %v3019_v43 = vmul.f32 %v3007_v8, %v10874_v63  ;;  %v8831_v5 = vld [vmem:[%s12301_s15 + $0x2b4] ss:$8 sps:$4 sm:$0xff]   ;;  %v8838_v8 = vld [vmem:[%s12301_s15 + $0x280] ss:$8 sps:$4 sm:$0xff]  }
 0xe73   :  { %v3000_v27 = vpop.f32.mrf.mxu0 }
 0xe74   :  { %v3020_v13 = vmul.f32 %v3008_v26, %v10862_v9  ;;  %v3001_v10 = vadd.f32 %v3000_v27, %v2504_v46  ;;  %v3013_v18 = vmul.f32 %v10869_v6, %v10869_v6  ;;  %v3031_v52 = vmul.f32 0.044715, %v3019_v43  ;;  %v8834_v26 = vld [vmem:[%s12301_s15 + $0x2a4] ss:$8 sps:$4 sm:$0xff]  }
 0xe75   :  { %3786 = vmatpush1.bf16.msra.mxu1 %v8802_v17  ;;  %v8829_v17 = vld [vmem:[%s12301_s15 + $0x2b0] ss:$8 sps:$4 sm:$0xff]  }
 0xe76   :  { %v3032_v31 = vmul.f32 0.044715, %v3020_v13  ;;  %v3014_v3 = vmul.f32 %v3001_v10, %v3001_v10  ;;  %3787 = vmatprep.subr.bf16.mxu1 %v8807_v20  ;;  %v3025_v41 = vmul.f32 %v3013_v18, %v10869_v6  ;;  %v3043_v56 = vadd.f32 %v3031_v52, %v10874_v63 }
 0xe78   :  { %v3044_v39 = vadd.f32 %v3032_v31, %v10862_v9  ;;  %v3026_v14 = vmul.f32 %v3014_v3, %v3001_v10  ;;  %v3037_v50 = vmul.f32 0.044715, %v3025_v41  ;;  %v3055_v60 = vmul.f32 0.7978846, %v3043_v56  ;;  %v8835_v31 = vld [vmem:[%s12301_s15 + $0x290] ss:$8 sps:$4 sm:$0xff]  }
 0xe79   :  { %3788 = vmatpush1.bf16.msra.mxu1 %v8805_v44  ;;  %v8840_v3 = vld [vmem:[%s12301_s15 + $0x284] ss:$8 sps:$4 sm:$0xff]  }
 0xe7a   :  { %v3056_v11 = vmul.f32 0.7978846, %v3044_v39  ;;  %v3038_v15 = vmul.f32 0.044715, %v3026_v14  ;;  %3789 = vmatprep.subr.bf16.mxu1 %v8810_v38  ;;  %v3049_v54 = vadd.f32 %v3037_v50, %v10869_v6 }
 0xe7c   :  { %9261 = vtanh.f32 %v3056_v11  ;;  %v3050_v42 = vadd.f32 %v3038_v15, %v3001_v10  ;;  %v3061_v58 = vmul.f32 0.7978846, %v3049_v54 }
 0xe7d   :  { %3790 = vmatpush1.bf16.msra.mxu1 %v8808_v7 }
 0xe7e   :  { %v3062_v49 = vmul.f32 0.7978846, %v3050_v42  ;;  %3791 = vmatprep.subr.bf16.mxu1 %v8813_v48 }
 0xe80   :  { %9263 = vtanh.f32 %v3062_v49 }
 0xe81   :  { %3792 = vmatpush1.bf16.msra.mxu1 %v8811_v47  ;;  %9265 = vtanh.f32 %v3061_v58 }
 0xe82   :  { %3793 = vmatprep.subr.bf16.mxu1 %v8816_v51  ;;  %9267 = vtanh.f32 %v3055_v60 }
 0xe85   :  { %3794 = vmatpush1.bf16.msra.mxu1 %v8814_v53 }
 0xe86   :  { %3795 = vmatprep.subr.bf16.mxu1 %v8819_v55 }
 0xe89   :  { %v9262_v37 = vpop.eup %9261  ;;  %3796 = vmatpush2.bf16.msra.mxu1 %v8817_v57 }
 0xe8a   :  { %3797 = vmatprep.subr.bf16.mxu1 %v8822_v59  ;;  %v3080_v32 = vadd.f32 1.0, %v9262_v37 }
 0xe8c   :  { %v3092_v46 = vmul.f32 0.5, %v3080_v32 }
 0xe8d   :  { %v9264_v61 = vpop.eup %9263  ;;  %3798 = vmatpush2.bf16.msra.mxu1 %v8820_v2 }
 0xe8e   :  { %3799 = vmatprep.subr.bf16.mxu1 %v8825_v45  ;;  %v3086_v30 = vadd.f32 1.0, %v9264_v61  ;;  %v3104_v0 = vmul.f32 %v3092_v46, %v10862_v9  ;;  %v9266_v20 = vpop.eup %9265  ;;  %v8832_v9 = vld [vmem:[%s12301_s15 + $0x2a0] ss:$8 sps:$4 sm:$0xff]  }
 0xe8f   :  { %v9268_v27 = vpop.eup %9267  ;;  %v3085_v13 = vadd.f32 1.0, %v9266_v20  ;;  %v8847_v20 = vld [vmem:[%s12330_s3 + $0x2d0] ss:$20 sps:$4 sm:$0xff]  }
 0xe90   :  { %v3098_v36 = vmul.f32 0.5, %v3086_v30  ;;  %v3079_v44 = vadd.f32 1.0, %v9268_v27  ;;  %v8850_v27 = vld [vmem:[%s12330_s3 + $0x2d8] ss:$20 sps:$4 sm:$0xff]  }
 0xe91   :  { %3800 = vmatpush2.bf16.msra.mxu1 %v8823_v34  ;;  %v3097_v18 = vmul.f32 0.5, %v3085_v13  ;;  %v8858_v13 = vld [vmem:[%s12330_s3 + $0x2b4] ss:$20 sps:$4 sm:$0xff]  }
 0xe92   :  { %3801 = vmatprep.subr.bf16.mxu1 %v8828_v25  ;;  %v3110_v1 = vmul.f32 %v3098_v36, %v3001_v10  ;;  %v8837_v10 = vld [vmem:[%s12301_s15 + $0x294] ss:$8 sps:$4 sm:$0xff]   ;;  %v3091_v38 = vmul.f32 0.5, %v3079_v44  ;;  %v8856_v44 = vld [vmem:[%s12330_s3 + $0x2b0] ss:$20 sps:$4 sm:$0xff]  }
 0xe93   :  { %v3109_v39 = vmul.f32 %v3097_v18, %v10869_v6  ;;  %v3826_v6 = vld [vmem:[%s12302_s16] sm:$0x3] }
 0xe94   :  { %v3116_v16 = vpack.c.bf16 %v3110_v1, %v3104_v0  ;;  %v3103_v14 = vmul.f32 %v3091_v38, %v10874_v63  ;;  %v3835_v56 = vrot.slane %v3826_v6, %v9974_v23  ;;  %v3831_v58 = vrot.slane %v3826_v6, %v9977_v24  ;;  %v8843_v1 = vld [vmem:[%s12330_s3 + $0x2fc] ss:$20 sps:$4 sm:$0xff]   ;;  %v8864_v18 = vld [vmem:[%s12330_s3 + $0x28c] ss:$20 sps:$4 sm:$0xff]  }
 0xe95   :  { %3802 = vmatpush2.bf16.msra.mxu1 %v8826_v62  ;;  %4332 = vmatprep.subr.bf16.mxu0 %v8843_v1  ;;  %v8862_v38 = vld [vmem:[%s12330_s3 + $0x288] ss:$20 sps:$4 sm:$0xff]  }
 0xe96   :  { %3811 = vmatprep.mubr.bf16.mxu1 %v3116_v16  ;;  %3803 = vmatprep.subr.bf16.mxu1 %v8831_v5  ;;  %v3115_v7 = vpack.c.bf16 %v3109_v39, %v3103_v14  ;;  %v8844_v5 = vld [vmem:[%s12330_s3 + $0x300] ss:$20 sps:$4 sm:$0xff]   ;;  %v8846_v16 = vld [vmem:[%s12330_s3 + $0x304] ss:$20 sps:$4 sm:$0xff]  }
 0xe97   :  { %v8870_v39 = vld [vmem:[%s12330_s3 + $0x264] ss:$20 sps:$4 sm:$0xff]   ;;  %v8897_v1 = vld [vmem:[%s12330_s3 + $0x374] ss:$20 sps:$4 sm:$0xff]  }
 0xe98   :  { %v8865_v14 = vld [vmem:[%s12330_s3 + $0x258] ss:$20 sps:$4 sm:$0xff]  }
 0xe99   :  { %3804 = vmatpush2.bf16.msra.mxu1 %v8829_v17  ;;  %v8849_v17 = vld [vmem:[%s12330_s3 + $0x2d4] ss:$20 sps:$4 sm:$0xff]  }
 0xe9a   :  { %3805 = vmatprep.subr.bf16.mxu1 %v8834_v26  ;;  %v8852_v26 = vld [vmem:[%s12330_s3 + $0x2dc] ss:$20 sps:$4 sm:$0xff]  }
 0xe9d   :  { %3806 = vmatpush2.bf16.msra.mxu1 %v8832_v9  ;;  %v8855_v9 = vld [vmem:[%s12330_s3 + $0x2ac] ss:$20 sps:$4 sm:$0xff]  }
 0xe9e   :  { %3807 = vmatprep.subr.bf16.mxu1 %v8837_v10  ;;  %v8853_v10 = vld [vmem:[%s12330_s3 + $0x2a8] ss:$20 sps:$4 sm:$0xff]  }
 0xea1   :  { %3808 = vmatpush2.bf16.msra.mxu1 %v8835_v31  ;;  %v8861_v31 = vld [vmem:[%s12330_s3 + $0x284] ss:$20 sps:$4 sm:$0xff]  }
 0xea2   :  { %3809 = vmatprep.subr.bf16.mxu1 %v8840_v3  ;;  %v8859_v3 = vld [vmem:[%s12330_s3 + $0x280] ss:$20 sps:$4 sm:$0xff]  }
 0xea5   :  { %3810 = vmatpush2.bf16.msra.mxu1 %v8838_v8  ;;  %v8867_v8 = vld [vmem:[%s12330_s3 + $0x25c] ss:$20 sps:$4 sm:$0xff]  }
 0xea6   :  { %4375 = vmatprep.subr.bf16.mxu1 %v8846_v16  ;;  %v8895_v16 = vld [vmem:[%s12330_s3 + $0x370] ss:$20 sps:$4 sm:$0xff]  }
 0xea8   :  { %3812 = vmatmul.mubr.bf16.vlgmr.msra.gmra.mxu1 %v3115_v7  ;;  %v8868_v7 = vld [vmem:[%s12330_s3 + $0x260] ss:$20 sps:$4 sm:$0xff]  }
 0xea9   :  { %4376 = vmatpush1.bf16.msra.mxu1 %v8844_v5  ;;  %v8900_v5 = vld [vmem:[%s12330_s3 + $0x37c] ss:$20 sps:$4 sm:$0xff]  }
 0xeaa   :  { %4377 = vmatprep.subr.bf16.mxu1 %v8852_v26  ;;  %v8903_v26 = vld [vmem:[%s12330_s3 + $0x34c] ss:$20 sps:$4 sm:$0xff]  }
 0xead   :  { %4378 = vmatpush1.bf16.msra.mxu1 %v8850_v27  ;;  %v8901_v27 = vld [vmem:[%s12330_s3 + $0x348] ss:$20 sps:$4 sm:$0xff]  }
 0xeae   :  { %4379 = vmatprep.subr.bf16.mxu1 %v8858_v13  ;;  %v8909_v13 = vld [vmem:[%s12330_s3 + $0x324] ss:$20 sps:$4 sm:$0xff]  }
 0xeb1   :  { %4380 = vmatpush1.bf16.msra.mxu1 %v8856_v44  ;;  %v8907_v44 = vld [vmem:[%s12330_s3 + $0x320] ss:$20 sps:$4 sm:$0xff]  }
 0xeb2   :  { %4381 = vmatprep.subr.bf16.mxu1 %v8864_v18 }
 0xeb5   :  { %4382 = vmatpush1.bf16.msra.mxu1 %v8862_v38 }
 0xeb6   :  { %4383 = vmatprep.subr.bf16.mxu1 %v8870_v39 }
 0xeb9   :  { %4384 = vmatpush1.bf16.msra.mxu1 %v8868_v7  ;;  %v7574_v7 = vld [vmem:[%s12331_s5 + $0x2] sm:$0x3] }
 0xf28   :  { %v3727_v11 = vpop.f32.mrf.mxu1 }
 0xf29   :  { %v3770_v41 = vpop.f32.mrf.mxu0 }
 0xf2a   :  { %v3729_v15 = vpop.f32.mrf.mxu1  ;;  %v3771_v50 = vadd.f32 %v3770_v41, %v3727_v11 }
 0xf2b   :  { %v3772_v48 = vpop.f32.mrf.mxu0 }
 0xf2c   :  { %v3731_v43 = vpop.f32.mrf.mxu1  ;;  %v3773_v51 = vadd.f32 %v3772_v48, %v3729_v15 }
 0xf2d   :  { %v3774_v42 = vpop.f32.mrf.mxu0 }
 0xf2e   :  { %v3733_v47 = vpop.f32.mrf.mxu1  ;;  %v3775_v54 = vadd.f32 %v3774_v42, %v3731_v43 }
 0xf2f   :  { %v3776_v53 = vpop.f32.mrf.mxu0 }
 0xf30   :  { %v3777_v60 = vadd.f32 %v3776_v53, %v3733_v47 }
 0xf68   :  { %v3813_v49 = vpop.f32.mrf.mxu1 }
 0xf69   :  { %v3814_v52 = vadd.f32 %v3813_v49, %v3771_v50 }
 0xf6a   :  { %v3815_v63 = vpop.f32.mrf.mxu1 }
 0xf6b   :  { %v3816_v55 = vadd.f32 %v3815_v63, %v3773_v51  ;;  %v3822_v57 = vadd.f32 %v3814_v52, %v10299_v12 }
 0xf6c   :  { %v3817_v59 = vpop.f32.mrf.mxu1 }
 0xf6d   :  { %v3823_v37 = vadd.f32 %v3816_v55, %v10296_v33  ;;  %v3818_v2 = vadd.f32 %v3817_v59, %v3775_v54  ;;  %v10968_v25 = vadd.f32 %v3831_v58, %v3822_v57  ;;  %v8873_v57 = vld [vmem:[%s12330_s3 + $0x234] ss:$20 sps:$4 sm:$0xff]   ;;  %v8876_v59 = vld [vmem:[%s12330_s3 + $0x23c] ss:$20 sps:$4 sm:$0xff]  }
 0xf6e   :  { %v3819_v45 = vpop.f32.mrf.mxu1  ;;  %4385 = vmatprep.subr.bf16.mxu1 %v8876_v59 }
 0xf6f   :  { %v10965_v32 = vadd.f32 %v3835_v56, %v3823_v37  ;;  %v3824_v61 = vadd.f32 %v3818_v2, %v10301_v28  ;;  %v3820_v34 = vadd.f32 %v3819_v45, %v3777_v60  ;;  %v8874_v60 = vld [vmem:[%s12330_s3 + $0x238] ss:$20 sps:$4 sm:$0xff]   ;;  %v8877_v2 = vld [vmem:[%s12330_s3 + $0x208] ss:$20 sps:$4 sm:$0xff]  }
 0xf70   :  { %4386 = vmatpush1.bf16.msra.mxu1 %v8874_v60  ;;  %v8879_v37 = vld [vmem:[%s12330_s3 + $0x20c] ss:$20 sps:$4 sm:$0xff]   ;;  %v8882_v45 = vld [vmem:[%s12330_s3 + $0x214] ss:$20 sps:$4 sm:$0xff]  }
 0xf71   :  { %v10970_v30 = vadd.f32 %v3831_v58, %v3824_v61  ;;  %v3825_v46 = vadd.f32 %v3820_v34, %v10307_v40  ;;  %v3846_v12 = vsel %vm807_vm0, %v10965_v32, 0.0  ;;  %v8841_v40 = vld [vmem:[%s12330_s3 + $0x2f8] ss:$20 sps:$4 sm:$0xff]   ;;  %v8871_v58 = vld [vmem:[%s12330_s3 + $0x230] ss:$20 sps:$4 sm:$0xff]   ;;  %4387 = vmatprep.subr.bf16.mxu1 %v8882_v45 }
 0xf72   :  { %v3847_v36 = vadd.f32 %v3846_v12, %v10968_v25  ;;  %4333 = vmatpush1.bf16.msra.mxu0 %v8841_v40  ;;  %v8880_v61 = vld [vmem:[%s12330_s3 + $0x210] ss:$20 sps:$4 sm:$0xff]   ;;  %v8883_v34 = vld [vmem:[%s12330_s3 + $0x1e0] ss:$20 sps:$4 sm:$0xff]   ;;  %v8886_v12 = vld [vmem:[%s12330_s3 + $0x1e8] ss:$20 sps:$4 sm:$0xff]  }
 0xf73   :  { %v10976_v62 = vadd.f32 %v3835_v56, %v3825_v46  ;;  %v3850_v33 = vsel %vm812_vm1, %v10970_v30, 0.0  ;;  %4334 = vmatprep.subr.bf16.mxu0 %v8849_v17  ;;  %v8885_v46 = vld [vmem:[%s12330_s3 + $0x1e4] ss:$20 sps:$4 sm:$0xff]   ;;  %v8892_v40 = vld [vmem:[%s12330_s3 + $0x3a0] ss:$20 sps:$4 sm:$0xff]  }
 0xf74   :  { %3848 = vadd.xlane.f32.xlu0 %v3847_v36  ;;  %4388 = vmatpush1.bf16.msra.mxu1 %v8880_v61  ;;  %v8888_v36 = vld [vmem:[%s12330_s3 + $0x1ec] ss:$20 sps:$4 sm:$0xff]   ;;  %v8913_v45 = vld [vmem:[%s12330_s3 + $0x308] ss:$20 sps:$4 sm:$0xff]   ;;  %v8916_v61 = vld [vmem:[%s12330_s3 + $0x290] ss:$20 sps:$4 sm:$0xff]  }
 0xf75   :  { %v3851_v28 = vsel %vm814_vm2, %v10976_v62, 0.0  ;;  %4389 = vmatprep.subr.bf16.mxu1 %v8888_v36  ;;  %v8898_v17 = vld [vmem:[%s12330_s3 + $0x378] ss:$20 sps:$4 sm:$0xff]   ;;  %v8920_v36 = vld [vmem:[%s12330_s3 + $0x1f0] ss:$20 sps:$4 sm:$0xff]  }
 0xf76   :  { %v3852_v0 = vadd.f32 %v3851_v28, %v3850_v33  ;;  %4335 = vmatpush1.bf16.msra.mxu0 %v8847_v20  ;;  %v8891_v33 = vld [vmem:[%s12330_s3 + $0x39c] ss:$20 sps:$4 sm:$0xff]   ;;  %v8894_v28 = vld [vmem:[%s12330_s3 + $0x3a4] ss:$20 sps:$4 sm:$0xff]   ;;  %v8906_v20 = vld [vmem:[%s12330_s3 + $0x354] ss:$20 sps:$4 sm:$0xff]  }
 0xf77   :  { %4336 = vmatprep.subr.bf16.mxu0 %v8855_v9  ;;  %v8904_v9 = vld [vmem:[%s12330_s3 + $0x350] ss:$20 sps:$4 sm:$0xff]  }
 0xf78   :  { %3853 = vadd.xlane.f32.xlu1 %v3852_v0  ;;  %v8889_v0 = vld [vmem:[%s12330_s3 + $0x398] ss:$20 sps:$4 sm:$0xff]   ;;  %4390 = vmatpush1.bf16.msra.mxu1 %v8886_v12 }
 0xf79   :  { %4399 = vmatprep.subr.bf16.mxu1 %v8894_v28  ;;  %v8919_v12 = vld [vmem:[%s12330_s3 + $0x218] ss:$20 sps:$4 sm:$0xff]   ;;  %v8922_v28 = vld [vmem:[%s12330_s3 + $0x380] ss:$20 sps:$4 sm:$0xff]  }
 0xf7a   :  { %4337 = vmatpush1.bf16.msra.mxu0 %v8853_v10  ;;  %v8912_v10 = vld [vmem:[%s12330_s3 + $0x32c] ss:$20 sps:$4 sm:$0xff]  }
 0xf7b   :  { %4338 = vmatprep.subr.bf16.mxu0 %v8861_v31  ;;  %v8910_v31 = vld [vmem:[%s12330_s3 + $0x328] ss:$20 sps:$4 sm:$0xff]  }
 0xf7c   :  { %4400 = vmatpush2.bf16.msra.mxu1 %v8892_v40  ;;  %v8924_v40 = vld [vmem:[%s12330_s3 + $0x330] ss:$20 sps:$4 sm:$0xff]  }
 0xf7d   :  { %4401 = vmatprep.subr.bf16.mxu1 %v8900_v5 }
 0xf7e   :  { %4339 = vmatpush1.bf16.msra.mxu0 %v8859_v3 }
 0xf7f   :  { %4340 = vmatprep.subr.bf16.mxu0 %v8867_v8 }
 0xf80   :  { %4402 = vmatpush2.bf16.msra.mxu1 %v8898_v17 }
 0xf81   :  { %4403 = vmatprep.subr.bf16.mxu1 %v8906_v20 }
 0xf82   :  { %4341 = vmatpush1.bf16.msra.mxu0 %v8865_v14 }
 0xf83   :  { %4342 = vmatprep.subr.bf16.mxu0 %v8873_v57 }
 0xf84   :  { %4404 = vmatpush2.bf16.msra.mxu1 %v8904_v9 }
 0xf85   :  { %4405 = vmatprep.subr.bf16.mxu1 %v8912_v10 }
 0xf86   :  { %4343 = vmatpush1.bf16.msra.mxu0 %v8871_v58 }
 0xf87   :  { %4344 = vmatprep.subr.bf16.mxu0 %v8879_v37 }
 0xf88   :  { %4406 = vmatpush2.bf16.msra.mxu1 %v8910_v31 }
 0xf8a   :  { %4345 = vmatpush1.bf16.msra.mxu0 %v8877_v2 }
 0xf8b   :  { %4346 = vmatprep.subr.bf16.mxu0 %v8885_v46  ;;  %v8918_v46 = vld [vmem:[%s12330_s3 + $0x240] ss:$20 sps:$4 sm:$0xff]  }
 0xf8e   :  { %4347 = vmatpush1.bf16.msra.mxu0 %v8883_v34  ;;  %v8917_v34 = vld [vmem:[%s12330_s3 + $0x268] ss:$20 sps:$4 sm:$0xff]  }
 0xf8f   :  { %4356 = vmatprep.subr.bf16.mxu0 %v8891_v33  ;;  %v8921_v33 = vld [vmem:[%s12330_s3 + $0x3a8] ss:$20 sps:$4 sm:$0xff]  }
 0xf92   :  { %4357 = vmatpush2.bf16.msra.mxu0 %v8889_v0  ;;  %v8923_v0 = vld [vmem:[%s12330_s3 + $0x358] ss:$20 sps:$4 sm:$0xff]  }
 0xf93   :  { %4358 = vmatprep.subr.bf16.mxu0 %v8897_v1  ;;  %v11218_v1 = vld [vmem:[%s12294_s8 + $0x5] sm:$0x1f]  ;;  %s12334_s8 = smov 64  }
 0xf94   :  { %v3995_v5 = vrot.slane %v11218_v1, %v9977_v24  ;;  %v3999_v17 = vrot.slane %v11218_v1, %v9974_v23 }
 0xf96   :  { %4359 = vmatpush2.bf16.msra.mxu0 %v8895_v16  ;;  %v4003_v16 = vrot.slane %v11218_v1, %v10091_v29 }
 0xf97   :  { %4360 = vmatprep.subr.bf16.mxu0 %v8903_v26 }
 0xf9a   :  { %4361 = vmatpush2.bf16.msra.mxu0 %v8901_v27 }
 0xf9b   :  { %4362 = vmatprep.subr.bf16.mxu0 %v8909_v13 }
 0xf9e   :  { %4363 = vmatpush2.bf16.msra.mxu0 %v8907_v44 }
 0xf9f   :  { %4418 = vmatprep.subr.bf16.mxu0 %v9349_v21 }
 0xffd   :  { %v3849_v11 = vpop.xlane.xlu0 %3848 }
 0xffe   :  { %v3855_v41 = vmul.f32 0.0052083335, %v3849_v11 }
0x1000   :  { %v11043_v15 = vsub.f32 %v10968_v25, %v3855_v41  ;;  %v11046_v48 = vsub.f32 %v10965_v32, %v3855_v41  ;;  %v7575_v41 = vld [vmem:[%s12332_s26 + $0x2] sm:$0x3] }
0x1001   :  { %v3854_v43 = vpop.xlane.xlu1 %3853 }
0x1002   :  { %v3856_v42 = vmul.f32 0.0052083335, %v3854_v43  ;;  %v3861_v47 = vmul.f32 %v11043_v15, %v11043_v15  ;;  %v3862_v50 = vmul.f32 %v11046_v48, %v11046_v48 }
0x1004   :  { %v11053_v49 = vsub.f32 %v10970_v30, %v3856_v42  ;;  %v11056_v51 = vsub.f32 %v10976_v62, %v3856_v42  ;;  %v3865_v52 = vsel %vm807_vm0, %v3862_v50, 0.0  ;;  %v3892_v42 = vrot.slane %v7574_v7, %v9974_v23 }
0x1005   :  { %v3866_v6 = vadd.f32 %v3865_v52, %v3861_v47  ;;  %v3888_v50 = vrot.slane %v7574_v7, %v9977_v24 }
0x1006   :  { %v3863_v53 = vmul.f32 %v11053_v49, %v11053_v49  ;;  %v3864_v63 = vmul.f32 %v11056_v51, %v11056_v51 }
0x1007   :  { %3867 = vadd.xlane.f32.xlu0 %v3866_v6  ;;  %v3907_v6 = vrot.slane %v7575_v41, %v9974_v23 }
0x1008   :  { %v3869_v54 = vsel %vm812_vm1, %v3863_v53, 0.0  ;;  %v3870_v55 = vsel %vm814_vm2, %v3864_v63, 0.0  ;;  %v3903_v53 = vrot.slane %v7575_v41, %v9977_v24 }
0x1009   :  { %v3871_v56 = vadd.f32 %v3870_v55, %v3869_v54 }
0x100b   :  { %3872 = vadd.xlane.f32.xlu1 %v3871_v56 }
0x1090   :  { %v3868_v18 = vpop.xlane.xlu0 %3867 }
0x1091   :  { %v3874_v3 = vmul.f32 0.0052083335, %v3868_v18 }
0x1093   :  { %v3876_v38 = vadd.f32 1e-12, %v3874_v3 }
0x1094   :  { %v3873_v8 = vpop.xlane.xlu1 %3872 }
0x1095   :  { %9269 = vrsqrt.f32 %v3876_v38  ;;  %v3875_v39 = vmul.f32 0.0052083335, %v3873_v8 }
0x1097   :  { %v3877_v14 = vadd.f32 1e-12, %v3875_v39 }
0x1099   :  { %9271 = vrsqrt.f32 %v3877_v14 }
0x10a2   :  { %v9270_v11 = vpop.eup %9269 }
0x10a3   :  { %v3881_v43 = vmul.f32 %v9270_v11, %v11046_v48  ;;  %v3880_v47 = vmul.f32 %v9270_v11, %v11043_v15 }
0x10a5   :  { %v3896_v54 = vmul.f32 %v3892_v42, %v3881_v43  ;;  %v3895_v56 = vmul.f32 %v3888_v50, %v3880_v47  ;;  %v4007_v47 = vrot.slane %v11218_v1, %v10098_v35 }
0x10a6   :  { %v9272_v52 = vpop.eup %9271 }
0x10a7   :  { %v3883_v63 = vmul.f32 %v9272_v52, %v11056_v51  ;;  %v3882_v55 = vmul.f32 %v9272_v52, %v11053_v49  ;;  %v3911_v48 = vadd.f32 %v3907_v6, %v3896_v54  ;;  %v3910_v60 = vadd.f32 %v3903_v53, %v3895_v56  ;;  %v8914_v49 = vld [vmem:[%s12330_s3 + $0x2e0] ss:$20 sps:$4 sm:$0xff]   ;;  %v8915_v51 = vld [vmem:[%s12330_s3 + $0x2b8] ss:$20 sps:$4 sm:$0xff]   ;;  %v11265_v56 = vld [vmem:[%s12333_s27 + $0x8] sm:$0x3] }
0x10a9   :  { %v3898_v57 = vmul.f32 %v3892_v42, %v3883_v63  ;;  %v3897_v58 = vmul.f32 %v3888_v50, %v3882_v55 }
0x10ab   :  { %v3913_v59 = vadd.f32 %v3907_v6, %v3898_v57  ;;  %v3912_v37 = vadd.f32 %v3903_v53, %v3897_v58 }
0x10ad   :  { %v3915_v15 = vpack.c.bf16 %v3913_v59, %v3911_v48  ;;  %v3914_v2 = vpack.c.bf16 %v3912_v37, %v3910_v60  ;;  %v11272_v48 = vld [vmem:[%s12333_s27] sm:$0xff] }
0x10af   :  { %7709 = vmatprep.mubr.msk.bf16.mxu0 %vm807_vm0, %v3915_v15  ;;  %7710 = vmatprep.mubr.msk.bf16.mxu1 %vm807_vm0, %v3915_v15 }
0x10b0   :  { %4365 = vmatmul.mubr.bf16.vlgmr.msra.gmra.mxu0 %v3914_v2  ;;  %4408 = vmatmul.mubr.bf16.vlgmr.msra.gmra.mxu1 %v3914_v2 }
0x10b1   :  { %4419 = vmatpush1.bf16.msra.mxu0 %v8913_v45  ;;  %7711 = vmatprep.mubr.msk.bf16.mxu0 %vm807_vm0, %v3915_v15 }
0x10b2   :  { %4420 = vmatprep.subr.bf16.mxu0 %v9349_v21 }
0x10b5   :  { %4421 = vmatpush1.bf16.msra.mxu0 %v8914_v49 }
0x10b6   :  { %4422 = vmatprep.subr.bf16.mxu0 %v9349_v21 }
0x10b9   :  { %4423 = vmatpush1.bf16.msra.mxu0 %v8915_v51 }
0x10ba   :  { %4424 = vmatprep.subr.bf16.mxu0 %v9349_v21 }
0x10bd   :  { %4425 = vmatpush1.bf16.msra.mxu0 %v8916_v61 }
0x10be   :  { %4426 = vmatprep.subr.bf16.mxu0 %v9349_v21 }
0x10c1   :  { %4427 = vmatpush1.bf16.msra.mxu0 %v8917_v34 }
0x10c2   :  { %4428 = vmatprep.subr.bf16.mxu0 %v9349_v21 }
0x10c5   :  { %4429 = vmatpush1.bf16.msra.mxu0 %v8918_v46 }
0x10c6   :  { %4430 = vmatprep.subr.bf16.mxu0 %v9349_v21 }
0x10c9   :  { %4431 = vmatpush1.bf16.msra.mxu0 %v8919_v12 }
0x10ca   :  { %4432 = vmatprep.subr.bf16.mxu0 %v9349_v21 }
0x10cd   :  { %4433 = vmatpush1.bf16.msra.mxu0 %v8920_v36 }
0x10ce   :  { %4442 = vmatprep.subr.bf16.mxu0 %v9349_v21 }
0x10d1   :  { %4443 = vmatpush2.bf16.msra.mxu0 %v8921_v33 }
0x10d2   :  { %4444 = vmatprep.subr.bf16.mxu0 %v9349_v21 }
0x10d5   :  { %4445 = vmatpush2.bf16.msra.mxu0 %v8922_v28 }
0x10d6   :  { %4446 = vmatprep.subr.bf16.mxu0 %v9349_v21 }
0x10d9   :  { %4447 = vmatpush2.bf16.msra.mxu0 %v8923_v0 }
0x10da   :  { %4448 = vmatprep.subr.bf16.mxu0 %v9349_v21 }
0x10dd   :  { %4449 = vmatpush2.bf16.msra.mxu0 %v8924_v40 }
0x10e0   :  { %4451 = vmatmul.mubr.bf16.vlgmr.msra.gmra.mxu0 %v3914_v2 }
0x10e1   :  { %4966 = vmatprep.mubr.bf16.mxu0 %v9349_v21 }
0x1170   :  { %v4366_v26 = vpop.f32.mrf.mxu0  ;;  %v4409_v20 = vpop.f32.mrf.mxu1 }
0x1171   :  { %v4367_v27 = vadd.f32 %v4366_v26, %v3995_v5  ;;  %v11226_v9 = vadd.f32 %v4409_v20, %v4003_v16 }
0x1172   :  { %v4368_v13 = vpop.f32.mrf.mxu0  ;;  %v4411_v7 = vpop.f32.mrf.mxu1 }
0x1173   :  { %v11228_v10 = vadd.f32 %v4368_v13, %v3999_v17  ;;  %8247 = vmatprep.mubr.msk.f32.mxu1 %vm807_vm0, %v4367_v27  ;;  %v11251_v52 = vadd.f32 %v4411_v7, %v4007_v47 }
0x1174   :  { %v4370_v44 = vpop.f32.mrf.mxu0  ;;  %v4413_v11 = vpop.f32.mrf.mxu1 }
0x1175   :  { %v4371_v31 = vadd.f32 %v4370_v44, %v3995_v5  ;;  %4486 = vrot.lane.b32.xlu1 %v11228_v10, %s12334_s8  ;;  %v11256_v6 = vadd.f32 %v4413_v11, %v4003_v16 }
0x1176   :  { %v4372_v18 = vpop.f32.mrf.mxu0  ;;  %v4415_v43 = vpop.f32.mrf.mxu1 }
0x1177   :  { %v11233_v3 = vadd.f32 %v4372_v18, %v3999_v17  ;;  %v11246_v50 = vadd.f32 %v4415_v43, %v4007_v47  ;;  %v8927_v43 = vld [vmem:[%s12295_s9 + $0x134] ss:$8 sps:$4 sm:$0xff]   ;;  %v8928_v47 = vld [vmem:[%s12295_s9 + $0x120] ss:$8 sps:$4 sm:$0xff]  }
0x1178   :  { %4942 = vmatprep.subr.bf16.mxu0 %v8927_v43 }
0x1179   :  { %4488 = vrot.lane.b32.xlu0 %v11233_v3, %s12334_s8 }
0x11a0   :  { %v11237_v38 = vpop.f32.mrf.mxu0 }
0x11a2   :  { %v4454_v8 = vpop.f32.mrf.mxu0 }
0x11a4   :  { %v11239_v39 = vpop.f32.mrf.mxu0 }
0x11a6   :  { %v4457_v14 = vpop.f32.mrf.mxu0 }
0x11e7   :  { %v4487_v42 = vpop.permute.xlu1 %4486 }
0x11eb   :  { %v4489_v41 = vpop.permute.xlu0 %4488 }
0x11ec   :  { %8243 = vmatprep.subr.msk.mxu1 %vm807_vm0, %v4489_v41 }
0x11ed   :  { %8244 = vmatpush3.xpose.msk.msra.mxu1 %vm807_vm0, %v4489_v41  ;;  %v8925_v41 = vld [vmem:[%s12295_s9 + $0x130] ss:$8 sps:$4 sm:$0xff]  }
0x11ee   :  { %8245 = vmatprep.subr.msk.mxu1 %vm807_vm0, %v4487_v42  ;;  %4943 = vmatpush1.bf16.msra.mxu0 %v8925_v41 }
0x11f1   :  { %8246 = vmatpush3.xpose.msk.msra.mxu1 %vm807_vm0, %v4487_v42  ;;  %v8930_v42 = vld [vmem:[%s12295_s9 + $0x124] ss:$8 sps:$4 sm:$0xff]  }
0x11f2   :  { %8250 = vmatprep.subr.msk.mxu1 %vm812_vm1, %v11246_v50  ;;  %4944 = vmatprep.subr.bf16.mxu0 %v8930_v42 }
0x11f3   :  { %4945 = vmatpush1.bf16.msra.mxu0 %v8928_v47 }
0x11f4   :  { %8248 = vmatmul.mubr.msk.f32.vlgmr.msra.gmra.mxu1 %vm807_vm0, %v4371_v31 }
0x11f5   :  { %8251 = vmatpush3.msk.msra.mxu1 %vm812_vm1, %v11246_v50 }
0x11f6   :  { %8252 = vmatprep.subr.mxu1 %v11251_v52 }
0x11f7   :  { %8253 = vmatpush3.msra.mxu1 %v11251_v52 }
0x11f8   :  { %8257 = vmatprep.subr.msk.mxu1 %vm807_vm0, %v11256_v6 }
0x12b4   :  { %v8249_v53 = vpop.f32.mrf.mxu1 }
0x12b5   :  { %v4576_v63 = vmul.f32 0.125, %v8249_v53 }
0x12b6   :  { %v4566_v54 = vpop.f32.mrf.mxu1 }
0x12b7   :  { %v4575_v55 = vmul.f32 0.125, %v4566_v54  ;;  %v4578_v57 = vadd.f32 %v11265_v56, %v4576_v63 }
0x12b9   :  { %v4582_v58 = vsel %vm1545_vm3, %v4578_v57, -inf  ;;  %v4577_v59 = vadd.f32 %v11272_v48, %v4575_v55 }
0x12ba   :  { %4583 = vmax.xlane.f32.xlu0 %v4582_v58 }
0x12bb   :  { %v4579_v60 = vsel %vm1541_vm4, %v4577_v59, -inf }
0x12bc   :  { %4580 = vmax.xlane.f32.xlu1 %v4579_v60 }
0x1343   :  { %v4584_v37 = vpop.xlane.xlu0 %4583 }
0x1344   :  { %v4586_v15 = vsub.f32 %v4578_v57, %v4584_v37 }
0x1345   :  { %v4581_v2 = vpop.xlane.xlu1 %4580 }
0x1346   :  { %v4589_v45 = vmul.f32 1.442695, %v4586_v15  ;;  %v4585_v49 = vsub.f32 %v4577_v59, %v4581_v2  ;;  %v8933_v2 = vld [vmem:[%s12295_s9 + $0x114] ss:$8 sps:$4 sm:$0xff]  }
0x1347   :  { %4946 = vmatprep.subr.bf16.mxu0 %v8933_v2  ;;  %v8952_v2 = vld [vmem:[%s12295_s9 + $0x160] ss:$8 sps:$4 sm:$0xff]  }
0x1348   :  { %9273 = vpow2.f32 %v4589_v45  ;;  %v4587_v51 = vmul.f32 1.442695, %v4585_v49  ;;  %v8931_v45 = vld [vmem:[%s12295_s9 + $0x110] ss:$8 sps:$4 sm:$0xff]   ;;  %v8936_v49 = vld [vmem:[%s12295_s9 + $0x104] ss:$8 sps:$4 sm:$0xff]  }
0x1349   :  { %4947 = vmatpush1.bf16.msra.mxu0 %v8931_v45  ;;  %v8957_v45 = vld [vmem:[%s12295_s9 + $0x154] ss:$8 sps:$4 sm:$0xff]  }
0x134a   :  { %9275 = vpow2.f32 %v4587_v51  ;;  %v8934_v51 = vld [vmem:[%s12295_s9 + $0x100] ss:$8 sps:$4 sm:$0xff]   ;;  %4948 = vmatprep.subr.bf16.mxu0 %v8936_v49  ;;  %v8955_v49 = vld [vmem:[%s12295_s9 + $0x150] ss:$8 sps:$4 sm:$0xff]  }
0x134d   :  { %4949 = vmatpush1.bf16.msra.mxu0 %v8934_v51 }
0x1355   :  { %v9274_v61 = vpop.eup %9273 }
0x1356   :  { %v4594_v34 = vsel %vm1545_vm3, %v9274_v61, 0.0 }
0x1357   :  { %v9276_v46 = vpop.eup %9275  ;;  %4595 = vadd.xlane.f32.xlu1 %v4594_v34 }
0x1358   :  { %v4591_v12 = vsel %vm1541_vm4, %v9276_v46, 0.0 }
0x1359   :  { %4592 = vadd.xlane.f32.xlu0 %v4591_v12 }
0x1368   :  { %4688 = vrot.lane.b32.xlu1 %v4371_v31, %s12334_s8 }
0x136f   :  { %4686 = vrot.lane.b32.xlu0 %v4367_v27, %s12334_s8 }
0x13e0   :  { %v4596_v36 = vpop.xlane.xlu1 %4595 }
0x13e1   :  { %9277 = vrcp.f32 %v4596_v36 }
0x13e2   :  { %v4593_v33 = vpop.xlane.xlu0 %4592 }
0x13e3   :  { %9279 = vrcp.f32 %v4593_v33  ;;  %v8937_v33 = vld [vmem:[%s12295_s9 + $0xf0] ss:$8 sps:$4 sm:$0xff]  }
0x13e4   :  { %v4689_v17 = vpop.permute.xlu1 %4688 }
0x13e6   :  { %v4687_v16 = vpop.permute.xlu0 %4686 }
0x13ee   :  { %v9278_v28 = vpop.eup %9277 }
0x13ef   :  { %v4600_v5 = vmul.f32 %v9278_v28, %v9274_v61 }
0x13f0   :  { %v9280_v0 = vpop.eup %9279 }
0x13f1   :  { %v4598_v40 = vmul.f32 %v9280_v0, %v9276_v46  ;;  %v8942_v0 = vld [vmem:[%s12295_s9 + $0xe4] ss:$8 sps:$4 sm:$0xff]  }
0x13f3   :  { %8254 = vmatprep.mubr.msk.f32.mxu1 %vm1541_vm4, %v4598_v40  ;;  %v8940_v40 = vld [vmem:[%s12295_s9 + $0xe0] ss:$8 sps:$4 sm:$0xff]  }
0x13f4   :  { %8255 = vmatmul.mubr.msk.f32.vlgmr.msra.gmra.mxu1 %vm1541_vm4, %v4600_v5  ;;  %v8945_v5 = vld [vmem:[%s12295_s9 + $0xd4] ss:$8 sps:$4 sm:$0xff]  }
0x13f5   :  { %8258 = vmatpush3.xpose.msk.msra.mxu1 %vm807_vm0, %v11256_v6  ;;  %8261 = vmatprep.mubr.msk.f32.mxu1 %vm807_vm0, %v4687_v16  ;;  %v8943_v16 = vld [vmem:[%s12295_s9 + $0xd0] ss:$8 sps:$4 sm:$0xff]  }
0x13f6   :  { %8259 = vmatprep.subr.msk.mxu1 %vm807_vm0, %v11226_v9 }
0x13f9   :  { %8260 = vmatpush3.xpose.msk.msra.mxu1 %vm807_vm0, %v11226_v9 }
0x13fc   :  { %8262 = vmatmul.mubr.msk.f32.vlgmr.msra.gmra.mxu1 %vm807_vm0, %v4689_v17  ;;  %v8948_v17 = vld [vmem:[%s12295_s9 + $0xc4] ss:$8 sps:$4 sm:$0xff]  }
0x14b4   :  { %v11290_v26 = vpop.f32.mrf.mxu1 }
0x14b6   :  { %v11292_v20 = vpop.f32.mrf.mxu1 }
0x14b7   :  { %v4685_v27 = vpack.c.bf16 %v11290_v26, %v11292_v20 }
0x14bc   :  { %v8263_v13 = vpop.f32.mrf.mxu1 }
0x14bd   :  { %v4776_v44 = vmul.f32 0.125, %v8263_v13  ;;  %v8946_v13 = vld [vmem:[%s12295_s9 + $0xc0] ss:$8 sps:$4 sm:$0xff]  }
0x14be   :  { %v4766_v31 = vpop.f32.mrf.mxu1 }
0x14bf   :  { %v4775_v18 = vmul.f32 0.125, %v4766_v31  ;;  %v4778_v8 = vadd.f32 %v11265_v56, %v4776_v44 }
0x14c1   :  { %v4782_v14 = vsel %vm1545_vm3, %v4778_v8, -inf  ;;  %v4777_v7 = vadd.f32 %v11272_v48, %v4775_v18 }
0x14c2   :  { %4783 = vmax.xlane.f32.xlu0 %v4782_v14  ;;  %v4011_v14 = vrot.slane %v11218_v1, %v10220_v4 }
0x14c3   :  { %v4779_v11 = vsel %vm1541_vm4, %v4777_v7, -inf }
0x14c4   :  { %4780 = vmax.xlane.f32.xlu1 %v4779_v11  ;;  %v4456_v26 = vadd.f32 %v11239_v39, %v4011_v14 }
0x154b   :  { %v4784_v53 = vpop.xlane.xlu0 %4783 }
0x154c   :  { %v4786_v63 = vsub.f32 %v4778_v8, %v4784_v53 }
0x154d   :  { %v4781_v54 = vpop.xlane.xlu1 %4780 }
0x154e   :  { %v4789_v55 = vmul.f32 1.442695, %v4786_v63  ;;  %v4785_v57 = vsub.f32 %v4777_v7, %v4781_v54 }
0x1550   :  { %9281 = vpow2.f32 %v4789_v55  ;;  %v4787_v58 = vmul.f32 1.442695, %v4785_v57 }
0x1552   :  { %9283 = vpow2.f32 %v4787_v58 }
0x155d   :  { %v9282_v59 = vpop.eup %9281 }
0x155e   :  { %v4794_v60 = vsel %vm1545_vm3, %v9282_v59, 0.0 }
0x155f   :  { %v9284_v37 = vpop.eup %9283  ;;  %4795 = vadd.xlane.f32.xlu1 %v4794_v60 }
0x1560   :  { %v4791_v15 = vsel %vm1541_vm4, %v9284_v37, 0.0 }
0x1561   :  { %4792 = vadd.xlane.f32.xlu0 %v4791_v15  ;;  %v8954_v15 = vld [vmem:[%s12295_s9 + $0x164] ss:$8 sps:$4 sm:$0xff]  }
0x1570   :  { %4802 = vrot.lane.b32.xlu1 %v11251_v52, %s12334_s8  ;;  %v8939_v52 = vld [vmem:[%s12295_s9 + $0xf4] ss:$8 sps:$4 sm:$0xff]  }
0x1574   :  { %5065 = vrot.lane.b32.xlu1 %v11256_v6, %s12334_s8 }
0x1577   :  { %4804 = vrot.lane.b32.xlu0 %v11246_v50, %s12334_s8 }
0x1578   :  { %5063 = vrot.lane.b32.xlu1 %v11226_v9, %s12334_s8 }
0x15e8   :  { %v4796_v61 = vpop.xlane.xlu1 %4795 }
0x15e9   :  { %9285 = vrcp.f32 %v4796_v61 }
0x15ea   :  { %v4793_v34 = vpop.xlane.xlu0 %4792 }
0x15eb   :  { %9287 = vrcp.f32 %v4793_v34 }
0x15ec   :  { %v4803_v46 = vpop.permute.xlu1 %4802 }
0x15ee   :  { %v4805_v12 = vpop.permute.xlu0 %4804 }
0x15ef   :  { %8264 = vmatprep.subr.msk.mxu1 %vm812_vm1, %v4805_v12 }
0x15f0   :  { %8265 = vmatpush3.msk.msra.mxu1 %vm812_vm1, %v4805_v12  ;;  %v5066_v6 = vpop.permute.xlu1 %5065 }
0x15f1   :  { %8266 = vmatprep.subr.mxu1 %v4803_v46  ;;  %8271 = vmatprep.subr.msk.mxu0 %vm807_vm0, %v5066_v6 }
0x15f2   :  { %8267 = vmatpush3.msra.mxu1 %v4803_v46 }
0x15f3   :  { %5028 = vmatprep.subr.bf16.mxu1 %v8939_v52 }
0x15f4   :  { %v5064_v8 = vpop.permute.xlu1 %5063 }
0x15f6   :  { %v9286_v9 = vpop.eup %9285 }
0x15f7   :  { %v4800_v28 = vmul.f32 %v9286_v9, %v9282_v59  ;;  %v8960_v9 = vld [vmem:[%s12295_s9 + $0x144] ss:$8 sps:$4 sm:$0xff]  }
0x15f8   :  { %v9288_v50 = vpop.eup %9287 }
0x15f9   :  { %v4798_v36 = vmul.f32 %v9288_v50, %v9284_v37  ;;  %v8951_v37 = vld [vmem:[%s12295_s9 + $0x174] ss:$8 sps:$4 sm:$0xff]  }
0x15fb   :  { %8268 = vmatprep.mubr.msk.f32.mxu1 %vm1541_vm4, %v4798_v36 }
0x15fc   :  { %8269 = vmatmul.mubr.msk.f32.vlgmr.msra.gmra.mxu1 %vm1541_vm4, %v4800_v28 }
0x15fd   :  { %5029 = vmatpush1.bf16.msra.mxu1 %v8937_v33  ;;  %5052 = vmatprep.mubr.bf16.mxu1 %v9349_v21 }
0x15fe   :  { %5030 = vmatprep.subr.bf16.mxu1 %v8942_v0 }
0x1601   :  { %5031 = vmatpush1.bf16.msra.mxu1 %v8940_v40 }
0x1602   :  { %5032 = vmatprep.subr.bf16.mxu1 %v8945_v5 }
0x1605   :  { %5033 = vmatpush1.bf16.msra.mxu1 %v8943_v16 }
0x1606   :  { %5034 = vmatprep.subr.bf16.mxu1 %v8948_v17 }
0x1609   :  { %5035 = vmatpush1.bf16.msra.mxu1 %v8946_v13 }
0x160a   :  { %5312 = vmatprep.subr.bf16.mxu1 %v8951_v37  ;;  %v8978_v37 = vld [vmem:[%s12299_s13 + $0x33c] ss:$24 sps:$4 sm:$0xff]  }
0x160c   :  { %7767 = vmatmul.mubr.msk.bf16.vlgmr.msra.gmra.mxu1 %vm807_vm0, %v4685_v27 }
0x160d   :  { %5336 = vmatprep.mubr.bf16.mxu1 %v9349_v21  ;;  %v4453_v21 = vadd.f32 %v11237_v38, %v4011_v14 }
0x16bc   :  { %v8270_v44 = vpop.f32.mrf.mxu1 }
0x16be   :  { %v4881_v31 = vpop.f32.mrf.mxu1 }
0x16bf   :  { %v4890_v18 = vpack.c.bf16 %v8270_v44, %v4881_v31  ;;  %v7784_v31 = vld [vmem:[%s12296_s10 + $0x2] sm:$0x3] }
0x16c1   :  { %7758 = vmatmul.mubr.msk.bf16.vlgmr.msra.gmra.mxu0 %vm807_vm0, %v4890_v18 }
0x16c2   :  { %8272 = vmatpush3.xpose.msk.msra.mxu0 %vm807_vm0, %v5066_v6  ;;  %8275 = vmatprep.mubr.msk.f32.mxu0 %vm807_vm0, %v11228_v10  ;;  %v8958_v6 = vld [vmem:[%s12295_s9 + $0x140] ss:$8 sps:$4 sm:$0xff]  }
0x16c3   :  { %8273 = vmatprep.subr.msk.mxu0 %vm807_vm0, %v5064_v8 }
0x16c6   :  { %8274 = vmatpush3.xpose.msk.msra.mxu0 %vm807_vm0, %v5064_v8 }
0x16c7   :  { %8278 = vmatprep.subr.msk.mxu0 %vm812_vm1, %v4456_v26 }
0x16c9   :  { %8276 = vmatmul.mubr.msk.f32.vlgmr.msra.gmra.mxu0 %vm807_vm0, %v11233_v3 }
0x16ca   :  { %8279 = vmatpush3.msk.msra.mxu0 %vm812_vm1, %v4456_v26  ;;  %v5365_v26 = vrot.slane %v7784_v31, %v9974_v23 }
0x16cb   :  { %8280 = vmatprep.subr.mxu0 %v4453_v21 }
0x16cc   :  { %8281 = vmatpush3.msra.mxu0 %v4453_v21  ;;  %v5054_v28 = vpop.f32.mrf.mxu1 }
0x16ce   :  { %v5056_v0 = vpop.f32.mrf.mxu1 }
0x16d0   :  { %v5058_v40 = vpop.f32.mrf.mxu1 }
0x16d2   :  { %v5060_v5 = vpop.f32.mrf.mxu1 }
0x1781   :  { %v4968_v10 = vpop.f32.mrf.mxu0 }
0x1782   :  { %v5055_v16 = vadd.f32 %v5054_v28, %v4968_v10 }
0x1783   :  { %v11383_v20 = vpop.f32.mrf.mxu0 }
0x1784   :  { %v5057_v13 = vadd.f32 %v5056_v0, %v11383_v20 }
0x1785   :  { %v11385_v1 = vpop.f32.mrf.mxu0 }
0x1786   :  { %v5059_v8 = vadd.f32 %v5058_v40, %v11385_v1 }
0x1787   :  { %v11387_v27 = vpop.f32.mrf.mxu0 }
0x1788   :  { %v5061_v10 = vadd.f32 %v5060_v5, %v11387_v27 }
0x1789   :  { %v8277_v39 = vpop.f32.mrf.mxu0 }
0x178a   :  { %v5151_v7 = vmul.f32 0.125, %v8277_v39  ;;  %v5361_v39 = vrot.slane %v7784_v31, %v9977_v24 }
0x178b   :  { %v5141_v11 = vpop.f32.mrf.mxu0 }
0x178c   :  { %v5150_v41 = vmul.f32 0.125, %v5141_v11  ;;  %v5153_v38 = vadd.f32 %v11265_v56, %v5151_v7 }
0x178e   :  { %v5157_v43 = vsel %vm1545_vm3, %v5153_v38, -inf  ;;  %v5152_v3 = vadd.f32 %v11272_v48, %v5150_v41  ;;  %v8949_v48 = vld [vmem:[%s12295_s9 + $0x170] ss:$8 sps:$4 sm:$0xff]  }
0x178f   :  { %5158 = vmax.xlane.f32.xlu1 %v5157_v43  ;;  %5313 = vmatpush1.bf16.msra.mxu1 %v8949_v48  ;;  %v8975_v48 = vld [vmem:[%s12299_s13 + $0x334] ss:$24 sps:$4 sm:$0xff]  }
0x1790   :  { %v5154_v42 = vsel %vm1541_vm4, %v5152_v3, -inf  ;;  %5314 = vmatprep.subr.bf16.mxu1 %v8954_v15  ;;  %v8973_v15 = vld [vmem:[%s12299_s13 + $0x330] ss:$24 sps:$4 sm:$0xff]  }
0x1791   :  { %5155 = vmax.xlane.f32.xlu0 %v5154_v42 }
0x1793   :  { %5315 = vmatpush1.bf16.msra.mxu1 %v8952_v2  ;;  %v8976_v2 = vld [vmem:[%s12299_s13 + $0x338] ss:$24 sps:$4 sm:$0xff]  }
0x1794   :  { %5316 = vmatprep.subr.bf16.mxu1 %v8957_v45  ;;  %v8981_v45 = vld [vmem:[%s12299_s13 + $0x304] ss:$24 sps:$4 sm:$0xff]  }
0x1797   :  { %5317 = vmatpush1.bf16.msra.mxu1 %v8955_v49  ;;  %v8984_v49 = vld [vmem:[%s12299_s13 + $0x30c] ss:$24 sps:$4 sm:$0xff]  }
0x1798   :  { %5318 = vmatprep.subr.bf16.mxu1 %v8960_v9 }
0x179b   :  { %5319 = vmatpush1.bf16.msra.mxu1 %v8958_v6 }
0x1818   :  { %v5159_v47 = vpop.xlane.xlu1 %5158 }
0x1819   :  { %v5161_v53 = vsub.f32 %v5153_v38, %v5159_v47 }
0x181a   :  { %v5156_v63 = vpop.xlane.xlu0 %5155 }
0x181b   :  { %v5160_v54 = vsub.f32 %v5152_v3, %v5156_v63  ;;  %v5164_v55 = vmul.f32 1.442695, %v5161_v53 }
0x181d   :  { %v5162_v57 = vmul.f32 1.442695, %v5160_v54  ;;  %v8963_v54 = vld [vmem:[%s12299_s13 + $0x394] ss:$24 sps:$4 sm:$0xff]  }
0x181e   :  { %5915 = vmatprep.subr.bf16.mxu0 %v8963_v54  ;;  %v9020_v54 = vld [vmem:[%s12299_s13 + $0x42c] ss:$24 sps:$4 sm:$0xff]  }
0x181f   :  { %9289 = vpow2.f32 %v5162_v57  ;;  %v8966_v57 = vld [vmem:[%s12299_s13 + $0x39c] ss:$24 sps:$4 sm:$0xff]  }
0x1820   :  { %9291 = vpow2.f32 %v5164_v55  ;;  %v8964_v55 = vld [vmem:[%s12299_s13 + $0x398] ss:$24 sps:$4 sm:$0xff]   ;;  %5958 = vmatprep.subr.bf16.mxu1 %v8966_v57  ;;  %v9018_v57 = vld [vmem:[%s12299_s13 + $0x428] ss:$24 sps:$4 sm:$0xff]  }
0x182c   :  { %v9290_v58 = vpop.eup %9289 }
0x182d   :  { %v5166_v59 = vsel %vm1541_vm4, %v9290_v58, 0.0  ;;  %v9292_v56 = vpop.eup %9291 }
0x182e   :  { %5167 = vadd.xlane.f32.xlu0 %v5166_v59  ;;  %v5169_v60 = vsel %vm1545_vm3, %v9292_v56, 0.0  ;;  %v8972_v59 = vld [vmem:[%s12299_s13 + $0x36c] ss:$24 sps:$4 sm:$0xff]  }
0x1832   :  { %5170 = vadd.xlane.f32.xlu0 %v5169_v60  ;;  %v8970_v60 = vld [vmem:[%s12299_s13 + $0x368] ss:$24 sps:$4 sm:$0xff]  }
0x18b7   :  { %v5168_v51 = vpop.xlane.xlu0 %5167 }
0x18b8   :  { %9293 = vrcp.f32 %v5168_v51  ;;  %v8979_v51 = vld [vmem:[%s12299_s13 + $0x300] ss:$24 sps:$4 sm:$0xff]  }
0x18bb   :  { %v5171_v61 = vpop.xlane.xlu0 %5170 }
0x18bc   :  { %9295 = vrcp.f32 %v5171_v61  ;;  %v8982_v61 = vld [vmem:[%s12299_s13 + $0x308] ss:$24 sps:$4 sm:$0xff]  }
0x18c5   :  { %v9294_v34 = vpop.eup %9293 }
0x18c6   :  { %v5173_v46 = vmul.f32 %v9294_v34, %v9290_v58  ;;  %v8969_v58 = vld [vmem:[%s12299_s13 + $0x364] ss:$24 sps:$4 sm:$0xff]   ;;  %v8987_v34 = vld [vmem:[%s12299_s13 + $0x2d4] ss:$24 sps:$4 sm:$0xff]  }
0x18c8   :  { %8282 = vmatprep.mubr.msk.f32.mxu0 %vm1541_vm4, %v5173_v46  ;;  %v8990_v46 = vld [vmem:[%s12299_s13 + $0x2dc] ss:$24 sps:$4 sm:$0xff]  }
0x18c9   :  { %v9296_v12 = vpop.eup %9295 }
0x18ca   :  { %v5175_v52 = vmul.f32 %v9296_v12, %v9292_v56  ;;  %v8967_v56 = vld [vmem:[%s12299_s13 + $0x360] ss:$24 sps:$4 sm:$0xff]   ;;  %v8985_v12 = vld [vmem:[%s12299_s13 + $0x2d0] ss:$24 sps:$4 sm:$0xff]  }
0x18cc   :  { %8283 = vmatmul.mubr.msk.f32.vlgmr.msra.gmra.mxu0 %vm1541_vm4, %v5175_v52  ;;  %v8988_v52 = vld [vmem:[%s12299_s13 + $0x2d8] ss:$24 sps:$4 sm:$0xff]  }
0x198c   :  { %v8284_v50 = vpop.f32.mrf.mxu0 }
0x198e   :  { %v5251_v36 = vpop.f32.mrf.mxu0 }
0x198f   :  { %v5260_v33 = vpack.c.bf16 %v8284_v50, %v5251_v36 }
0x1991   :  { %7783 = vmatmul.mubr.msk.bf16.vlgmr.msra.gmra.mxu1 %vm807_vm0, %v5260_v33 }
0x1992   :  { %5959 = vmatpush1.bf16.msra.mxu1 %v8964_v55  ;;  %v9015_v55 = vld [vmem:[%s12299_s13 + $0x420] ss:$24 sps:$4 sm:$0xff]  }
0x1993   :  { %5960 = vmatprep.subr.bf16.mxu1 %v8972_v59  ;;  %v9026_v59 = vld [vmem:[%s12299_s13 + $0x3fc] ss:$24 sps:$4 sm:$0xff]  }
0x1996   :  { %5961 = vmatpush1.bf16.msra.mxu1 %v8970_v60  ;;  %v9024_v60 = vld [vmem:[%s12299_s13 + $0x3f8] ss:$24 sps:$4 sm:$0xff]  }
0x1997   :  { %5962 = vmatprep.subr.bf16.mxu1 %v8978_v37  ;;  %v9032_v37 = vld [vmem:[%s12299_s13 + $0x3cc] ss:$24 sps:$4 sm:$0xff]  }
0x199a   :  { %5963 = vmatpush1.bf16.msra.mxu1 %v8976_v2  ;;  %v9030_v2 = vld [vmem:[%s12299_s13 + $0x3c8] ss:$24 sps:$4 sm:$0xff]  }
0x199b   :  { %5964 = vmatprep.subr.bf16.mxu1 %v8984_v49  ;;  %v9071_v49 = vld [vmem:[%s12301_s15 + $0x374] ss:$8 sps:$4 sm:$0xff]  }
0x199e   :  { %5965 = vmatpush1.bf16.msra.mxu1 %v8982_v61 }
0x199f   :  { %5966 = vmatprep.subr.bf16.mxu1 %v8990_v46 }
0x19a2   :  { %5967 = vmatpush1.bf16.msra.mxu1 %v8988_v52 }
0x1a51   :  { %v5338_v17 = vpop.f32.mrf.mxu1 }
0x1a52   :  { %v5347_v44 = vadd.f32 %v5338_v17, %v5055_v16 }
0x1a53   :  { %v5340_v18 = vpop.f32.mrf.mxu1 }
0x1a54   :  { %v5348_v14 = vadd.f32 %v5340_v18, %v5057_v13  ;;  %v5351_v21 = vadd.f32 %v5347_v44, %v10968_v25 }
0x1a55   :  { %v5342_v7 = vpop.f32.mrf.mxu1 }
0x1a56   :  { %v5352_v20 = vadd.f32 %v5348_v14, %v10965_v32  ;;  %v5349_v11 = vadd.f32 %v5342_v7, %v5059_v8  ;;  %v11435_v1 = vadd.f32 %v5361_v39, %v5351_v21  ;;  %v8991_v21 = vld [vmem:[%s12299_s13 + $0x2a0] ss:$24 sps:$4 sm:$0xff]  }
0x1a57   :  { %v5344_v41 = vpop.f32.mrf.mxu1  ;;  %v8994_v7 = vld [vmem:[%s12299_s13 + $0x2a8] ss:$24 sps:$4 sm:$0xff]  }
0x1a58   :  { %v11432_v38 = vadd.f32 %v5365_v26, %v5352_v20  ;;  %v5353_v43 = vadd.f32 %v5349_v11, %v10970_v30  ;;  %v5350_v3 = vadd.f32 %v5344_v41, %v5061_v10  ;;  %v8999_v10 = vld [vmem:[%s12299_s13 + $0x274] ss:$24 sps:$4 sm:$0xff]   ;;  %v8997_v20 = vld [vmem:[%s12299_s13 + $0x270] ss:$24 sps:$4 sm:$0xff]  }
0x1a59   :  { %v9002_v11 = vld [vmem:[%s12299_s13 + $0x27c] ss:$24 sps:$4 sm:$0xff]   ;;  %v9000_v41 = vld [vmem:[%s12299_s13 + $0x278] ss:$24 sps:$4 sm:$0xff]  }
0x1a5a   :  { %v11437_v42 = vadd.f32 %v5361_v39, %v5353_v43  ;;  %v5354_v25 = vadd.f32 %v5350_v3, %v10976_v62  ;;  %v5376_v47 = vsel %vm807_vm0, %v11432_v38, 0.0  ;;  %v8961_v62 = vld [vmem:[%s12299_s13 + $0x390] ss:$24 sps:$4 sm:$0xff]   ;;  %v8996_v39 = vld [vmem:[%s12299_s13 + $0x2ac] ss:$24 sps:$4 sm:$0xff]  }
0x1a5b   :  { %v5377_v27 = vadd.f32 %v5376_v47, %v11435_v1  ;;  %5916 = vmatpush1.bf16.msra.mxu0 %v8961_v62  ;;  %5968 = vmatprep.subr.bf16.mxu1 %v8996_v39  ;;  %v9003_v43 = vld [vmem:[%s12299_s13 + $0x240] ss:$24 sps:$4 sm:$0xff]   ;;  %v9005_v3 = vld [vmem:[%s12299_s13 + $0x244] ss:$24 sps:$4 sm:$0xff]  }
0x1a5c   :  { %v11443_v53 = vadd.f32 %v5365_v26, %v5354_v25  ;;  %v5380_v32 = vsel %vm812_vm1, %v11437_v42, 0.0  ;;  %5917 = vmatprep.subr.bf16.mxu0 %v8969_v58  ;;  %v8993_v26 = vld [vmem:[%s12299_s13 + $0x2a4] ss:$24 sps:$4 sm:$0xff]   ;;  %5969 = vmatpush1.bf16.msra.mxu1 %v8994_v7  ;;  %v9006_v25 = vld [vmem:[%s12299_s13 + $0x248] ss:$24 sps:$4 sm:$0xff]  }
0x1a5d   :  { %5378 = vadd.xlane.f32.xlu0 %v5377_v27  ;;  %5970 = vmatprep.subr.bf16.mxu1 %v9002_v11  ;;  %v9008_v47 = vld [vmem:[%s12299_s13 + $0x24c] ss:$24 sps:$4 sm:$0xff]   ;;  %v9033_v11 = vld [vmem:[%s12299_s13 + $0x3a0] ss:$24 sps:$4 sm:$0xff]  }
0x1a5e   :  { %v5381_v30 = vsel %vm814_vm2, %v11443_v53, 0.0  ;;  %v9011_v27 = vld [vmem:[%s12299_s13 + $0x454] ss:$24 sps:$4 sm:$0xff]   ;;  %v9017_v62 = vld [vmem:[%s12299_s13 + $0x424] ss:$24 sps:$4 sm:$0xff]  }
0x1a5f   :  { %v5382_v63 = vadd.f32 %v5381_v30, %v5380_v32  ;;  %5918 = vmatpush1.bf16.msra.mxu0 %v8967_v56  ;;  %v9014_v32 = vld [vmem:[%s12299_s13 + $0x45c] ss:$24 sps:$4 sm:$0xff]   ;;  %v9009_v30 = vld [vmem:[%s12299_s13 + $0x450] ss:$24 sps:$4 sm:$0xff]  }
0x1a60   :  { %5919 = vmatprep.subr.bf16.mxu0 %v8975_v48  ;;  %5971 = vmatpush1.bf16.msra.mxu1 %v9000_v41  ;;  %v9023_v58 = vld [vmem:[%s12299_s13 + $0x3f4] ss:$24 sps:$4 sm:$0xff]   ;;  %v9021_v56 = vld [vmem:[%s12299_s13 + $0x3f0] ss:$24 sps:$4 sm:$0xff]   ;;  %v9029_v48 = vld [vmem:[%s12299_s13 + $0x3c4] ss:$24 sps:$4 sm:$0xff]  }
0x1a61   :  { %5383 = vadd.xlane.f32.xlu1 %v5382_v63  ;;  %5972 = vmatprep.subr.bf16.mxu1 %v9008_v47  ;;  %v9012_v63 = vld [vmem:[%s12299_s13 + $0x458] ss:$24 sps:$4 sm:$0xff]   ;;  %v9075_v47 = vld [vmem:[%s12301_s15 + $0x360] ss:$8 sps:$4 sm:$0xff]  }
0x1a63   :  { %5920 = vmatpush1.bf16.msra.mxu0 %v8973_v15  ;;  %v9027_v15 = vld [vmem:[%s12299_s13 + $0x3c0] ss:$24 sps:$4 sm:$0xff]  }
0x1a64   :  { %5921 = vmatprep.subr.bf16.mxu0 %v8981_v45  ;;  %5973 = vmatpush1.bf16.msra.mxu1 %v9006_v25  ;;  %v9035_v45 = vld [vmem:[%s12299_s13 + $0x3a4] ss:$24 sps:$4 sm:$0xff]  }
0x1a65   :  { %5982 = vmatprep.subr.bf16.mxu1 %v9014_v32  ;;  %v9041_v25 = vld [vmem:[%s12299_s13 + $0x344] ss:$24 sps:$4 sm:$0xff]   ;;  %v9039_v32 = vld [vmem:[%s12299_s13 + $0x340] ss:$24 sps:$4 sm:$0xff]  }
0x1a67   :  { %5922 = vmatpush1.bf16.msra.mxu0 %v8979_v51 }
0x1a68   :  { %5923 = vmatprep.subr.bf16.mxu0 %v8987_v34  ;;  %5983 = vmatpush2.bf16.msra.mxu1 %v9012_v63  ;;  %v9081_v63 = vld [vmem:[%s12301_s15 + $0x350] ss:$8 sps:$4 sm:$0xff]  }
0x1a69   :  { %5984 = vmatprep.subr.bf16.mxu1 %v9020_v54  ;;  %v9042_v54 = vld [vmem:[%s12299_s13 + $0x310] ss:$24 sps:$4 sm:$0xff]  }
0x1a6b   :  { %5924 = vmatpush1.bf16.msra.mxu0 %v8985_v12 }
0x1a6c   :  { %5925 = vmatprep.subr.bf16.mxu0 %v8993_v26  ;;  %5985 = vmatpush2.bf16.msra.mxu1 %v9018_v57  ;;  %v9087_v57 = vld [vmem:[%s12301_s15 + $0x340] ss:$8 sps:$4 sm:$0xff]  }
0x1a6d   :  { %5986 = vmatprep.subr.bf16.mxu1 %v9026_v59  ;;  %v9045_v59 = vld [vmem:[%s12299_s13 + $0x2e0] ss:$24 sps:$4 sm:$0xff]  }
0x1a6f   :  { %5926 = vmatpush1.bf16.msra.mxu0 %v8991_v21 }
0x1a70   :  { %5927 = vmatprep.subr.bf16.mxu0 %v8999_v10  ;;  %5987 = vmatpush2.bf16.msra.mxu1 %v9024_v60  ;;  %v9093_v60 = vld [vmem:[%s12301_s15 + $0x330] ss:$8 sps:$4 sm:$0xff]  }
0x1a71   :  { %5988 = vmatprep.subr.bf16.mxu1 %v9032_v37  ;;  %v9048_v37 = vld [vmem:[%s12299_s13 + $0x2b0] ss:$24 sps:$4 sm:$0xff]  }
0x1a73   :  { %5928 = vmatpush1.bf16.msra.mxu0 %v8997_v20 }
0x1a74   :  { %5929 = vmatprep.subr.bf16.mxu0 %v9005_v3  ;;  %5989 = vmatpush2.bf16.msra.mxu1 %v9030_v2  ;;  %v9036_v3 = vld [vmem:[%s12299_s13 + $0x370] ss:$24 sps:$4 sm:$0xff]  }
0x1a75   :  { %6735 = vmatprep.subr.bf16.mxu1 %v9071_v49  ;;  %v9099_v2 = vld [vmem:[%s12301_s15 + $0x320] ss:$8 sps:$4 sm:$0xff]   ;;  %v9056_v49 = vld [vmem:[%s12299_s13 + $0x254] ss:$24 sps:$4 sm:$0xff]  }
0x1a77   :  { %5930 = vmatpush1.bf16.msra.mxu0 %v9003_v43  ;;  %v9077_v43 = vld [vmem:[%s12301_s15 + $0x364] ss:$8 sps:$4 sm:$0xff]  }
0x1a78   :  { %5939 = vmatprep.subr.bf16.mxu0 %v9011_v27  ;;  %v9083_v27 = vld [vmem:[%s12301_s15 + $0x354] ss:$8 sps:$4 sm:$0xff]  }
0x1a7b   :  { %5940 = vmatpush2.bf16.msra.mxu0 %v9009_v30  ;;  %v9044_v30 = vld [vmem:[%s12299_s13 + $0x314] ss:$24 sps:$4 sm:$0xff]  }
0x1a7c   :  { %5941 = vmatprep.subr.bf16.mxu0 %v9017_v62  ;;  %v9089_v62 = vld [vmem:[%s12301_s15 + $0x344] ss:$8 sps:$4 sm:$0xff]  }
0x1a7f   :  { %5942 = vmatpush2.bf16.msra.mxu0 %v9015_v55  ;;  %v9047_v55 = vld [vmem:[%s12299_s13 + $0x2e4] ss:$24 sps:$4 sm:$0xff]  }
0x1a80   :  { %5943 = vmatprep.subr.bf16.mxu0 %v9023_v58  ;;  %v9095_v58 = vld [vmem:[%s12301_s15 + $0x334] ss:$8 sps:$4 sm:$0xff]  }
0x1a83   :  { %5944 = vmatpush2.bf16.msra.mxu0 %v9021_v56  ;;  %v9050_v56 = vld [vmem:[%s12299_s13 + $0x2b4] ss:$24 sps:$4 sm:$0xff]  }
0x1a84   :  { %5945 = vmatprep.subr.bf16.mxu0 %v9029_v48  ;;  %v9101_v48 = vld [vmem:[%s12301_s15 + $0x324] ss:$8 sps:$4 sm:$0xff]  }
0x1a87   :  { %5946 = vmatpush2.bf16.msra.mxu0 %v9027_v15  ;;  %v9053_v15 = vld [vmem:[%s12299_s13 + $0x284] ss:$24 sps:$4 sm:$0xff]  }
0x1a88   :  { %6001 = vmatprep.subr.bf16.mxu0 %v9035_v45  ;;  %v9051_v45 = vld [vmem:[%s12299_s13 + $0x280] ss:$24 sps:$4 sm:$0xff]  }
0x1ae6   :  { %v5379_v6 = vpop.xlane.xlu0 %5378 }
0x1ae7   :  { %v5385_v9 = vmul.f32 0.0052083335, %v5379_v6  ;;  %v7785_v6 = vld [vmem:[%s12297_s11 + $0x2] sm:$0x3] }
0x1ae9   :  { %v11510_v50 = vsub.f32 %v11435_v1, %v5385_v9  ;;  %v11513_v36 = vsub.f32 %v11432_v38, %v5385_v9 }
0x1aea   :  { %v5384_v33 = vpop.xlane.xlu1 %5383 }
0x1aeb   :  { %v5386_v28 = vmul.f32 0.0052083335, %v5384_v33  ;;  %v5391_v0 = vmul.f32 %v11510_v50, %v11510_v50  ;;  %v5392_v40 = vmul.f32 %v11513_v36, %v11513_v36  ;;  %v7786_v33 = vld [vmem:[%s12298_s12 + $0x2] sm:$0x3] }
0x1aed   :  { %v11520_v5 = vsub.f32 %v11437_v42, %v5386_v28  ;;  %v11523_v16 = vsub.f32 %v11443_v53, %v5386_v28  ;;  %v5395_v17 = vsel %vm807_vm0, %v5392_v40, 0.0 }
0x1aee   :  { %v5396_v13 = vadd.f32 %v5395_v17, %v5391_v0  ;;  %v5422_v0 = vrot.slane %v7785_v6, %v9974_v23  ;;  %v5418_v17 = vrot.slane %v7785_v6, %v9977_v24  ;;  %v9063_v6 = vld [vmem:[%s12299_s13 + $0x400] ss:$24 sps:$4 sm:$0xff]  }
0x1aef   :  { %v5393_v44 = vmul.f32 %v11520_v5, %v11520_v5  ;;  %v5394_v31 = vmul.f32 %v11523_v16, %v11523_v16 }
0x1af0   :  { %5397 = vadd.xlane.f32.xlu0 %v5396_v13 }
0x1af1   :  { %v5399_v18 = vsel %vm812_vm1, %v5393_v44, 0.0  ;;  %v5400_v8 = vsel %vm814_vm2, %v5394_v31, 0.0  ;;  %v5437_v44 = vrot.slane %v7786_v33, %v9974_v23  ;;  %v5433_v31 = vrot.slane %v7786_v33, %v9977_v24  ;;  %v9066_v33 = vld [vmem:[%s12299_s13 + $0x3d0] ss:$24 sps:$4 sm:$0xff]  }
0x1af2   :  { %v5401_v14 = vadd.f32 %v5400_v8, %v5399_v18 }
0x1af4   :  { %5402 = vadd.xlane.f32.xlu1 %v5401_v14 }
0x1b79   :  { %v5398_v51 = vpop.xlane.xlu0 %5397 }
0x1b7a   :  { %v5404_v61 = vmul.f32 0.0052083335, %v5398_v51  ;;  %v9054_v51 = vld [vmem:[%s12299_s13 + $0x250] ss:$24 sps:$4 sm:$0xff]  }
0x1b7c   :  { %v5406_v34 = vadd.f32 1e-12, %v5404_v61  ;;  %v9059_v61 = vld [vmem:[%s12299_s13 + $0x464] ss:$24 sps:$4 sm:$0xff]  }
0x1b7d   :  { %v5403_v46 = vpop.xlane.xlu1 %5402 }
0x1b7e   :  { %9297 = vrsqrt.f32 %v5406_v34  ;;  %v5405_v12 = vmul.f32 0.0052083335, %v5403_v46  ;;  %v9057_v34 = vld [vmem:[%s12299_s13 + $0x460] ss:$24 sps:$4 sm:$0xff]   ;;  %v9062_v46 = vld [vmem:[%s12299_s13 + $0x434] ss:$24 sps:$4 sm:$0xff]  }
0x1b80   :  { %v5407_v52 = vadd.f32 1e-12, %v5405_v12  ;;  %v9060_v12 = vld [vmem:[%s12299_s13 + $0x430] ss:$24 sps:$4 sm:$0xff]  }
0x1b82   :  { %9299 = vrsqrt.f32 %v5407_v52  ;;  %v9065_v52 = vld [vmem:[%s12299_s13 + $0x404] ss:$24 sps:$4 sm:$0xff]  }
0x1b8b   :  { %v9298_v9 = vpop.eup %9297 }
0x1b8c   :  { %v5411_v28 = vmul.f32 %v9298_v9, %v11513_v36  ;;  %v5410_v40 = vmul.f32 %v9298_v9, %v11510_v50  ;;  %v9068_v9 = vld [vmem:[%s12299_s13 + $0x3d4] ss:$24 sps:$4 sm:$0xff]  }
0x1b8e   :  { %v5426_v8 = vmul.f32 %v5422_v0, %v5411_v28  ;;  %v5425_v26 = vmul.f32 %v5418_v17, %v5410_v40  ;;  %v9074_v28 = vld [vmem:[%s12301_s15 + $0x474] ss:$8 sps:$4 sm:$0xff]   ;;  %v9080_v40 = vld [vmem:[%s12301_s15 + $0x464] ss:$8 sps:$4 sm:$0xff]  }
0x1b8f   :  { %v9300_v13 = vpop.eup %9299 }
0x1b90   :  { %v5413_v18 = vmul.f32 %v9300_v13, %v11523_v16  ;;  %v5412_v14 = vmul.f32 %v9300_v13, %v11520_v5  ;;  %v5441_v36 = vadd.f32 %v5437_v44, %v5426_v8  ;;  %v5440_v10 = vadd.f32 %v5433_v31, %v5425_v26  ;;  %v9038_v16 = vld [vmem:[%s12299_s13 + $0x374] ss:$24 sps:$4 sm:$0xff]   ;;  %v9069_v5 = vld [vmem:[%s12301_s15 + $0x370] ss:$8 sps:$4 sm:$0xff]  }
0x1b91   :  { %v9086_v13 = vld [vmem:[%s12301_s15 + $0x454] ss:$8 sps:$4 sm:$0xff]   ;;  %v9104_v26 = vld [vmem:[%s12301_s15 + $0x424] ss:$8 sps:$4 sm:$0xff]  }
0x1b92   :  { %v5428_v21 = vmul.f32 %v5422_v0, %v5413_v18  ;;  %v5427_v39 = vmul.f32 %v5418_v17, %v5412_v14  ;;  %v9072_v0 = vld [vmem:[%s12301_s15 + $0x470] ss:$8 sps:$4 sm:$0xff]   ;;  %v9078_v17 = vld [vmem:[%s12301_s15 + $0x460] ss:$8 sps:$4 sm:$0xff]   ;;  %v9098_v8 = vld [vmem:[%s12301_s15 + $0x434] ss:$8 sps:$4 sm:$0xff]  }
0x1b93   :  { %v9090_v18 = vld [vmem:[%s12301_s15 + $0x440] ss:$8 sps:$4 sm:$0xff]   ;;  %v9096_v14 = vld [vmem:[%s12301_s15 + $0x430] ss:$8 sps:$4 sm:$0xff]  }
0x1b94   :  { %v5443_v7 = vadd.f32 %v5437_v44, %v5428_v21  ;;  %v5442_v20 = vadd.f32 %v5433_v31, %v5427_v39  ;;  %v9084_v44 = vld [vmem:[%s12301_s15 + $0x450] ss:$8 sps:$4 sm:$0xff]   ;;  %v9092_v31 = vld [vmem:[%s12301_s15 + $0x444] ss:$8 sps:$4 sm:$0xff]   ;;  %v9107_v21 = vld [vmem:[%s12301_s15 + $0x314] ss:$8 sps:$4 sm:$0xff]  }
0x1b95   :  { %v9102_v39 = vld [vmem:[%s12301_s15 + $0x420] ss:$8 sps:$4 sm:$0xff]  }
0x1b96   :  { %v5445_v50 = vpack.c.bf16 %v5443_v7, %v5441_v36  ;;  %v11639_v41 = vpack.c.bf16 %v5442_v20, %v5440_v10  ;;  %v9105_v36 = vld [vmem:[%s12301_s15 + $0x310] ss:$8 sps:$4 sm:$0xff]   ;;  %v9110_v7 = vld [vmem:[%s12301_s15 + $0x414] ss:$8 sps:$4 sm:$0xff]   ;;  %v9113_v20 = vld [vmem:[%s12301_s15 + $0x304] ss:$8 sps:$4 sm:$0xff]  }
0x1b97   :  { %v9108_v10 = vld [vmem:[%s12301_s15 + $0x410] ss:$8 sps:$4 sm:$0xff]  }
0x1b98   :  { %7932 = vmatprep.mubr.msk.bf16.mxu0 %vm807_vm0, %v5445_v50  ;;  %7933 = vmatprep.mubr.msk.bf16.mxu1 %vm807_vm0, %v5445_v50 }
0x1b99   :  { %5948 = vmatmul.mubr.bf16.vlgmr.msra.gmra.mxu0 %v11639_v41  ;;  %5991 = vmatmul.mubr.bf16.vlgmr.msra.gmra.mxu1 %v11639_v41 }
0x1b9a   :  { %6002 = vmatpush1.bf16.msra.mxu0 %v9033_v11  ;;  %7934 = vmatprep.mubr.msk.bf16.mxu0 %vm807_vm0, %v5445_v50  ;;  %v9111_v50 = vld [vmem:[%s12301_s15 + $0x300] ss:$8 sps:$4 sm:$0xff]   ;;  %v9116_v11 = vld [vmem:[%s12301_s15 + $0x404] ss:$8 sps:$4 sm:$0xff]  }
0x1b9b   :  { %6003 = vmatprep.subr.bf16.mxu0 %v9038_v16  ;;  %6736 = vmatpush1.bf16.msra.mxu1 %v9069_v5  ;;  %v9119_v16 = vld [vmem:[%s12301_s15 + $0x3f4] ss:$8 sps:$4 sm:$0xff]   ;;  %v9117_v5 = vld [vmem:[%s12301_s15 + $0x3f0] ss:$8 sps:$4 sm:$0xff]  }
0x1b9c   :  { %6737 = vmatprep.subr.bf16.mxu1 %v9077_v43  ;;  %v9122_v43 = vld [vmem:[%s12301_s15 + $0x4f4] ss:$8 sps:$4 sm:$0xff]  }
0x1b9e   :  { %6004 = vmatpush1.bf16.msra.mxu0 %v9036_v3  ;;  %v9120_v3 = vld [vmem:[%s12301_s15 + $0x4f0] ss:$8 sps:$4 sm:$0xff]  }
0x1b9f   :  { %6005 = vmatprep.subr.bf16.mxu0 %v9041_v25  ;;  %6738 = vmatpush1.bf16.msra.mxu1 %v9075_v47  ;;  %v9125_v25 = vld [vmem:[%s12301_s15 + $0x3e4] ss:$8 sps:$4 sm:$0xff]   ;;  %v9123_v47 = vld [vmem:[%s12301_s15 + $0x3e0] ss:$8 sps:$4 sm:$0xff]  }
0x1ba0   :  { %6739 = vmatprep.subr.bf16.mxu1 %v9083_v27  ;;  %v9128_v27 = vld [vmem:[%s12301_s15 + $0x4e4] ss:$8 sps:$4 sm:$0xff]  }
0x1ba2   :  { %6006 = vmatpush1.bf16.msra.mxu0 %v9039_v32  ;;  %v9126_v32 = vld [vmem:[%s12301_s15 + $0x4e0] ss:$8 sps:$4 sm:$0xff]  }
0x1ba3   :  { %6007 = vmatprep.subr.bf16.mxu0 %v9044_v30  ;;  %6740 = vmatpush1.bf16.msra.mxu1 %v9081_v63  ;;  %v9131_v30 = vld [vmem:[%s12301_s15 + $0x3d4] ss:$8 sps:$4 sm:$0xff]   ;;  %v9129_v63 = vld [vmem:[%s12301_s15 + $0x3d0] ss:$8 sps:$4 sm:$0xff]  }
0x1ba4   :  { %6741 = vmatprep.subr.bf16.mxu1 %v9089_v62  ;;  %v9134_v62 = vld [vmem:[%s12301_s15 + $0x4d4] ss:$8 sps:$4 sm:$0xff]  }
0x1ba6   :  { %6008 = vmatpush1.bf16.msra.mxu0 %v9042_v54  ;;  %v9132_v54 = vld [vmem:[%s12301_s15 + $0x4d0] ss:$8 sps:$4 sm:$0xff]  }
0x1ba7   :  { %6009 = vmatprep.subr.bf16.mxu0 %v9047_v55  ;;  %6742 = vmatpush1.bf16.msra.mxu1 %v9087_v57  ;;  %v9137_v55 = vld [vmem:[%s12301_s15 + $0x3c4] ss:$8 sps:$4 sm:$0xff]   ;;  %v9135_v57 = vld [vmem:[%s12301_s15 + $0x3c0] ss:$8 sps:$4 sm:$0xff]  }
0x1ba8   :  { %6743 = vmatprep.subr.bf16.mxu1 %v9095_v58  ;;  %v9140_v58 = vld [vmem:[%s12301_s15 + $0x4c4] ss:$8 sps:$4 sm:$0xff]  }
0x1baa   :  { %6010 = vmatpush1.bf16.msra.mxu0 %v9045_v59  ;;  %v9138_v59 = vld [vmem:[%s12301_s15 + $0x4c0] ss:$8 sps:$4 sm:$0xff]  }
0x1bab   :  { %6011 = vmatprep.subr.bf16.mxu0 %v9050_v56  ;;  %6744 = vmatpush1.bf16.msra.mxu1 %v9093_v60  ;;  %v9143_v56 = vld [vmem:[%s12301_s15 + $0x3b4] ss:$8 sps:$4 sm:$0xff]   ;;  %v9141_v60 = vld [vmem:[%s12301_s15 + $0x3b0] ss:$8 sps:$4 sm:$0xff]  }
0x1bac   :  { %6745 = vmatprep.subr.bf16.mxu1 %v9101_v48  ;;  %v9146_v48 = vld [vmem:[%s12301_s15 + $0x4b4] ss:$8 sps:$4 sm:$0xff]  }
0x1bae   :  { %6012 = vmatpush1.bf16.msra.mxu0 %v9048_v37  ;;  %v9144_v37 = vld [vmem:[%s12301_s15 + $0x4b0] ss:$8 sps:$4 sm:$0xff]  }
0x1baf   :  { %6013 = vmatprep.subr.bf16.mxu0 %v9053_v15  ;;  %6746 = vmatpush1.bf16.msra.mxu1 %v9099_v2  ;;  %v9149_v15 = vld [vmem:[%s12301_s15 + $0x3a4] ss:$8 sps:$4 sm:$0xff]   ;;  %v9147_v2 = vld [vmem:[%s12301_s15 + $0x3a0] ss:$8 sps:$4 sm:$0xff]  }
0x1bb0   :  { %6747 = vmatprep.subr.bf16.mxu1 %v9107_v21 }
0x1bb2   :  { %6014 = vmatpush1.bf16.msra.mxu0 %v9051_v45  ;;  %v9152_v45 = vld [vmem:[%s12301_s15 + $0x4a4] ss:$8 sps:$4 sm:$0xff]  }
0x1bb3   :  { %6015 = vmatprep.subr.bf16.mxu0 %v9056_v49  ;;  %6748 = vmatpush1.bf16.msra.mxu1 %v9105_v36  ;;  %v9150_v49 = vld [vmem:[%s12301_s15 + $0x4a0] ss:$8 sps:$4 sm:$0xff]  }
0x1bb4   :  { %6749 = vmatprep.subr.bf16.mxu1 %v9113_v20 }
0x1bb6   :  { %6016 = vmatpush1.bf16.msra.mxu0 %v9054_v51  ;;  %v9155_v51 = vld [vmem:[%s12301_s15 + $0x394] ss:$8 sps:$4 sm:$0xff]  }
0x1bb7   :  { %6025 = vmatprep.subr.bf16.mxu0 %v9059_v61  ;;  %6750 = vmatpush1.bf16.msra.mxu1 %v9111_v50  ;;  %v9153_v61 = vld [vmem:[%s12301_s15 + $0x390] ss:$8 sps:$4 sm:$0xff]  }
0x1bb8   :  { %6751 = vmatprep.subr.bf16.mxu1 %v9119_v16 }
0x1bba   :  { %6026 = vmatpush2.bf16.msra.mxu0 %v9057_v34  ;;  %v9158_v34 = vld [vmem:[%s12301_s15 + $0x494] ss:$8 sps:$4 sm:$0xff]  }
0x1bbb   :  { %6027 = vmatprep.subr.bf16.mxu0 %v9062_v46  ;;  %6752 = vmatpush2.bf16.msra.mxu1 %v9117_v5  ;;  %v9156_v46 = vld [vmem:[%s12301_s15 + $0x490] ss:$8 sps:$4 sm:$0xff]  }
0x1bbc   :  { %6753 = vmatprep.subr.bf16.mxu1 %v9125_v25 }
0x1bbe   :  { %6028 = vmatpush2.bf16.msra.mxu0 %v9060_v12  ;;  %v9159_v12 = vld [vmem:[%s12301_s15 + $0x380] ss:$8 sps:$4 sm:$0xff]  }
0x1bbf   :  { %6029 = vmatprep.subr.bf16.mxu0 %v9065_v52  ;;  %6754 = vmatpush2.bf16.msra.mxu1 %v9123_v47  ;;  %v9161_v52 = vld [vmem:[%s12301_s15 + $0x384] ss:$8 sps:$4 sm:$0xff]  }
0x1bc0   :  { %6755 = vmatprep.subr.bf16.mxu1 %v9131_v30 }
0x1bc2   :  { %6030 = vmatpush2.bf16.msra.mxu0 %v9063_v6  ;;  %v9164_v6 = vld [vmem:[%s12301_s15 + $0x484] ss:$8 sps:$4 sm:$0xff]  }
0x1bc3   :  { %6031 = vmatprep.subr.bf16.mxu0 %v9068_v9  ;;  %6756 = vmatpush2.bf16.msra.mxu1 %v9129_v63  ;;  %v9162_v9 = vld [vmem:[%s12301_s15 + $0x480] ss:$8 sps:$4 sm:$0xff]  }
0x1bc4   :  { %6757 = vmatprep.subr.bf16.mxu1 %v9137_v55 }
0x1bc6   :  { %6032 = vmatpush2.bf16.msra.mxu0 %v9066_v33  ;;  %v9167_v33 = vld [vmem:[%s12301_s15 + $0x574] ss:$8 sps:$4 sm:$0xff]  }
0x1bc7   :  { %6778 = vmatprep.subr.bf16.mxu0 %v9074_v28  ;;  %6758 = vmatpush2.bf16.msra.mxu1 %v9135_v57  ;;  %v11908_v28 = vld [vmem:[%s12300_s14 + $0x6] sm:$0x3f] }
0x1bc8   :  { %6759 = vmatprep.subr.bf16.mxu1 %v9143_v56 }
0x1bc9   :  { %6034 = vmatmul.mubr.bf16.vlgmr.msra.gmra.mxu0 %v11639_v41  ;;  %v9114_v41 = vld [vmem:[%s12301_s15 + $0x400] ss:$8 sps:$4 sm:$0xff]  }
0x1bca   :  { %6779 = vmatpush1.bf16.msra.mxu0 %v9072_v0  ;;  %v5525_v0 = vrot.slane %v11908_v28, %v9977_v24 }
0x1bcb   :  { %6780 = vmatprep.subr.bf16.mxu0 %v9080_v40  ;;  %6760 = vmatpush2.bf16.msra.mxu1 %v9141_v60  ;;  %v5533_v40 = vrot.slane %v11908_v28, %v10091_v29 }
0x1bcc   :  { %6761 = vmatprep.subr.bf16.mxu1 %v9149_v15 }
0x1bce   :  { %6781 = vmatpush1.bf16.msra.mxu0 %v9078_v17  ;;  %v5529_v17 = vrot.slane %v11908_v28, %v9974_v23 }
0x1bcf   :  { %6782 = vmatprep.subr.bf16.mxu0 %v9086_v13  ;;  %6762 = vmatpush2.bf16.msra.mxu1 %v9147_v2  ;;  %v5537_v13 = vrot.slane %v11908_v28, %v10098_v35 }
0x1bd0   :  { %6763 = vmatprep.subr.bf16.mxu1 %v9155_v51 }
0x1bd2   :  { %6783 = vmatpush1.bf16.msra.mxu0 %v9084_v44 }
0x1bd3   :  { %6784 = vmatprep.subr.bf16.mxu0 %v9092_v31  ;;  %6764 = vmatpush2.bf16.msra.mxu1 %v9153_v61 }
0x1bd4   :  { %6765 = vmatprep.subr.bf16.mxu1 %v9161_v52 }
0x1bd6   :  { %6785 = vmatpush1.bf16.msra.mxu0 %v9090_v18 }
0x1bd7   :  { %6786 = vmatprep.subr.bf16.mxu0 %v9098_v8  ;;  %6766 = vmatpush2.bf16.msra.mxu1 %v9159_v12 }
0x1bd8   :  { %6821 = vmatprep.subr.bf16.mxu1 %v9167_v33 }
0x1bda   :  { %6787 = vmatpush1.bf16.msra.mxu0 %v9096_v14 }
0x1bdb   :  { %6788 = vmatprep.subr.bf16.mxu0 %v9104_v26 }
0x1bde   :  { %6789 = vmatpush1.bf16.msra.mxu0 %v9102_v39 }
0x1bdf   :  { %6790 = vmatprep.subr.bf16.mxu0 %v9110_v7 }
0x1be2   :  { %6791 = vmatpush1.bf16.msra.mxu0 %v9108_v10 }
0x1be3   :  { %6792 = vmatprep.subr.bf16.mxu0 %v9116_v11 }
0x1be6   :  { %6793 = vmatpush1.bf16.msra.mxu0 %v9114_v41 }
0x1be7   :  { %6794 = vmatprep.subr.bf16.mxu0 %v9122_v43 }
0x1bea   :  { %6795 = vmatpush2.bf16.msra.mxu0 %v9120_v3 }
0x1beb   :  { %6796 = vmatprep.subr.bf16.mxu0 %v9128_v27 }
0x1bee   :  { %6797 = vmatpush2.bf16.msra.mxu0 %v9126_v32 }
0x1bef   :  { %6798 = vmatprep.subr.bf16.mxu0 %v9134_v62 }
0x1bf2   :  { %6799 = vmatpush2.bf16.msra.mxu0 %v9132_v54 }
0x1bf3   :  { %6800 = vmatprep.subr.bf16.mxu0 %v9140_v58 }
0x1bf6   :  { %6801 = vmatpush2.bf16.msra.mxu0 %v9138_v59 }
0x1bf7   :  { %6802 = vmatprep.subr.bf16.mxu0 %v9146_v48 }
0x1bfa   :  { %6803 = vmatpush2.bf16.msra.mxu0 %v9144_v37 }
0x1bfb   :  { %6804 = vmatprep.subr.bf16.mxu0 %v9152_v45 }
0x1bfe   :  { %6805 = vmatpush2.bf16.msra.mxu0 %v9150_v49 }
0x1bff   :  { %6806 = vmatprep.subr.bf16.mxu0 %v9158_v34 }
0x1c02   :  { %6807 = vmatpush2.bf16.msra.mxu0 %v9156_v46 }
0x1c03   :  { %6808 = vmatprep.subr.bf16.mxu0 %v9164_v6 }
0x1c06   :  { %6809 = vmatpush2.bf16.msra.mxu0 %v9162_v9 }
0x1c59   :  { %v5949_v44 = vpop.f32.mrf.mxu0  ;;  %v5992_v31 = vpop.f32.mrf.mxu1 }
0x1c5a   :  { %v11918_v18 = vadd.f32 %v5949_v44, %v5525_v0  ;;  %v11920_v8 = vadd.f32 %v5992_v31, %v5533_v40 }
0x1c5b   :  { %v5951_v14 = vpop.f32.mrf.mxu0  ;;  %v5994_v26 = vpop.f32.mrf.mxu1 }
0x1c5c   :  { %v6044_v21 = vmul.f32 %v11918_v18, %v11918_v18  ;;  %v6046_v29 = vmul.f32 %v11920_v8, %v11920_v8  ;;  %v11926_v39 = vadd.f32 %v5951_v14, %v5529_v17  ;;  %v11928_v36 = vadd.f32 %v5994_v26, %v5537_v13 }
0x1c5d   :  { %v5953_v7 = vpop.f32.mrf.mxu0  ;;  %v5996_v35 = vpop.f32.mrf.mxu1 }
0x1c5e   :  { %v6056_v10 = vmul.f32 %v6044_v21, %v11918_v18  ;;  %v6058_v20 = vmul.f32 %v6046_v29, %v11920_v8  ;;  %v6045_v50 = vmul.f32 %v11926_v39, %v11926_v39  ;;  %v6047_v11 = vmul.f32 %v11928_v36, %v11928_v36 }
0x1c5f   :  { %v11936_v41 = vadd.f32 %v5953_v7, %v5525_v0  ;;  %v11938_v16 = vadd.f32 %v5996_v35, %v5533_v40  ;;  %v5955_v5 = vpop.f32.mrf.mxu0  ;;  %v5998_v43 = vpop.f32.mrf.mxu1 }
0x1c60   :  { %v6068_v3 = vmul.f32 0.044715, %v6056_v10  ;;  %v6070_v25 = vmul.f32 0.044715, %v6058_v20  ;;  %v6057_v47 = vmul.f32 %v6045_v50, %v11926_v39  ;;  %v6059_v27 = vmul.f32 %v6047_v11, %v11928_v36 }
0x1c61   :  { %v6050_v32 = vmul.f32 %v11936_v41, %v11936_v41  ;;  %v6052_v30 = vmul.f32 %v11938_v16, %v11938_v16  ;;  %v11946_v63 = vadd.f32 %v5955_v5, %v5529_v17  ;;  %v11948_v62 = vadd.f32 %v5998_v43, %v5537_v13 }
0x1c62   :  { %v6080_v54 = vadd.f32 %v6068_v3, %v11918_v18  ;;  %v6082_v55 = vadd.f32 %v6070_v25, %v11920_v8  ;;  %v6069_v57 = vmul.f32 0.044715, %v6057_v47  ;;  %v6071_v58 = vmul.f32 0.044715, %v6059_v27 }
0x1c63   :  { %v6062_v59 = vmul.f32 %v6050_v32, %v11936_v41  ;;  %v6064_v56 = vmul.f32 %v6052_v30, %v11938_v16  ;;  %v6051_v60 = vmul.f32 %v11946_v63, %v11946_v63  ;;  %v6053_v48 = vmul.f32 %v11948_v62, %v11948_v62 }
0x1c64   :  { %v6092_v37 = vmul.f32 0.7978846, %v6080_v54  ;;  %v6094_v15 = vmul.f32 0.7978846, %v6082_v55  ;;  %v6081_v2 = vadd.f32 %v6069_v57, %v11926_v39  ;;  %v6083_v45 = vadd.f32 %v6071_v58, %v11928_v36 }
0x1c65   :  { %v6074_v49 = vmul.f32 0.044715, %v6062_v59  ;;  %v6076_v51 = vmul.f32 0.044715, %v6064_v56  ;;  %v6063_v61 = vmul.f32 %v6051_v60, %v11946_v63  ;;  %v6065_v34 = vmul.f32 %v6053_v48, %v11948_v62 }
0x1c66   :  { %9301 = vtanh.f32 %v6092_v37  ;;  %v6093_v46 = vmul.f32 0.7978846, %v6081_v2  ;;  %v6095_v12 = vmul.f32 0.7978846, %v6083_v45 }
0x1c67   :  { %9303 = vtanh.f32 %v6094_v15  ;;  %v6086_v52 = vadd.f32 %v6074_v49, %v11936_v41  ;;  %v6088_v6 = vadd.f32 %v6076_v51, %v11938_v16  ;;  %v6075_v9 = vmul.f32 0.044715, %v6063_v61 }
0x1c68   :  { %9305 = vtanh.f32 %v6093_v46  ;;  %v6077_v33 = vmul.f32 0.044715, %v6065_v34 }
0x1c69   :  { %9307 = vtanh.f32 %v6095_v12  ;;  %v6098_v0 = vmul.f32 0.7978846, %v6086_v52  ;;  %v6100_v40 = vmul.f32 0.7978846, %v6088_v6  ;;  %v6087_v17 = vadd.f32 %v6075_v9, %v11946_v63  ;;  %v9176_v12 = vld [vmem:[%s12301_s15 + $0x544] ss:$8 sps:$4 sm:$0xff]  }
0x1c6a   :  { %v6089_v13 = vadd.f32 %v6077_v33, %v11948_v62  ;;  %v5541_v6 = vrot.slane %v11908_v28, %v10220_v4 }
0x1c6b   :  { %9309 = vtanh.f32 %v6098_v0  ;;  %v6099_v44 = vmul.f32 0.7978846, %v6087_v17 }
0x1c6c   :  { %9311 = vtanh.f32 %v6100_v40  ;;  %v6101_v31 = vmul.f32 0.7978846, %v6089_v13  ;;  %v9179_v40 = vld [vmem:[%s12301_s15 + $0x534] ss:$8 sps:$4 sm:$0xff]  }
0x1c6d   :  { %9313 = vtanh.f32 %v6099_v44  ;;  %v9177_v44 = vld [vmem:[%s12301_s15 + $0x530] ss:$8 sps:$4 sm:$0xff]  }
0x1c6e   :  { %9315 = vtanh.f32 %v6101_v31 }
0x1c73   :  { %v9302_v14 = vpop.eup %9301 }
0x1c74   :  { %v9304_v26 = vpop.eup %9303  ;;  %v6116_v10 = vadd.f32 1.0, %v9302_v14 }
0x1c75   :  { %v9306_v21 = vpop.eup %9305  ;;  %v6118_v11 = vadd.f32 1.0, %v9304_v26 }
0x1c76   :  { %v9308_v29 = vpop.eup %9307  ;;  %v6117_v7 = vadd.f32 1.0, %v9306_v21  ;;  %v6128_v30 = vmul.f32 0.5, %v6116_v10  ;;  %v9182_v21 = vld [vmem:[%s12301_s15 + $0x524] ss:$8 sps:$4 sm:$0xff]   ;;  %v9180_v10 = vld [vmem:[%s12301_s15 + $0x520] ss:$8 sps:$4 sm:$0xff]  }
0x1c77   :  { %v6119_v20 = vadd.f32 1.0, %v9308_v29  ;;  %v6130_v58 = vmul.f32 0.5, %v6118_v11 }
0x1c78   :  { %v9310_v35 = vpop.eup %9309  ;;  %v6129_v32 = vmul.f32 0.5, %v6117_v7  ;;  %v6140_v2 = vmul.f32 %v6128_v30, %v11918_v18  ;;  %v9168_v18 = vld [vmem:[%s12301_s15 + $0x560] ss:$8 sps:$4 sm:$0xff]  }
0x1c79   :  { %v9312_v50 = vpop.eup %9311  ;;  %v6122_v5 = vadd.f32 1.0, %v9310_v35  ;;  %v6131_v57 = vmul.f32 0.5, %v6119_v20  ;;  %v6142_v51 = vmul.f32 %v6130_v58, %v11920_v8  ;;  %v9173_v8 = vld [vmem:[%s12301_s15 + $0x554] ss:$8 sps:$4 sm:$0xff]  }
0x1c7a   :  { %v9314_v43 = vpop.eup %9313  ;;  %v6124_v3 = vadd.f32 1.0, %v9312_v50  ;;  %v6141_v37 = vmul.f32 %v6129_v32, %v11926_v39  ;;  %v9170_v39 = vld [vmem:[%s12301_s15 + $0x564] ss:$8 sps:$4 sm:$0xff]  }
0x1c7b   :  { %v9316_v25 = vpop.eup %9315  ;;  %v6134_v47 = vmul.f32 0.5, %v6122_v5  ;;  %v6123_v27 = vadd.f32 1.0, %v9314_v43  ;;  %v6143_v45 = vmul.f32 %v6131_v57, %v11928_v36  ;;  %v5545_v36 = vrot.slane %v11908_v28, %v2503_v19  ;;  %v9174_v19 = vld [vmem:[%s12301_s15 + $0x540] ss:$8 sps:$4 sm:$0xff]   ;;  %v9185_v5 = vld [vmem:[%s12301_s15 + $0x514] ss:$8 sps:$4 sm:$0xff]  }
0x1c7c   :  { %v6136_v54 = vmul.f32 0.5, %v6124_v3  ;;  %v6125_v55 = vadd.f32 1.0, %v9316_v25  ;;  %v9183_v25 = vld [vmem:[%s12301_s15 + $0x510] ss:$8 sps:$4 sm:$0xff]   ;;  %v9188_v32 = vld [vmem:[%s12301_s15 + $0x504] ss:$8 sps:$4 sm:$0xff]  }
0x1c7d   :  { %v6135_v59 = vmul.f32 0.5, %v6123_v27  ;;  %v6146_v56 = vmul.f32 %v6134_v47, %v11936_v41  ;;  %v9165_v41 = vld [vmem:[%s12301_s15 + $0x570] ss:$8 sps:$4 sm:$0xff]   ;;  %v9191_v57 = vld [vmem:[%s12301_s15 + $0x5f4] ss:$8 sps:$4 sm:$0xff]  }
0x1c7e   :  { %v6137_v60 = vmul.f32 0.5, %v6125_v55  ;;  %v6148_v48 = vmul.f32 %v6136_v54, %v11938_v16  ;;  %v9186_v54 = vld [vmem:[%s12301_s15 + $0x500] ss:$8 sps:$4 sm:$0xff]  }
0x1c7f   :  { %v6147_v15 = vmul.f32 %v6135_v59, %v11946_v63  ;;  %v6152_v46 = vpack.c.bf16 %v6146_v56, %v6140_v2  ;;  %v9189_v59 = vld [vmem:[%s12301_s15 + $0x5f0] ss:$8 sps:$4 sm:$0xff]   ;;  %v9197_v2 = vld [vmem:[%s12301_s15 + $0x5d4] ss:$8 sps:$4 sm:$0xff]  }
0x1c80   :  { %v6149_v49 = vmul.f32 %v6137_v60, %v11948_v62  ;;  %v6154_v16 = vpack.c.bf16 %v6148_v48, %v6142_v51  ;;  %v9171_v62 = vld [vmem:[%s12301_s15 + $0x550] ss:$8 sps:$4 sm:$0xff]   ;;  %v9194_v60 = vld [vmem:[%s12301_s15 + $0x5e4] ss:$8 sps:$4 sm:$0xff]  }
0x1c81   :  { %v6153_v61 = vpack.c.bf16 %v6147_v15, %v6141_v37  ;;  %v9192_v15 = vld [vmem:[%s12301_s15 + $0x5e0] ss:$8 sps:$4 sm:$0xff]   ;;  %v9195_v51 = vld [vmem:[%s12301_s15 + $0x5d0] ss:$8 sps:$4 sm:$0xff]  }
0x1c82   :  { %v6155_v34 = vpack.c.bf16 %v6149_v49, %v6143_v45 }
0x1c83   :  { %6767 = vmatprep.mubr.bf16.mxu1 %v6153_v61  ;;  %v9200_v61 = vld [vmem:[%s12301_s15 + $0x5c4] ss:$8 sps:$4 sm:$0xff]  }
0x1c84   :  { %6810 = vmatprep.mubr.bf16.mxu0 %v6155_v34  ;;  %6768 = vmatmul.mubr.bf16.vlgmr.msra.gmra.mxu1 %v6152_v46 }
0x1c85   :  { %6811 = vmatmul.mubr.bf16.vlgmr.msra.gmra.mxu0 %v6154_v16  ;;  %6822 = vmatpush1.bf16.msra.mxu1 %v9165_v41 }
0x1c86   :  { %6823 = vmatprep.subr.bf16.mxu1 %v9170_v39  ;;  %v9198_v39 = vld [vmem:[%s12301_s15 + $0x5c0] ss:$8 sps:$4 sm:$0xff]  }
0x1c89   :  { %6824 = vmatpush1.bf16.msra.mxu1 %v9168_v18  ;;  %v6035_v63 = vpop.f32.mrf.mxu0 }
0x1c8a   :  { %6825 = vmatprep.subr.bf16.mxu1 %v9173_v8  ;;  %v12009_v4 = vadd.f32 %v6035_v63, %v5541_v6  ;;  %v9203_v8 = vld [vmem:[%s12301_s15 + $0x5b4] ss:$8 sps:$4 sm:$0xff]   ;;  %v9201_v63 = vld [vmem:[%s12301_s15 + $0x5b0] ss:$8 sps:$4 sm:$0xff]  }
0x1c8b   :  { %v6037_v52 = vpop.f32.mrf.mxu0 }
0x1c8c   :  { %v11997_v9 = vadd.f32 %v6037_v52, %v5545_v36  ;;  %v6048_v29 = vmul.f32 %v12009_v4, %v12009_v4 }
0x1c8d   :  { %6826 = vmatpush1.bf16.msra.mxu1 %v9171_v62  ;;  %v6039_v22 = vpop.f32.mrf.mxu0  ;;  %v9206_v62 = vld [vmem:[%s12301_s15 + $0x5a4] ss:$8 sps:$4 sm:$0xff]  }
0x1c8e   :  { %v6049_v33 = vmul.f32 %v11997_v9, %v11997_v9  ;;  %v12004_v0 = vadd.f32 %v6039_v22, %v5541_v6  ;;  %6827 = vmatprep.subr.bf16.mxu1 %v9176_v12  ;;  %v6060_v43 = vmul.f32 %v6048_v29, %v12009_v4  ;;  %v9204_v6 = vld [vmem:[%s12301_s15 + $0x5a0] ss:$8 sps:$4 sm:$0xff]   ;;  %v9209_v22 = vld [vmem:[%s12301_s15 + $0x594] ss:$8 sps:$4 sm:$0xff]  }
0x1c8f   :  { %v6041_v17 = vpop.f32.mrf.mxu0 }
0x1c90   :  { %v6061_v28 = vmul.f32 %v6049_v33, %v11997_v9  ;;  %v6042_v13 = vadd.f32 %v6041_v17, %v5545_v36  ;;  %v6054_v14 = vmul.f32 %v12004_v0, %v12004_v0  ;;  %v6072_v30 = vmul.f32 0.044715, %v6060_v43  ;;  %v9207_v33 = vld [vmem:[%s12301_s15 + $0x590] ss:$8 sps:$4 sm:$0xff]   ;;  %v9212_v17 = vld [vmem:[%s12301_s15 + $0x584] ss:$8 sps:$4 sm:$0xff]  }
0x1c91   :  { %6828 = vmatpush1.bf16.msra.mxu1 %v9174_v19 }
0x1c92   :  { %v6073_v31 = vmul.f32 0.044715, %v6061_v28  ;;  %v6055_v26 = vmul.f32 %v6042_v13, %v6042_v13  ;;  %6829 = vmatprep.subr.bf16.mxu1 %v9179_v40  ;;  %v6066_v50 = vmul.f32 %v6054_v14, %v12004_v0  ;;  %v6084_v58 = vadd.f32 %v6072_v30, %v12009_v4 }
0x1c94   :  { %v6085_v7 = vadd.f32 %v6073_v31, %v11997_v9  ;;  %v6067_v35 = vmul.f32 %v6055_v26, %v6042_v13  ;;  %v6078_v47 = vmul.f32 0.044715, %v6066_v50  ;;  %v6096_v48 = vmul.f32 0.7978846, %v6084_v58 }
0x1c95   :  { %6830 = vmatpush1.bf16.msra.mxu1 %v9177_v44  ;;  %v9351_v26 = vmov 0.0  }
0x1c96   :  { %v6097_v20 = vmul.f32 0.7978846, %v6085_v7  ;;  %v6079_v11 = vmul.f32 0.044715, %v6067_v35  ;;  %6831 = vmatprep.subr.bf16.mxu1 %v9182_v21  ;;  %v6090_v55 = vadd.f32 %v6078_v47, %v12004_v0  ;;  %6959 = vmatprep.mubr.f32.mxu0 %v9351_v26 }
0x1c98   :  { %9317 = vtanh.f32 %v6097_v20  ;;  %v6091_v3 = vadd.f32 %v6079_v11, %v6042_v13  ;;  %v6102_v56 = vmul.f32 0.7978846, %v6090_v55  ;;  %v8127_v55 = vld [vmem:[%s12302_s16 + $0x2] sm:$0x3] }
0x1c99   :  { %6832 = vmatpush1.bf16.msra.mxu1 %v9180_v10 }
0x1c9a   :  { %v6103_v27 = vmul.f32 0.7978846, %v6091_v3  ;;  %6833 = vmatprep.subr.bf16.mxu1 %v9185_v5 }
0x1c9c   :  { %9319 = vtanh.f32 %v6103_v27 }
0x1c9d   :  { %6834 = vmatpush1.bf16.msra.mxu1 %v9183_v25  ;;  %9321 = vtanh.f32 %v6102_v56 }
0x1c9e   :  { %6835 = vmatprep.subr.bf16.mxu1 %v9188_v32  ;;  %9323 = vtanh.f32 %v6096_v48 }
0x1ca1   :  { %6836 = vmatpush1.bf16.msra.mxu1 %v9186_v54 }
0x1ca2   :  { %6837 = vmatprep.subr.bf16.mxu1 %v9191_v57 }
0x1ca5   :  { %v9318_v37 = vpop.eup %9317  ;;  %6838 = vmatpush2.bf16.msra.mxu1 %v9189_v59 }
0x1ca6   :  { %6839 = vmatprep.subr.bf16.mxu1 %v9194_v60  ;;  %v6121_v45 = vadd.f32 1.0, %v9318_v37  ;;  %v6878_v60 = vrot.slane %v8127_v55, %v9974_v23  ;;  %v6874_v37 = vrot.slane %v8127_v55, %v9977_v24  ;;  %v6981_v23 = vld [vmem:[%s12303_s17 + $0x78] sm:$0xff]  ;;  %v6980_v24 = vld [vmem:[%s12303_s17 + $0x70] sm:$0xff] }
0x1ca8   :  { %v6133_v34 = vmul.f32 0.5, %v6121_v45 }
0x1ca9   :  { %v9320_v49 = vpop.eup %9319  ;;  %6840 = vmatpush2.bf16.msra.mxu1 %v9192_v15 }
0x1caa   :  { %6841 = vmatprep.subr.bf16.mxu1 %v9197_v2  ;;  %v6127_v41 = vadd.f32 1.0, %v9320_v49  ;;  %v6145_v16 = vmul.f32 %v6133_v34, %v11997_v9  ;;  %v9322_v12 = vpop.eup %9321  ;;  %v6973_v34 = vld [vmem:[%s12303_s17 + $0x38] sm:$0xff] }
0x1cab   :  { %v9324_v52 = vpop.eup %9323  ;;  %v6126_v9 = vadd.f32 1.0, %v9322_v12  ;;  %v6988_v12 = vld [vmem:[%s12303_s17 + $0xb0] sm:$0xff] }
0x1cac   :  { %v6139_v46 = vmul.f32 0.5, %v6127_v41  ;;  %v6120_v19 = vadd.f32 1.0, %v9324_v52  ;;  %v6974_v41 = vld [vmem:[%s12303_s17 + $0x40] sm:$0xff]  ;;  %v6987_v52 = vld [vmem:[%s12303_s17 + $0xa8] sm:$0xff] }
0x1cad   :  { %6842 = vmatpush2.bf16.msra.mxu1 %v9195_v51  ;;  %v6138_v40 = vmul.f32 0.5, %v6126_v9  ;;  %v6976_v51 = vld [vmem:[%s12303_s17 + $0x50] sm:$0xff]  ;;  %v6985_v9 = vld [vmem:[%s12303_s17 + $0x98] sm:$0xff] }
0x1cae   :  { %6843 = vmatprep.subr.bf16.mxu1 %v9200_v61  ;;  %v6151_v18 = vmul.f32 %v6139_v46, %v6042_v13  ;;  %v6132_v28 = vmul.f32 0.5, %v6120_v19  ;;  %v9210_v13 = vld [vmem:[%s12301_s15 + $0x580] ss:$8 sps:$4 sm:$0xff]   ;;  %v6972_v46 = vld [vmem:[%s12303_s17 + $0x30] sm:$0xff] }
0x1caf   :  { %v6150_v44 = vmul.f32 %v6138_v40, %v12004_v0  ;;  %v6975_v61 = vld [vmem:[%s12303_s17 + $0x48] sm:$0xff]  ;;  %v7102_v40 = vld [vmem:[%s12307_s21 + $0x78] sm:$0xff] }
0x1cb0   :  { %v6157_v36 = vpack.c.bf16 %v6151_v18, %v6145_v16  ;;  %v6144_v31 = vmul.f32 %v6132_v28, %v12009_v4  ;;  %v6970_v16 = vld [vmem:[%s12303_s17 + $0x20] sm:$0xff]  ;;  %v6969_v18 = vld [vmem:[%s12303_s17 + $0x18] sm:$0xff]  ;;  %v6983_v19 = vld [vmem:[%s12303_s17 + $0x88] sm:$0xff] }
0x1cb1   :  { %6844 = vmatpush2.bf16.msra.mxu1 %v9198_v39  ;;  %v6971_v39 = vld [vmem:[%s12303_s17 + $0x28] sm:$0xff] }
0x1cb2   :  { %6853 = vmatprep.mubr.bf16.mxu1 %v6157_v36  ;;  %6845 = vmatprep.subr.bf16.mxu1 %v9203_v8  ;;  %v6156_v14 = vpack.c.bf16 %v6150_v44, %v6144_v31  ;;  %v6968_v8 = vld [vmem:[%s12303_s17 + $0x10] sm:$0xff]  ;;  %v6967_v36 = vld [vmem:[%s12303_s17 + $0x8] sm:$0xff]  ;;  %v7098_v44 = vld [vmem:[%s12307_s21 + $0x58] sm:$0xff] }
0x1cb3   :  { %v7100_v28 = vld [vmem:[%s12307_s21 + $0x68] sm:$0xff]  ;;  %v7097_v31 = vld [vmem:[%s12307_s21 + $0x50] sm:$0xff] }
0x1cb5   :  { %6846 = vmatpush2.bf16.msra.mxu1 %v9201_v63  ;;  %v6966_v63 = vld [vmem:[%s12303_s17] sm:$0xff] }
0x1cb6   :  { %6847 = vmatprep.subr.bf16.mxu1 %v9206_v62  ;;  %v6989_v62 = vld [vmem:[%s12303_s17 + $0xb8] sm:$0xff] }
0x1cb9   :  { %6848 = vmatpush2.bf16.msra.mxu1 %v9204_v6  ;;  %v6986_v6 = vld [vmem:[%s12303_s17 + $0xa0] sm:$0xff] }
0x1cba   :  { %6849 = vmatprep.subr.bf16.mxu1 %v9209_v22  ;;  %v6984_v22 = vld [vmem:[%s12303_s17 + $0x90] sm:$0xff] }
0x1cbd   :  { %6850 = vmatpush2.bf16.msra.mxu1 %v9207_v33  ;;  %v6982_v33 = vld [vmem:[%s12303_s17 + $0x80] sm:$0xff] }
0x1cbe   :  { %6851 = vmatprep.subr.bf16.mxu1 %v9212_v17  ;;  %v7101_v17 = vld [vmem:[%s12307_s21 + $0x70] sm:$0xff] }
0x1cc1   :  { %6852 = vmatpush2.bf16.msra.mxu1 %v9210_v13  ;;  %v7099_v13 = vld [vmem:[%s12307_s21 + $0x60] sm:$0xff] }
0x1cc2   :  { %8285 = vmatprep.subr.mxu1 %v9351_v26 }
0x1cc4   :  { %6854 = vmatmul.mubr.bf16.vlgmr.msra.gmra.mxu1 %v6156_v14  ;;  %v7096_v14 = vld [vmem:[%s12307_s21 + $0x48] sm:$0xff] }
0x1cc5   :  { %8286 = vmatpush3.msra.mxu1 %v7102_v40  ;;  %8317 = vmatprep.mubr.msk.f32.mxu1 %vm9352_vm5, %v9351_v26 }
0x1cc6   :  { %8287 = vmatprep.subr.mxu1 %v9351_v26 }
0x1cc7   :  { %8288 = vmatpush3.msra.mxu1 %v7101_v17 }
0x1cc8   :  { %8289 = vmatprep.subr.mxu1 %v9351_v26 }
0x1cc9   :  { %8290 = vmatpush3.msra.mxu1 %v7100_v28 }
0x1cca   :  { %8291 = vmatprep.subr.mxu1 %v9351_v26 }
0x1ccb   :  { %8292 = vmatpush3.msra.mxu1 %v7099_v13 }
0x1ccc   :  { %8293 = vmatprep.subr.mxu1 %v9351_v26 }
0x1ccd   :  { %8294 = vmatpush3.msra.mxu1 %v7098_v44 }
0x1cce   :  { %8295 = vmatprep.subr.mxu1 %v9351_v26 }
0x1ccf   :  { %8296 = vmatpush3.msra.mxu1 %v7097_v31 }
0x1cd0   :  { %8297 = vmatprep.subr.mxu1 %v9351_v26 }
0x1cd1   :  { %8298 = vmatpush3.msra.mxu1 %v7096_v14 }
0x1cd2   :  { %8299 = vmatprep.subr.mxu1 %v9351_v26 }
0x1d44   :  { %v6769_v21 = vpop.f32.mrf.mxu1 }
0x1d45   :  { %v6812_v29 = vpop.f32.mrf.mxu0 }
0x1d46   :  { %v6771_v7 = vpop.f32.mrf.mxu1  ;;  %v6813_v3 = vadd.f32 %v6812_v29, %v6769_v21  ;;  %v7095_v21 = vld [vmem:[%s12307_s21 + $0x40] sm:$0xff]  ;;  %v7094_v29 = vld [vmem:[%s12307_s21 + $0x38] sm:$0xff] }
0x1d47   :  { %v6814_v35 = vpop.f32.mrf.mxu0  ;;  %8300 = vmatpush3.msra.mxu1 %v7095_v21 }
0x1d48   :  { %v6773_v10 = vpop.f32.mrf.mxu1  ;;  %v6815_v43 = vadd.f32 %v6814_v35, %v6771_v7  ;;  %8301 = vmatprep.subr.mxu1 %v9351_v26  ;;  %v7093_v7 = vld [vmem:[%s12307_s21 + $0x30] sm:$0xff]  ;;  %v7092_v35 = vld [vmem:[%s12307_s21 + $0x28] sm:$0xff] }
0x1d49   :  { %v6816_v20 = vpop.f32.mrf.mxu0  ;;  %8302 = vmatpush3.msra.mxu1 %v7094_v29 }
0x1d4a   :  { %v6775_v50 = vpop.f32.mrf.mxu1  ;;  %v6817_v4 = vadd.f32 %v6816_v20, %v6773_v10  ;;  %8303 = vmatprep.subr.mxu1 %v9351_v26 }
0x1d4b   :  { %v6818_v0 = vpop.f32.mrf.mxu0  ;;  %8304 = vmatpush3.msra.mxu1 %v7093_v7 }
0x1d4c   :  { %v6819_v47 = vadd.f32 %v6818_v0, %v6775_v50  ;;  %8305 = vmatprep.subr.mxu1 %v9351_v26  ;;  %v7091_v50 = vld [vmem:[%s12307_s21 + $0x20] sm:$0xff]  ;;  %v7089_v0 = vld [vmem:[%s12307_s21 + $0x10] sm:$0xff] }
0x1d4d   :  { %8306 = vmatpush3.msra.mxu1 %v7092_v35 }
0x1d4e   :  { %8307 = vmatprep.subr.mxu1 %v9351_v26 }
0x1d4f   :  { %8308 = vmatpush3.msra.mxu1 %v7091_v50 }
0x1d50   :  { %8309 = vmatprep.subr.mxu1 %v9351_v26 }
0x1d84   :  { %v6855_v11 = vpop.f32.mrf.mxu1 }
0x1d85   :  { %v6856_v30 = vadd.f32 %v6855_v11, %v6813_v3  ;;  %v7090_v11 = vld [vmem:[%s12307_s21 + $0x18] sm:$0xff] }
0x1d86   :  { %v6857_v5 = vpop.f32.mrf.mxu1  ;;  %8310 = vmatpush3.msra.mxu1 %v7090_v11 }
0x1d87   :  { %v6858_v27 = vadd.f32 %v6857_v5, %v6815_v43  ;;  %v6864_v48 = vadd.f32 %v6856_v30, %v11435_v1  ;;  %v6979_v1 = vld [vmem:[%s12303_s17 + $0x68] sm:$0xff]  ;;  %8311 = vmatprep.subr.mxu1 %v9351_v26  ;;  %v7087_v43 = vld [vmem:[%s12307_s21] sm:$0xff] }
0x1d88   :  { %v6859_v25 = vpop.f32.mrf.mxu1  ;;  %8312 = vmatpush3.msra.mxu1 %v7089_v0  ;;  %v7088_v5 = vld [vmem:[%s12307_s21 + $0x8] sm:$0xff] }
0x1d89   :  { %v6860_v32 = vadd.f32 %v6859_v25, %v6817_v4  ;;  %v6865_v59 = vadd.f32 %v6858_v27, %v11432_v38  ;;  %v6881_v49 = vadd.f32 %v6874_v37, %v6864_v48  ;;  %v6885_v38 = vld [vmem:[%s12335_s6] sm:$0x3]  ;;  %8313 = vmatprep.subr.mxu1 %v9351_v26 }
0x1d8a   :  { %v6861_v54 = vpop.f32.mrf.mxu1  ;;  %8314 = vmatpush3.msra.mxu1 %v7088_v5  ;;  %v8131_v4 = vld [vmem:[%s12304_s18] ss:$0 sm:$0xff]  ;;  %s9353_s18 = smov [#allocation2]  }
0x1d8b   :  { %v6862_v57 = vadd.f32 %v6861_v54, %v6819_v47  ;;  %v6866_v58 = vadd.f32 %v6860_v32, %v11437_v42  ;;  %v6882_v45 = vadd.f32 %v6878_v60, %v6865_v59  ;;  %v6978_v42 = vld [vmem:[%s12303_s17 + $0x60] sm:$0xff]  ;;  %8315 = vmatprep.subr.mxu1 %v9351_v26  ;;  %s7188_s12 = sshll.u32 %s9353_s18, 4  ;;  %s7189_s12 = int_to_ptr.vmem [resolvable:$true] %s7188_s12 }
0x1d8c   :  { %8316 = vmatpush3.msra.mxu1 %v7087_v43  ;;  %v8133_v25 = vld [vmem:[%s12305_s19] ss:$0 sm:$0xff]  ;;  %s9327_s19 = scalar_lea.vmem %s7189_s12, 32  ;;  %p9332_p1 = scmp.lt.s32.totalorder %s7189_s12, %s7189_s12 }
0x1d8d   :  { %v6867_v56 = vadd.f32 %v6862_v57, %v11443_v53  ;;  %v6883_v2 = vadd.f32 %v6874_v37, %v6866_v58  ;;  %v6977_v53 = vld [vmem:[%s12303_s17 + $0x58] sm:$0xff]  ;;  %v8134_v27 = vld [vmem:[%s12306_s20] ss:$0 sm:$0xff]  ;;  %p9328_p0 = scmp.ne.s32.totalorder %s7189_s12, %s9327_s19  ;;  %p9333_p2 = scmp.lt.s32.totalorder %s9327_s19, %s9327_s19 }
0x1d8f   :  { %v6884_v15 = vadd.f32 %v6878_v60, %v6867_v56  ;;  %p9334_p3 = por %p9333_p2, %p9332_p1 }
0x1d91   :  { %8128 = vmatprep.subr.msk.mxu0 %vm812_vm1, %v6884_v15  ;;  %p9335_p4 = pnand %p9334_p3, %p9328_p0 }
0x1d92   :  { %8129 = vmatpush1.msk.msra.mxu0 %vm812_vm1, %v6883_v2 }
0x1d93   :  { %6925 = vmatprep.subr.mxu0 %v6882_v45 }
0x1d94   :  { %6926 = vmatpush1.msra.mxu0 %v6881_v49 }
0x1d95   :  { %8130 = vmatmul.mubr.msk.f32.vlgmr.msra.gmra.mxu0 %vm1541_vm4, %v6885_v38  ;;  %7000 = vmatprep.subr.mxu0 %v9351_v26 }
0x1d96   :  { %7001 = vmatpush1.msra.mxu0 %v6981_v23 }
0x1d97   :  { %7002 = vmatprep.subr.mxu0 %v9351_v26 }
0x1d98   :  { %7003 = vmatpush1.msra.mxu0 %v6980_v24 }
0x1d99   :  { %7004 = vmatprep.subr.mxu0 %v9351_v26 }
0x1d9a   :  { %7005 = vmatpush1.msra.mxu0 %v6979_v1 }
0x1d9b   :  { %7006 = vmatprep.subr.mxu0 %v9351_v26 }
0x1d9c   :  { %7007 = vmatpush1.msra.mxu0 %v6978_v42 }
0x1d9d   :  { %7008 = vmatprep.subr.mxu0 %v9351_v26 }
0x1d9e   :  { %7009 = vmatpush1.msra.mxu0 %v6977_v53 }
0x1d9f   :  { %7010 = vmatprep.subr.mxu0 %v9351_v26 }
0x1da0   :  { %7011 = vmatpush1.msra.mxu0 %v6976_v51 }
0x1da1   :  { %7012 = vmatprep.subr.mxu0 %v9351_v26 }
0x1da2   :  { %7013 = vmatpush1.msra.mxu0 %v6975_v61 }
0x1da3   :  { %7014 = vmatprep.subr.mxu0 %v9351_v26 }
0x1da4   :  { %7015 = vmatpush1.msra.mxu0 %v6974_v41 }
0x1da5   :  { %7016 = vmatprep.subr.mxu0 %v9351_v26 }
0x1da6   :  { %7017 = vmatpush1.msra.mxu0 %v6973_v34 }
0x1da7   :  { %7018 = vmatprep.subr.mxu0 %v9351_v26 }
0x1da8   :  { %7019 = vmatpush1.msra.mxu0 %v6972_v46 }
0x1da9   :  { %7020 = vmatprep.subr.mxu0 %v9351_v26 }
0x1daa   :  { %7021 = vmatpush1.msra.mxu0 %v6971_v39 }
0x1dab   :  { %7022 = vmatprep.subr.mxu0 %v9351_v26 }
0x1dac   :  { %7023 = vmatpush1.msra.mxu0 %v6970_v16 }
0x1dad   :  { %7024 = vmatprep.subr.mxu0 %v9351_v26 }
0x1dae   :  { %7025 = vmatpush1.msra.mxu0 %v6969_v18 }
0x1daf   :  { %7026 = vmatprep.subr.mxu0 %v9351_v26 }
0x1db0   :  { %7027 = vmatpush1.msra.mxu0 %v6968_v8 }
0x1db1   :  { %7028 = vmatprep.subr.mxu0 %v9351_v26 }
0x1db2   :  { %7029 = vmatpush1.msra.mxu0 %v6967_v36 }
0x1db3   :  { %7030 = vmatprep.subr.mxu0 %v9351_v26 }
0x1db4   :  { %7031 = vmatpush1.msra.mxu0 %v6966_v63 }
0x1db5   :  { %7048 = vmatprep.subr.mxu0 %v9351_v26 }
0x1db6   :  { %7049 = vmatpush2.msra.mxu0 %v6989_v62 }
0x1db7   :  { %7050 = vmatprep.subr.mxu0 %v9351_v26 }
0x1db8   :  { %7051 = vmatpush2.msra.mxu0 %v6988_v12 }
0x1db9   :  { %7052 = vmatprep.subr.mxu0 %v9351_v26 }
0x1dba   :  { %7053 = vmatpush2.msra.mxu0 %v6987_v52 }
0x1dbb   :  { %7054 = vmatprep.subr.mxu0 %v9351_v26 }
0x1dbc   :  { %7055 = vmatpush2.msra.mxu0 %v6986_v6 }
0x1dbd   :  { %7056 = vmatprep.subr.mxu0 %v9351_v26 }
0x1dbe   :  { %7057 = vmatpush2.msra.mxu0 %v6985_v9 }
0x1dbf   :  { %7058 = vmatprep.subr.mxu0 %v9351_v26 }
0x1dc0   :  { %7059 = vmatpush2.msra.mxu0 %v6984_v22 }
0x1dc1   :  { %7060 = vmatprep.subr.mxu0 %v9351_v26 }
0x1dc2   :  { %7061 = vmatpush2.msra.mxu0 %v6983_v19 }
0x1dc3   :  { %7062 = vmatprep.subr.mxu0 %v9351_v26  ;;  %v8135_v26 = vld [vmem:[%s12308_s22] ss:$0 sm:$0xff] }
0x1dc4   :  { %7063 = vmatpush2.msra.mxu0 %v6982_v33 }
0x1e55   :  { %v6961_v10 = vpop.f32.mrf.mxu0 }
0x1e57   :  { %v6963_v20 = vpop.f32.mrf.mxu0 }
0x1e58   :  { %8132 = vmatprep.mubr.msk.f32.mxu0 %vm807_vm0, %v6963_v20 }
0x1e59   :  { %7065 = vmatmul.mubr.f32.vlgmr.msra.gmra.mxu0 %v6961_v10 }
0x1f19   :  { %v7066_v3 = vpop.f32.mrf.mxu0 }
0x1f1a   :  { %v7067_v47 = vadd.f32 %v8131_v4, %v7066_v3 }
0x1f1b   :  { %v7068_v32 = vpop.f32.mrf.mxu0 }
0x1f1c   :  { %v7077_v30 = vmul.f32 %v8133_v25, %v7067_v47 }
0x1f1e   :  { %v7085_v54 = vadd.f32 %v8134_v27, %v7077_v30 }
0x1f20   :  { %v7086_v55 = vmax.f32 %v7085_v54, 0.0 }
0x1f22   :  { %8318 = vmatmul.mubr.f32.vlgmr.msra.gmra.mxu1 %v7086_v55 }
0x1fe2   :  { %v7176_v57 = vpop.f32.mrf.mxu1 }
0x1fe3   :  { %v7177_v58 = vadd.f32 %v8135_v26, %v7176_v57 }
0x1fe4   :  { %v8319_v59 = vpop.f32.mrf.mxu1 }
0x1fe5   :  { %7181 = vst.msk [vmem:[#allocation2] sm:$0x3] %vm7180_vm6, %v7177_v58 }
0x1fe6   :  { %9338 = shalt.err (!%p9335_p4)
}
0x1fe7   :  { %7191 = dma.vmem_to_hbm [thread:$0]  %s7189_s12, 32, %s12309_s23, [#allocation3]  }
0x1fe8   :  { %9347 = dma.done.wait [#allocation3], 32  }
0x1fe9   :  { %9348 = vsyncadd [#allocation3], 4294967264 }
0x1fea   :  { %7195 = vsyncpa [#allocation3], 1 }

</bundles_post_ra>
